<compile_context>
chip_gen: v7x
topology: tpu7x:2x2x1
jax: 0.10.0
libtpu: 0.0.40
codegen_flags: <defaults>
</compile_context>

<pallas_src>
import functools

import jax
import jax.numpy as jnp
from jax import lax
from jax.experimental import pallas as pl
from jax.experimental.pallas import tpu as pltpu

P_DROP = 0.1
EPS = 1e-12
HIDDEN = 256
# keep iff bits >= DROP_THRESHOLD  -> P(keep) = 1 - p (to within 2^-32)
DROP_THRESHOLD = int(round(P_DROP * (2 ** 32)))
KEEP_SCALE = 1.0 / (1.0 - P_DROP)


def _dropout_add_layernorm_kernel(*refs, train: bool):
    if train:
        bits_ref, x_ref, r_ref, gamma_ref, beta_ref, o_ref = refs
    else:
        x_ref, r_ref, gamma_ref, beta_ref, o_ref = refs

    x = x_ref[...].astype(jnp.float32)            # (TILE_ROWS, HIDDEN)
    r = r_ref[...].astype(jnp.float32)            # (TILE_ROWS, HIDDEN)

    if train:
        # Dropout(p=0.1): keep with prob (1-p), scale kept values by 1/(1-p).
        # Integer-threshold compare on raw uint32 bits; fold select + residual add.
        keep = bits_ref[...] >= jnp.uint32(DROP_THRESHOLD)
        y = x * (keep.astype(jnp.float32) * jnp.float32(KEEP_SCALE)) + r
    else:
        y = x + r

    # LayerNorm over the hidden (last) axis, eps=1e-12, elementwise affine.
    # One-pass statistics: the two reductions are independent and overlap in the XLU.
    inv_h = jnp.float32(1.0 / HIDDEN)
    s1 = jnp.sum(y, axis=-1, keepdims=True)
    s2 = jnp.sum(y * y, axis=-1, keepdims=True)
    mean = s1 * inv_h
    var = jnp.maximum(s2 * inv_h - mean * mean, jnp.float32(0.0))
    inv = lax.rsqrt(var + jnp.float32(EPS))
    out = (y - mean) * inv * gamma_ref[...] + beta_ref[...]
    o_ref[...] = out.astype(o_ref.dtype)


def _pick_tile_rows(rows: int) -> int:
    """One tile on single-TC chips; split in two for v7x (2 TensorCores/chip)."""
    kind = ""
    try:
        kind = jax.devices()[0].device_kind.lower()
    except Exception:
        pass
    if "v7" in kind and rows % 2 == 0 and (rows // 2) % 8 == 0:
        return rows // 2
    return rows


def dropout_add_layernorm(x524, x491, gamma, beta, *, key=None, train=True):
    """x524, x491: (B, S, H) float32. Returns LayerNorm(Dropout(x524) + x491)."""
    B, S, H = x524.shape
    assert H == HIDDEN
    rows = B * S

    tile_rows = _pick_tile_rows(rows)
    assert rows % tile_rows == 0
    grid = (rows // tile_rows,)

    x2 = x524.reshape(rows, H)
    r2 = x491.reshape(rows, H)
    gamma2 = gamma.reshape(1, H).astype(jnp.float32)
    beta2 = beta.reshape(1, H).astype(jnp.float32)

    row_spec = pl.BlockSpec((tile_rows, H), lambda i: (i, 0))
    vec_spec = pl.BlockSpec((1, H), lambda i: (0, 0))

    kernel = functools.partial(_dropout_add_layernorm_kernel, train=train)

    if train:
        if key is None:
            key = jax.random.PRNGKey(0)
        bits = jax.random.bits(key, (rows, H), dtype=jnp.uint32)
        in_specs = [row_spec, row_spec, row_spec, vec_spec, vec_spec]
        args = (bits, x2, r2, gamma2, beta2)
    else:
        in_specs = [row_spec, row_spec, vec_spec, vec_spec]
        args = (x2, r2, gamma2, beta2)

    out = pl.pallas_call(
        kernel,
        out_shape=jax.ShapeDtypeStruct((rows, H), x524.dtype),
        grid=grid,
        in_specs=in_specs,
        out_specs=row_spec,
        compiler_params=pltpu.CompilerParams(
            dimension_semantics=("parallel",)),
    )(*args)

    # TODO(synk): for real end-to-end wins this epilogue should be fused into the
    # producing GEMM's pallas_call rather than run standalone (~1.2 MiB of traffic).
    return out.reshape(B, S, H)


if __name__ == "__main__":
    key = jax.random.PRNGKey(0)
    k1, k2, k3 = jax.random.split(key, 3)

    B, S, H = 1, 384, 256
    x524 = jax.random.normal(k1, (B, S, H), dtype=jnp.float32)
    x491 = jax.random.normal(k2, (B, S, H), dtype=jnp.float32)

    # nn.LayerNorm((256,)) default init: weight=ones, bias=zeros
    gamma = jnp.ones((H,), dtype=jnp.float32)
    beta = jnp.zeros((H,), dtype=jnp.float32)

    # train=True matches the freshly-constructed PyTorch module (training mode).
    out = dropout_add_layernorm(x524, x491, gamma, beta, key=k3, train=True)
    out = jax.block_until_ready(out)
    assert out.shape == (B, S, H)
    assert bool(jnp.all(jnp.isfinite(out)))

    # sanity: eval-mode (dropout = identity) path matches a pure-JAX reference
    out_eval = jax.block_until_ready(
        dropout_add_layernorm(x524, x491, gamma, beta, train=False))
    y = x524 + x491
    mean = jnp.mean(y, axis=-1, keepdims=True)
    var = jnp.mean((y - mean) ** 2, axis=-1, keepdims=True)
    ref = (y - mean) * lax.rsqrt(var + EPS) * gamma + beta
    assert jnp.allclose(out_eval, ref, atol=1e-5, rtol=1e-5)

    print("KERNEL_OK")
</pallas_src>

<mosaic_0001>
module attributes {stable_mosaic.version = 11 : i64} {
  func.func @_dropout_add_layernorm_kernel(%arg0: i32, %arg1: memref<384x256xi32, #tpu.memory_space<vmem>>, %arg2: memref<384x256xf32, #tpu.memory_space<vmem>>, %arg3: memref<384x256xf32, #tpu.memory_space<vmem>>, %arg4: memref<1x256xf32, #tpu.memory_space<vmem>>, %arg5: memref<1x256xf32, #tpu.memory_space<vmem>>, %arg6: memref<384x256xf32, #tpu.memory_space<vmem>>) attributes {dimension_semantics = [#tpu.dimension_semantics<parallel>], iteration_bounds = array<i64: 1>, scalar_prefetch = 0 : i64, scratch_operands = 0 : i64, tpu.core_type = #tpu.core_type<tc>, window_params = [{transform_indices = @transform_0, window_bounds = array<i64: 384, 256>}, {transform_indices = @transform_1, window_bounds = array<i64: 384, 256>}, {transform_indices = @transform_2, window_bounds = array<i64: 384, 256>}, {pipeline_mode = #tpu.pipeline_mode<synchronous>, transform_indices = @transform_3, window_bounds = array<i64: 1, 256>}, {pipeline_mode = #tpu.pipeline_mode<synchronous>, transform_indices = @transform_4, window_bounds = array<i64: 1, 256>}, {transform_indices = @transform_5, window_bounds = array<i64: 384, 256>}]} {
    %c0 = arith.constant 0 : index
    %c0_0 = arith.constant 0 : index
    %0 = vector.load %arg2[%c0, %c0_0] : memref<384x256xf32, #tpu.memory_space<vmem>>, vector<384x256xf32>
    %c0_1 = arith.constant 0 : index
    %c0_2 = arith.constant 0 : index
    %1 = vector.load %arg3[%c0_1, %c0_2] : memref<384x256xf32, #tpu.memory_space<vmem>>, vector<384x256xf32>
    %c0_3 = arith.constant 0 : index
    %c0_4 = arith.constant 0 : index
    %2 = vector.load %arg1[%c0_3, %c0_4] : memref<384x256xi32, #tpu.memory_space<vmem>>, vector<384x256xi32>
    %c429496730_i32 = arith.constant 429496730 : i32
    %3 = vector.broadcast %c429496730_i32 : i32 to vector<384x256xi32>
    %4 = arith.cmpi uge, %2, %3 : vector<384x256xi32>
    %5 = arith.extui %4 : vector<384x256xi1> to vector<384x256xi32>
    %6 = arith.sitofp %5 : vector<384x256xi32> to vector<384x256xf32>
    %cst = arith.constant 1.11111116 : f32
    %7 = vector.broadcast %cst : f32 to vector<384x256xf32>
    %8 = arith.mulf %6, %7 : vector<384x256xf32>
    %9 = arith.mulf %0, %8 : vector<384x256xf32>
    %10 = arith.addf %9, %1 : vector<384x256xf32>
    %cst_5 = arith.constant dense<0.000000e+00> : vector<384xf32>
    %11 = vector.multi_reduction <add>, %10, %cst_5 [1] : vector<384x256xf32> to vector<384xf32>
    %12 = vector.shape_cast %11 : vector<384xf32> to vector<384x1xf32>
    %13 = arith.mulf %10, %10 : vector<384x256xf32>
    %cst_6 = arith.constant dense<0.000000e+00> : vector<384xf32>
    %14 = vector.multi_reduction <add>, %13, %cst_6 [1] : vector<384x256xf32> to vector<384xf32>
    %15 = vector.shape_cast %14 : vector<384xf32> to vector<384x1xf32>
    %cst_7 = arith.constant 3.906250e-03 : f32
    %16 = vector.broadcast %cst_7 : f32 to vector<384x1xf32>
    %17 = arith.mulf %12, %16 : vector<384x1xf32>
    %cst_8 = arith.constant 3.906250e-03 : f32
    %18 = vector.broadcast %cst_8 : f32 to vector<384x1xf32>
    %19 = arith.mulf %15, %18 : vector<384x1xf32>
    %20 = arith.mulf %17, %17 : vector<384x1xf32>
    %21 = arith.subf %19, %20 : vector<384x1xf32>
    %cst_9 = arith.constant 0.000000e+00 : f32
    %22 = vector.broadcast %cst_9 : f32 to vector<384x1xf32>
    %23 = arith.maximumf %21, %22 : vector<384x1xf32>
    %cst_10 = arith.constant 9.99999996E-13 : f32
    %24 = vector.broadcast %cst_10 : f32 to vector<384x1xf32>
    %25 = arith.addf %23, %24 : vector<384x1xf32>
    %26 = math.rsqrt %25 : vector<384x1xf32>
    %27 = vector.broadcast %17 : vector<384x1xf32> to vector<384x256xf32>
    %28 = arith.subf %10, %27 : vector<384x256xf32>
    %29 = vector.broadcast %26 : vector<384x1xf32> to vector<384x256xf32>
    %30 = arith.mulf %28, %29 : vector<384x256xf32>
    %c0_11 = arith.constant 0 : index
    %c0_12 = arith.constant 0 : index
    %31 = vector.load %arg4[%c0_11, %c0_12] : memref<1x256xf32, #tpu.memory_space<vmem>>, vector<1x256xf32>
    %32 = vector.broadcast %31 : vector<1x256xf32> to vector<384x256xf32>
    %33 = arith.mulf %30, %32 : vector<384x256xf32>
    %c0_13 = arith.constant 0 : index
    %c0_14 = arith.constant 0 : index
    %34 = vector.load %arg5[%c0_13, %c0_14] : memref<1x256xf32, #tpu.memory_space<vmem>>, vector<1x256xf32>
    %35 = vector.broadcast %34 : vector<1x256xf32> to vector<384x256xf32>
    %36 = arith.addf %33, %35 : vector<384x256xf32>
    %c0_15 = arith.constant 0 : index
    %c0_16 = arith.constant 0 : index
    %37 = vector.load %arg6[%c0_15, %c0_16] : memref<384x256xf32, #tpu.memory_space<vmem>>, vector<384x256xf32>
    tpu.vector_store %arg6[%c0_15, %c0_16], %36 {strides = array<i32>} : memref<384x256xf32, #tpu.memory_space<vmem>>, vector<384x256xf32>,
    return
  }
  func.func @transform_0(%arg0: i32) -> (i32, i32) {
    %c0_i32 = arith.constant 0 : i32
    %c0_i32_0 = arith.constant 0 : i32
    return %arg0, %c0_i32 : i32, i32
  }
  func.func @transform_1(%arg0: i32) -> (i32, i32) {
    %c0_i32 = arith.constant 0 : i32
    %c0_i32_0 = arith.constant 0 : i32
    return %arg0, %c0_i32 : i32, i32
  }
  func.func @transform_2(%arg0: i32) -> (i32, i32) {
    %c0_i32 = arith.constant 0 : i32
    %c0_i32_0 = arith.constant 0 : i32
    return %arg0, %c0_i32 : i32, i32
  }
  func.func @transform_3(%arg0: i32) -> (i32, i32) {
    %c0_i32 = arith.constant 0 : i32
    %c0_i32_0 = arith.constant 0 : i32
    %c0_i32_1 = arith.constant 0 : i32
    return %c0_i32, %c0_i32_0 : i32, i32
  }
  func.func @transform_4(%arg0: i32) -> (i32, i32) {
    %c0_i32 = arith.constant 0 : i32
    %c0_i32_0 = arith.constant 0 : i32
    %c0_i32_1 = arith.constant 0 : i32
    return %c0_i32, %c0_i32_0 : i32, i32
  }
  func.func @transform_5(%arg0: i32) -> (i32, i32) {
    %c0_i32 = arith.constant 0 : i32
    %c0_i32_0 = arith.constant 0 : i32
    return %arg0, %c0_i32 : i32, i32
  }
}

</mosaic_0001>

<bundles_post_ra>
// kernel: tpu_custom_call.1
= control target key start
LH: loop header
LB: loop body
LE: loop exit
PB: predicated region body
PF: predicated region fallthrough
CT: control target
= control target key end

     0   :  { %10 = vsyncpa [#allocation3], 0  ;;  %s4334_s0 = inlined_call_operand.hbm [shape: u32[384,256], index: 0, kind: input, shape index: {}]   ;;  %s4335_s1 = inlined_call_operand.hbm [shape: f32[384,256], index: 1, kind: input, shape index: {}]   ;;  %s4336_s2 = inlined_call_operand.hbm [shape: f32[384,256], index: 2, kind: input, shape index: {}]   ;;  %s4337_s3 = inlined_call_operand.vmem [shape: f32[1,256], index: 3, kind: input, shape index: {}]   ;;  %s4338_s4 = inlined_call_operand.vmem [shape: f32[1,256], index: 4, kind: input, shape index: {}]   ;;  %s4339_s5 = inlined_call_operand.hbm [shape: f32[384,256], index: 5, kind: output, shape index: {}]  }
   0x1   :  { %11 = vsyncpa [#allocation6], 0 }
   0x2   :  { %12 = vsyncpa [#allocation4], 0  ;;  %s2461_s18 = smov [#allocation5]   ;;  %s2462_s20 = smov [#allocation2]  }
   0x3   :  { %s30_s19 = sshll.u32 %s2461_s18, 4  ;;  %s18_s21 = sshll.u32 %s2462_s20, 4  ;;  %s31_s19 = int_to_ptr.vmem [resolvable:$true] %s30_s19  ;;  %s2498_s21 = int_to_ptr.vmem [resolvable:$true] %s18_s21 }
   0x4   :  { %s2367_s24 = scalar_lea.hbm %s4335_s1, 12288 }
   0x5   :  { %p2368_p0 = scmp.ne.s32.totalorder %s4335_s1, %s2367_s24  ;;  %p2371_p1 = scmp.lt.u32.totalorder %s2367_s24, %s4335_s1 }
   0x7   :  { %p2373_p2 = pnand %p2371_p1, %p2368_p0 }
   0x9   :  { %2376 = shalt.err (!%p2373_p2)
}
   0xa   :  { %s2377_s29 = scalar_lea.vmem %s31_s19, 12288  ;;  %p2382_p4 = scmp.lt.s32.totalorder %s31_s19, %s31_s19 }
   0xb   :  { %p2378_p3 = scmp.ne.s32.totalorder %s31_s19, %s2377_s29  ;;  %p2383_p5 = scmp.lt.s32.totalorder %s2377_s29, %s2377_s29 }
   0xd   :  { %p2384_p6 = por %p2383_p5, %p2382_p4 }
   0xf   :  { %p2385_p7 = pnand %p2384_p6, %p2378_p3 }
  0x11   :  { %2388 = shalt.err (!%p2385_p7)
}
  0x12   :  { %s2463_s30 = smov 256   ;;  %s2464_s6 = smov 16  }
  0x13   :  { %36 = dma.hbm_to_vmem [thread:$0]  %s4335_s1, 12288, %s31_s19, [#allocation6], %s2463_s30, %s2463_s30, %s2464_s6  }
  0x14   :  { %s2389_s11 = scalar_lea.hbm %s4334_s0, 12288 }
  0x15   :  { %p2390_p8 = scmp.ne.s32.totalorder %s4334_s0, %s2389_s11  ;;  %p2393_p9 = scmp.lt.u32.totalorder %s2389_s11, %s4334_s0 }
  0x17   :  { %p2395_p10 = pnand %p2393_p9, %p2390_p8 }
  0x19   :  { %2398 = shalt.err (!%p2395_p10)
}
  0x1a   :  { %s2399_s16 = scalar_lea.vmem %s2498_s21, 12288  ;;  %p2404_p12 = scmp.lt.s32.totalorder %s2498_s21, %s2498_s21 }
  0x1b   :  { %p2400_p11 = scmp.ne.s32.totalorder %s2498_s21, %s2399_s16  ;;  %p2405_p13 = scmp.lt.s32.totalorder %s2399_s16, %s2399_s16 }
  0x1d   :  { %p2406_p0 = por %p2405_p13, %p2404_p12 }
  0x1f   :  { %p2407_p1 = pnand %p2406_p0, %p2400_p11 }
  0x21   :  { %2410 = shalt.err (!%p2407_p1)
}
  0x22   :  { %24 = dma.hbm_to_vmem [thread:$0]  %s4334_s0, 12288, %s2498_s21, [#allocation3], %s2463_s30, %s2463_s30, %s2464_s6  }
  0x23   :  { %s2465_s18 = smov [#allocation7]   ;;  %s2411_s23 = scalar_lea.hbm %s4336_s2, 12288 }
  0x24   :  { %s42_s19 = sshll.u32 %s2465_s18, 4  ;;  %p2412_p2 = scmp.ne.s32.totalorder %s4336_s2, %s2411_s23  ;;  %s43_s19 = int_to_ptr.vmem [resolvable:$true] %s42_s19 }
  0x25   :  { %p2415_p3 = scmp.lt.u32.totalorder %s2411_s23, %s4336_s2 }
  0x27   :  { %p2417_p4 = pnand %p2415_p3, %p2412_p2 }
  0x29   :  { %2420 = shalt.err (!%p2417_p4)
}
  0x2a   :  { %s2421_s28 = scalar_lea.vmem %s43_s19, 12288  ;;  %p2426_p6 = scmp.lt.s32.totalorder %s43_s19, %s43_s19 }
  0x2b   :  { %p2422_p5 = scmp.ne.s32.totalorder %s43_s19, %s2421_s28  ;;  %p2427_p7 = scmp.lt.s32.totalorder %s2421_s28, %s2421_s28 }
  0x2d   :  { %p2428_p8 = por %p2427_p7, %p2426_p6 }
  0x2f   :  { %p2429_p9 = pnand %p2428_p8, %p2422_p5 }
  0x31   :  { %2432 = shalt.err (!%p2429_p9)
}
  0x32   :  { %48 = dma.hbm_to_vmem [thread:$0]  %s4336_s2, 12288, %s43_s19, [#allocation6], %s2463_s30, %s2463_s30, %s2464_s6  }
  0x33   :  { %2455 = dma.done.wait [#allocation3], 12288  }
  0x34   :  { %2456 = vsyncadd [#allocation3], 4294955008 }
  0x35   :  { %2457 = dma.done.wait [#allocation6], 24576  }
  0x36   :  { %2458 = vsyncadd [#allocation6], 4294942720  ;;  %v258_v0 = vld [vmem:[#allocation2 + $0x20] sm:$0xff]  ;;  %v259_v1 = vld [vmem:[#allocation2 + $0x28] sm:$0xff]  ;;  %v4352_v5 = vmov 0.0  }
  0x37   :  { %v66_v2 = vld [vmem:[#allocation5 + $0x20] sm:$0xff]  ;;  %vm354_vm0 = vcmp.ge.u32.totalorder %v258_v0, 429496730  ;;  %vm355_vm1 = vcmp.ge.u32.totalorder %v259_v1, 429496730  ;;  %v67_v3 = vld [vmem:[#allocation5 + $0x28] sm:$0xff] }
  0x38   :  { %v162_v4 = vld [vmem:[#allocation7 + $0x20] sm:$0xff]  ;;  %v2172_v6 = vsel %vm354_vm0, 1.0, %v4352_v5  ;;  %v2173_v7 = vsel %vm355_vm1, 1.0, %v4352_v5  ;;  %v163_v9 = vld [vmem:[#allocation7 + $0x28] sm:$0xff]  ;;  %v260_v20 = vld [vmem:[#allocation2 + $0x30] sm:$0xff] }
  0x39   :  { %v254_v8 = vld [vmem:[#allocation2] sm:$0xff]  ;;  %v642_v10 = vmul.f32 1.1111112, %v2172_v6  ;;  %v643_v11 = vmul.f32 1.1111112, %v2173_v7  ;;  %v255_v12 = vld [vmem:[#allocation2 + $0x8] sm:$0xff] }
  0x3a   :  { %v62_v13 = vld [vmem:[#allocation5] sm:$0xff]  ;;  %v63_v14 = vld [vmem:[#allocation5 + $0x8] sm:$0xff]  ;;  %vm350_vm2 = vcmp.ge.u32.totalorder %v254_v8, 429496730  ;;  %vm351_vm3 = vcmp.ge.u32.totalorder %v255_v12, 429496730 }
  0x3b   :  { %v738_v15 = vmul.f32 %v642_v10, %v66_v2  ;;  %v739_v16 = vmul.f32 %v643_v11, %v67_v3  ;;  %v158_v17 = vld [vmem:[#allocation7] sm:$0xff]  ;;  %v2168_v18 = vsel %vm350_vm2, 1.0, %v4352_v5  ;;  %v2169_v19 = vsel %vm351_vm3, 1.0, %v4352_v5  ;;  %v261_v21 = vld [vmem:[#allocation2 + $0x38] sm:$0xff]  ;;  %v159_v26 = vld [vmem:[#allocation7 + $0x8] sm:$0xff] }
  0x3c   :  { %v638_v22 = vmul.f32 1.1111112, %v2168_v18  ;;  %v639_v23 = vmul.f32 1.1111112, %v2169_v19  ;;  %vm356_vm4 = vcmp.ge.u32.totalorder %v260_v20, 429496730 }
  0x3d   :  { %v2554_v24 = vadd.f32 %v738_v15, %v162_v4  ;;  %v2556_v25 = vadd.f32 %v739_v16, %v163_v9  ;;  %v68_v27 = vld [vmem:[#allocation5 + $0x30] sm:$0xff]  ;;  %v69_v28 = vld [vmem:[#allocation5 + $0x38] sm:$0xff]  ;;  %vm357_vm5 = vcmp.ge.u32.totalorder %v261_v21, 429496730  ;;  %v2174_v29 = vsel %vm356_vm4, 1.0, %v4352_v5  ;;  %v262_v61 = vld [vmem:[#allocation2 + $0x40] sm:$0xff] }
  0x3e   :  { %v734_v30 = vmul.f32 %v638_v22, %v62_v13  ;;  %v735_v31 = vmul.f32 %v639_v23, %v63_v14  ;;  %v164_v32 = vld [vmem:[#allocation7 + $0x30] sm:$0xff]  ;;  %v2175_v33 = vsel %vm357_vm5, 1.0, %v4352_v5  ;;  %v644_v34 = vmul.f32 1.1111112, %v2174_v29  ;;  %v257_v36 = vld [vmem:[#allocation2 + $0x18] sm:$0xff]  ;;  %v263_v1 = vld [vmem:[#allocation2 + $0x48] sm:$0xff] }
  0x3f   :  { %v256_v35 = vld [vmem:[#allocation2 + $0x10] sm:$0xff]  ;;  %v932_v37 = vadd.f32 %v2556_v25, %v2554_v24  ;;  %v645_v38 = vmul.f32 1.1111112, %v2175_v33  ;;  %vm353_vm7 = vcmp.ge.u32.totalorder %v257_v36, 429496730  ;;  %v165_v41 = vld [vmem:[#allocation7 + $0x38] sm:$0xff] }
  0x40   :  { %vm352_vm6 = vcmp.ge.u32.totalorder %v256_v35, 429496730  ;;  %v2562_v39 = vadd.f32 %v734_v30, %v158_v17  ;;  %v2564_v40 = vadd.f32 %v735_v31, %v159_v26  ;;  %v740_v42 = vmul.f32 %v644_v34, %v68_v27  ;;  %v64_v43 = vld [vmem:[#allocation5 + $0x10] sm:$0xff]  ;;  %v65_v46 = vld [vmem:[#allocation5 + $0x18] sm:$0xff]  ;;  %v70_v10 = vld [vmem:[#allocation5 + $0x40] sm:$0xff] }
  0x41   :  { %v2170_v44 = vsel %vm352_vm6, 1.0, %v4352_v5  ;;  %933 = vadd.xlane.f32.xlu1 %v932_v37  ;;  %v741_v45 = vmul.f32 %v645_v38, %v69_v28  ;;  %v2171_v47 = vsel %vm353_vm7, 1.0, %v4352_v5  ;;  %v264_v49 = vld [vmem:[#allocation2 + $0x50] sm:$0xff]  ;;  %v265_v50 = vld [vmem:[#allocation2 + $0x58] sm:$0xff]  ;;  %vm358_vm10 = vcmp.ge.u32.totalorder %v262_v61, 429496730 }
  0x42   :  { %v640_v48 = vmul.f32 1.1111112, %v2170_v44  ;;  %v926_v51 = vadd.f32 %v2564_v40, %v2562_v39  ;;  %v2570_v52 = vadd.f32 %v740_v42, %v164_v32  ;;  %v160_v53 = vld [vmem:[#allocation7 + $0x10] sm:$0xff]  ;;  %v161_v54 = vld [vmem:[#allocation7 + $0x18] sm:$0xff]  ;;  %v641_v55 = vmul.f32 1.1111112, %v2171_v47 }
  0x43   :  { %vm360_vm8 = vcmp.ge.u32.totalorder %v264_v49, 429496730  ;;  %v2572_v56 = vadd.f32 %v741_v45, %v165_v41  ;;  %v72_v58 = vld [vmem:[#allocation5 + $0x50] sm:$0xff]  ;;  %v73_v59 = vld [vmem:[#allocation5 + $0x58] sm:$0xff]  ;;  %vm361_vm9 = vcmp.ge.u32.totalorder %v265_v50, 429496730 }
  0x44   :  { %v736_v57 = vmul.f32 %v640_v48, %v64_v43  ;;  %v2178_v60 = vsel %vm360_vm8, 1.0, %v4352_v5  ;;  %927 = vadd.xlane.f32.xlu0 %v926_v51  ;;  %v737_v62 = vmul.f32 %v641_v55, %v65_v46  ;;  %v2179_v63 = vsel %vm361_vm9, 1.0, %v4352_v5  ;;  %v168_v4 = vld [vmem:[#allocation7 + $0x50] sm:$0xff]  ;;  %v169_v6 = vld [vmem:[#allocation7 + $0x58] sm:$0xff]  ;;  %v71_v11 = vld [vmem:[#allocation5 + $0x48] sm:$0xff] }
  0x45   :  { %v648_v0 = vmul.f32 1.1111112, %v2178_v60  ;;  %v935_v2 = vadd.f32 %v2572_v56, %v2570_v52  ;;  %v649_v7 = vmul.f32 1.1111112, %v2179_v63  ;;  %vm359_vm11 = vcmp.ge.u32.totalorder %v263_v1, 429496730 }
  0x46   :  { %v2578_v3 = vadd.f32 %v736_v57, %v160_v53  ;;  %v2580_v8 = vadd.f32 %v737_v62, %v161_v54  ;;  %v2176_v12 = vsel %vm358_vm10, 1.0, %v4352_v5  ;;  %v2177_v13 = vsel %vm359_vm11, 1.0, %v4352_v5  ;;  %v268_v14 = vld [vmem:[#allocation2 + $0x70] sm:$0xff]  ;;  %v166_v16 = vld [vmem:[#allocation7 + $0x40] sm:$0xff]  ;;  %v269_v19 = vld [vmem:[#allocation2 + $0x78] sm:$0xff] }
  0x47   :  { %v744_v9 = vmul.f32 %v648_v0, %v72_v58  ;;  %936 = vadd.xlane.f32.xlu1 %v935_v2  ;;  %v745_v15 = vmul.f32 %v649_v7, %v73_v59  ;;  %v646_v17 = vmul.f32 1.1111112, %v2176_v12  ;;  %v647_v18 = vmul.f32 1.1111112, %v2177_v13  ;;  %v167_v22 = vld [vmem:[#allocation7 + $0x48] sm:$0xff]  ;;  %v76_v23 = vld [vmem:[#allocation5 + $0x70] sm:$0xff] }
  0x48   :  { %v929_v20 = vadd.f32 %v2580_v8, %v2578_v3  ;;  %vm364_vm12 = vcmp.ge.u32.totalorder %v268_v14, 429496730  ;;  %vm365_vm13 = vcmp.ge.u32.totalorder %v269_v19, 429496730  ;;  %v77_v29 = vld [vmem:[#allocation5 + $0x78] sm:$0xff]  ;;  %v266_v31 = vld [vmem:[#allocation2 + $0x60] sm:$0xff] }
  0x49   :  { %v2586_v21 = vadd.f32 %v744_v9, %v168_v4  ;;  %v2588_v26 = vadd.f32 %v745_v15, %v169_v6  ;;  %v742_v27 = vmul.f32 %v646_v17, %v70_v10  ;;  %v743_v28 = vmul.f32 %v647_v18, %v71_v11  ;;  %v267_v32 = vld [vmem:[#allocation2 + $0x68] sm:$0xff]  ;;  %v172_v33 = vld [vmem:[#allocation7 + $0x70] sm:$0xff]  ;;  %v173_v41 = vld [vmem:[#allocation7 + $0x78] sm:$0xff] }
  0x4a   :  { %v2182_v30 = vsel %vm364_vm12, 1.0, %v4352_v5  ;;  %930 = vadd.xlane.f32.xlu0 %v929_v20  ;;  %v2183_v34 = vsel %vm365_vm13, 1.0, %v4352_v5  ;;  %vm362_vm14 = vcmp.ge.u32.totalorder %v266_v31, 429496730  ;;  %v74_v43 = vld [vmem:[#allocation5 + $0x60] sm:$0xff]  ;;  %v75_v44 = vld [vmem:[#allocation5 + $0x68] sm:$0xff] }
  0x4b   :  { %4580 = vst [vmem:[#allocation12_spill] sm:$0xff] %v2588_v26  ;;  %v652_v35 = vmul.f32 1.1111112, %v2182_v30  ;;  %v941_v36 = vadd.f32 %v2588_v26, %v2586_v21  ;;  %v2594_v37 = vadd.f32 %v742_v27, %v166_v16  ;;  %v2596_v38 = vadd.f32 %v743_v28, %v167_v22  ;;  %v170_v46 = vld [vmem:[#allocation7 + $0x60] sm:$0xff]  ;;  %v272_v48 = vld [vmem:[#allocation2 + $0x90] sm:$0xff]  ;;  %v273_v49 = vld [vmem:[#allocation2 + $0x98] sm:$0xff] }
  0x4c   :  { %v653_v42 = vmul.f32 1.1111112, %v2183_v34  ;;  %vm363_vm15 = vcmp.ge.u32.totalorder %v267_v32, 429496730  ;;  %v2180_v47 = vsel %vm362_vm14, 1.0, %v4352_v5  ;;  %v171_v53 = vld [vmem:[#allocation7 + $0x68] sm:$0xff] }
  0x4d   :  { %4581 = vst [vmem:[#allocation13_spill] sm:$0xff] %v2594_v37  ;;  %4582 = vst [vmem:[#allocation14_spill] sm:$0xff] %v2596_v38  ;;  %v748_v45 = vmul.f32 %v652_v35, %v76_v23  ;;  %942 = vadd.xlane.f32.xlu1 %v941_v36  ;;  %v938_v50 = vadd.f32 %v2596_v38, %v2594_v37  ;;  %v2181_v54 = vsel %vm363_vm15, 1.0, %v4352_v5  ;;  %v650_v55 = vmul.f32 1.1111112, %v2180_v47  ;;  %v80_v57 = vld [vmem:[#allocation5 + $0x90] sm:$0xff] }
  0x4e   :  { %v749_v51 = vmul.f32 %v653_v42, %v77_v29  ;;  %v81_v58 = vld [vmem:[#allocation5 + $0x98] sm:$0xff]  ;;  %v651_v60 = vmul.f32 1.1111112, %v2181_v54  ;;  %vm368_vm0 = vcmp.ge.u32.totalorder %v272_v48, 429496730  ;;  %v176_v63 = vld [vmem:[#allocation7 + $0x90] sm:$0xff] }
  0x4f   :  { %v2602_v59 = vadd.f32 %v748_v45, %v172_v33  ;;  %vm369_vm1 = vcmp.ge.u32.totalorder %v273_v49, 429496730  ;;  %939 = vadd.xlane.f32.xlu0 %v938_v50  ;;  %v746_v62 = vmul.f32 %v650_v55, %v74_v43  ;;  %v2186_v0 = vsel %vm368_vm0, 1.0, %v4352_v5  ;;  %v270_v2 = vld [vmem:[#allocation2 + $0x80] sm:$0xff]  ;;  %v271_v4 = vld [vmem:[#allocation2 + $0x88] sm:$0xff]  ;;  %v177_v12 = vld [vmem:[#allocation7 + $0x98] sm:$0xff] }
  0x50   :  { %v2604_v61 = vadd.f32 %v749_v51, %v173_v41  ;;  %v2187_v1 = vsel %vm369_vm1, 1.0, %v4352_v5  ;;  %v747_v6 = vmul.f32 %v651_v60, %v75_v44  ;;  %v656_v7 = vmul.f32 1.1111112, %v2186_v0  ;;  %v78_v13 = vld [vmem:[#allocation5 + $0x80] sm:$0xff]  ;;  %v79_v14 = vld [vmem:[#allocation5 + $0x88] sm:$0xff]  ;;  %v276_v22 = vld [vmem:[#allocation2 + $0xb0] sm:$0xff] }
  0x51   :  { %4583 = vst [vmem:[#allocation15_spill] sm:$0xff] %v2602_v59  ;;  %v657_v9 = vmul.f32 1.1111112, %v2187_v1  ;;  %vm366_vm2 = vcmp.ge.u32.totalorder %v270_v2, 429496730  ;;  %v2610_v11 = vadd.f32 %v746_v62, %v170_v46  ;;  %v174_v19 = vld [vmem:[#allocation7 + $0x80] sm:$0xff] }
  0x52   :  { %4584 = vst [vmem:[#allocation16_spill] sm:$0xff] %v2604_v61  ;;  %v947_v10 = vadd.f32 %v2604_v61, %v2602_v59  ;;  %vm367_vm3 = vcmp.ge.u32.totalorder %v271_v4, 429496730  ;;  %v2184_v15 = vsel %vm366_vm2, 1.0, %v4352_v5  ;;  %v2613_v16 = vadd.f32 %v747_v6, %v171_v53  ;;  %v277_v23 = vld [vmem:[#allocation2 + $0xb8] sm:$0xff]  ;;  %v175_v32 = vld [vmem:[#allocation7 + $0x88] sm:$0xff] }
  0x53   :  { %4585 = vst [vmem:[#allocation17_spill] sm:$0xff] %v2610_v11  ;;  %v752_v17 = vmul.f32 %v656_v7, %v80_v57  ;;  %v753_v18 = vmul.f32 %v657_v9, %v81_v58  ;;  %v2185_v20 = vsel %vm367_vm3, 1.0, %v4352_v5  ;;  %v654_v27 = vmul.f32 1.1111112, %v2184_v15  ;;  %v84_v33 = vld [vmem:[#allocation5 + $0xb0] sm:$0xff]  ;;  %v85_v34 = vld [vmem:[#allocation5 + $0xb8] sm:$0xff] }
  0x54   :  { %4586 = vst [vmem:[#allocation18_spill] sm:$0xff] %v2613_v16  ;;  %948 = vadd.xlane.f32.xlu1 %v947_v10  ;;  %v655_v28 = vmul.f32 1.1111112, %v2185_v20  ;;  %vm372_vm4 = vcmp.ge.u32.totalorder %v276_v22, 429496730  ;;  %v944_v29 = vadd.f32 %v2613_v16, %v2610_v11  ;;  %v180_v41 = vld [vmem:[#allocation7 + $0xb0] sm:$0xff] }
  0x55   :  { %v2618_v30 = vadd.f32 %v752_v17, %v176_v63  ;;  %v2620_v31 = vadd.f32 %v753_v18, %v177_v12  ;;  %vm373_vm5 = vcmp.ge.u32.totalorder %v277_v23, 429496730  ;;  %v750_v35 = vmul.f32 %v654_v27, %v78_v13  ;;  %v181_v42 = vld [vmem:[#allocation7 + $0xb8] sm:$0xff]  ;;  %v274_v45 = vld [vmem:[#allocation2 + $0xa0] sm:$0xff]  ;;  %v275_v46 = vld [vmem:[#allocation2 + $0xa8] sm:$0xff] }
  0x56   :  { %v751_v36 = vmul.f32 %v655_v28, %v79_v14  ;;  %v2190_v43 = vsel %vm372_vm4, 1.0, %v4352_v5  ;;  %v2191_v44 = vsel %vm373_vm5, 1.0, %v4352_v5  ;;  %945 = vadd.xlane.f32.xlu0 %v944_v29  ;;  %vm370_vm6 = vcmp.ge.u32.totalorder %v274_v45, 429496730  ;;  %v82_v53 = vld [vmem:[#allocation5 + $0xa0] sm:$0xff]  ;;  %v83_v54 = vld [vmem:[#allocation5 + $0xa8] sm:$0xff] }
  0x57   :  { %4587 = vst [vmem:[#allocation19_spill] sm:$0xff] %v2618_v30  ;;  %4588 = vst [vmem:[#allocation20_spill] sm:$0xff] %v2620_v31  ;;  %v953_v47 = vadd.f32 %v2620_v31, %v2618_v30  ;;  %v660_v48 = vmul.f32 1.1111112, %v2190_v43  ;;  %v661_v49 = vmul.f32 1.1111112, %v2191_v44  ;;  %v2626_v50 = vadd.f32 %v750_v35, %v174_v19 }
  0x58   :  { %v2628_v51 = vadd.f32 %v751_v36, %v175_v32  ;;  %v178_v55 = vld [vmem:[#allocation7 + $0xa0] sm:$0xff]  ;;  %vm371_vm7 = vcmp.ge.u32.totalorder %v275_v46, 429496730  ;;  %v2188_v57 = vsel %vm370_vm6, 1.0, %v4352_v5  ;;  %v179_v62 = vld [vmem:[#allocation7 + $0xa8] sm:$0xff]  ;;  %v280_v1 = vld [vmem:[#allocation2 + $0xd0] sm:$0xff] }
  0x59   :  { %4589 = vst [vmem:[#allocation21_spill] sm:$0xff] %v2626_v50  ;;  %954 = vadd.xlane.f32.xlu1 %v953_v47  ;;  %v756_v58 = vmul.f32 %v660_v48, %v84_v33  ;;  %v757_v60 = vmul.f32 %v661_v49, %v85_v34  ;;  %v2189_v63 = vsel %vm371_vm7, 1.0, %v4352_v5  ;;  %v658_v0 = vmul.f32 1.1111112, %v2188_v57  ;;  %v281_v2 = vld [vmem:[#allocation2 + $0xd8] sm:$0xff]  ;;  %v88_v12 = vld [vmem:[#allocation5 + $0xd0] sm:$0xff] }
  0x5a   :  { %4590 = vst [vmem:[#allocation22_spill] sm:$0xff] %v2628_v51  ;;  %v950_v4 = vadd.f32 %v2628_v51, %v2626_v50  ;;  %v659_v6 = vmul.f32 1.1111112, %v2189_v63  ;;  %vm376_vm8 = vcmp.ge.u32.totalorder %v280_v1, 429496730  ;;  %v89_v13 = vld [vmem:[#allocation5 + $0xd8] sm:$0xff] }
  0x5b   :  { %vm377_vm9 = vcmp.ge.u32.totalorder %v281_v2, 429496730  ;;  %v2634_v7 = vadd.f32 %v756_v58, %v180_v41  ;;  %v2636_v9 = vadd.f32 %v757_v60, %v181_v42  ;;  %v754_v10 = vmul.f32 %v658_v0, %v82_v53  ;;  %v184_v14 = vld [vmem:[#allocation7 + $0xd0] sm:$0xff]  ;;  %v185_v18 = vld [vmem:[#allocation7 + $0xd8] sm:$0xff]  ;;  %v278_v22 = vld [vmem:[#allocation2 + $0xc0] sm:$0xff] }
  0x5c   :  { %v2194_v15 = vsel %vm376_vm8, 1.0, %v4352_v5  ;;  %951 = vadd.xlane.f32.xlu0 %v950_v4  ;;  %v755_v17 = vmul.f32 %v659_v6, %v83_v54  ;;  %v2195_v19 = vsel %vm377_vm9, 1.0, %v4352_v5  ;;  %v279_v23 = vld [vmem:[#allocation2 + $0xc8] sm:$0xff]  ;;  %v86_v32 = vld [vmem:[#allocation5 + $0xc0] sm:$0xff]  ;;  %vm374_vm10 = vcmp.ge.u32.totalorder %v278_v22, 429496730 }
  0x5d   :  { %4591 = vst [vmem:[#allocation23_spill] sm:$0xff] %v2634_v7  ;;  %4592 = vst [vmem:[#allocation24_spill] sm:$0xff] %v2636_v9  ;;  %v664_v20 = vmul.f32 1.1111112, %v2194_v15  ;;  %v959_v27 = vadd.f32 %v2636_v9, %v2634_v7  ;;  %v2642_v28 = vadd.f32 %v754_v10, %v178_v55  ;;  %v665_v29 = vmul.f32 1.1111112, %v2195_v19 }
  0x5e   :  { %v87_v33 = vld [vmem:[#allocation5 + $0xc8] sm:$0xff]  ;;  %v2644_v34 = vadd.f32 %v755_v17, %v179_v62  ;;  %v182_v36 = vld [vmem:[#allocation7 + $0xc0] sm:$0xff]  ;;  %vm375_vm11 = vcmp.ge.u32.totalorder %v279_v23, 429496730  ;;  %v2192_v41 = vsel %vm374_vm10, 1.0, %v4352_v5  ;;  %v284_v42 = vld [vmem:[#allocation2 + $0xf0] sm:$0xff] }
  0x5f   :  { %4593 = vst [vmem:[#allocation25_spill] sm:$0xff] %v2642_v28  ;;  %v760_v35 = vmul.f32 %v664_v20, %v88_v12  ;;  %v285_v43 = vld [vmem:[#allocation2 + $0xf8] sm:$0xff]  ;;  %960 = vadd.xlane.f32.xlu1 %v959_v27  ;;  %v761_v44 = vmul.f32 %v665_v29, %v89_v13  ;;  %v183_v45 = vld [vmem:[#allocation7 + $0xc8] sm:$0xff]  ;;  %v2193_v46 = vsel %vm375_vm11, 1.0, %v4352_v5  ;;  %v662_v47 = vmul.f32 1.1111112, %v2192_v41 }
  0x60   :  { %4594 = vst [vmem:[#allocation26_spill] sm:$0xff] %v2644_v34  ;;  %vm380_vm12 = vcmp.ge.u32.totalorder %v284_v42, 429496730  ;;  %v956_v48 = vadd.f32 %v2644_v34, %v2642_v28  ;;  %v663_v53 = vmul.f32 1.1111112, %v2193_v46  ;;  %v92_v54 = vld [vmem:[#allocation5 + $0xf0] sm:$0xff] }
  0x61   :  { %v2650_v49 = vadd.f32 %v760_v35, %v184_v14  ;;  %v93_v55 = vld [vmem:[#allocation5 + $0xf8] sm:$0xff]  ;;  %vm381_vm13 = vcmp.ge.u32.totalorder %v285_v43, 429496730  ;;  %v2652_v57 = vadd.f32 %v761_v44, %v185_v18  ;;  %v758_v58 = vmul.f32 %v662_v47, %v86_v32  ;;  %v188_v60 = vld [vmem:[#allocation7 + $0xf0] sm:$0xff]  ;;  %v282_v0 = vld [vmem:[#allocation2 + $0xe0] sm:$0xff] }
  0x62   :  { %v2198_v62 = vsel %vm380_vm12, 1.0, %v4352_v5  ;;  %v2199_v63 = vsel %vm381_vm13, 1.0, %v4352_v5  ;;  %v283_v1 = vld [vmem:[#allocation2 + $0xe8] sm:$0xff]  ;;  %957 = vadd.xlane.f32.xlu0 %v956_v48  ;;  %v759_v2 = vmul.f32 %v663_v53, %v87_v33  ;;  %vm378_vm14 = vcmp.ge.u32.totalorder %v282_v0, 429496730  ;;  %v189_v13 = vld [vmem:[#allocation7 + $0xf8] sm:$0xff] }
  0x63   :  { %4595 = vst [vmem:[#allocation27_spill] sm:$0xff] %v2650_v49  ;;  %4596 = vst [vmem:[#allocation28_spill] sm:$0xff] %v2652_v57  ;;  %v668_v4 = vmul.f32 1.1111112, %v2198_v62  ;;  %v669_v6 = vmul.f32 1.1111112, %v2199_v63  ;;  %v965_v10 = vadd.f32 %v2652_v57, %v2650_v49  ;;  %v2658_v12 = vadd.f32 %v758_v58, %v182_v36 }
  0x64   :  { %v90_v14 = vld [vmem:[#allocation5 + $0xe0] sm:$0xff]  ;;  %v91_v15 = vld [vmem:[#allocation5 + $0xe8] sm:$0xff]  ;;  %vm379_vm15 = vcmp.ge.u32.totalorder %v283_v1, 429496730  ;;  %v2196_v17 = vsel %vm378_vm14, 1.0, %v4352_v5  ;;  %v2661_v18 = vadd.f32 %v759_v2, %v183_v45  ;;  %v288_v27 = vld [vmem:[#allocation2 + $0x110] sm:$0xff] }
  0x65   :  { %4597 = vst [vmem:[#allocation29_spill] sm:$0xff] %v2658_v12  ;;  %v764_v19 = vmul.f32 %v668_v4, %v92_v54  ;;  %v765_v20 = vmul.f32 %v669_v6, %v93_v55  ;;  %v186_v22 = vld [vmem:[#allocation7 + $0xe0] sm:$0xff]  ;;  %v2197_v23 = vsel %vm379_vm15, 1.0, %v4352_v5  ;;  %v289_v29 = vld [vmem:[#allocation2 + $0x118] sm:$0xff]  ;;  %966 = vadd.xlane.f32.xlu1 %v965_v10  ;;  %v666_v32 = vmul.f32 1.1111112, %v2196_v17 }
  0x66   :  { %4598 = vst [vmem:[#allocation30_spill] sm:$0xff] %v2661_v18  ;;  %v667_v33 = vmul.f32 1.1111112, %v2197_v23  ;;  %vm384_vm0 = vcmp.ge.u32.totalorder %v288_v27, 429496730  ;;  %v962_v35 = vadd.f32 %v2661_v18, %v2658_v12  ;;  %v187_v42 = vld [vmem:[#allocation7 + $0xe8] sm:$0xff] }
  0x67   :  { %v2666_v36 = vadd.f32 %v764_v19, %v188_v60  ;;  %v2668_v41 = vadd.f32 %v765_v20, %v189_v13  ;;  %v96_v43 = vld [vmem:[#allocation5 + $0x110] sm:$0xff]  ;;  %v97_v44 = vld [vmem:[#allocation5 + $0x118] sm:$0xff]  ;;  %vm385_vm1 = vcmp.ge.u32.totalorder %v289_v29, 429496730  ;;  %v762_v45 = vmul.f32 %v666_v32, %v90_v14  ;;  %v286_v54 = vld [vmem:[#allocation2 + $0x100] sm:$0xff] }
  0x68   :  { %v763_v46 = vmul.f32 %v667_v33, %v91_v15  ;;  %v192_v47 = vld [vmem:[#allocation7 + $0x110] sm:$0xff]  ;;  %v2202_v48 = vsel %vm384_vm0, 1.0, %v4352_v5  ;;  %v2203_v53 = vsel %vm385_vm1, 1.0, %v4352_v5  ;;  %v287_v55 = vld [vmem:[#allocation2 + $0x108] sm:$0xff]  ;;  %963 = vadd.xlane.f32.xlu0 %v962_v35  ;;  %vm382_vm2 = vcmp.ge.u32.totalorder %v286_v54, 429496730 }
  0x69   :  { %4599 = vst [vmem:[#allocation31_spill] sm:$0xff] %v2666_v36  ;;  %4600 = vst [vmem:[#allocation32_spill] sm:$0xff] %v2668_v41  ;;  %v971_v58 = vadd.f32 %v2668_v41, %v2666_v36  ;;  %v672_v60 = vmul.f32 1.1111112, %v2202_v48  ;;  %v673_v62 = vmul.f32 1.1111112, %v2203_v53  ;;  %v2674_v63 = vadd.f32 %v762_v45, %v186_v22 }
  0x6a   :  { %v2676_v0 = vadd.f32 %v763_v46, %v187_v42  ;;  %v193_v1 = vld [vmem:[#allocation7 + $0x118] sm:$0xff]  ;;  %v94_v2 = vld [vmem:[#allocation5 + $0x100] sm:$0xff]  ;;  %v95_v4 = vld [vmem:[#allocation5 + $0x108] sm:$0xff]  ;;  %vm383_vm3 = vcmp.ge.u32.totalorder %v287_v55, 429496730  ;;  %v2200_v6 = vsel %vm382_vm2, 1.0, %v4352_v5 }
  0x6b   :  { %4601 = vst [vmem:[#allocation33_spill] sm:$0xff] %v2674_v63  ;;  %972 = vadd.xlane.f32.xlu1 %v971_v58  ;;  %v768_v10 = vmul.f32 %v672_v60, %v96_v43  ;;  %v769_v13 = vmul.f32 %v673_v62, %v97_v44  ;;  %v190_v14 = vld [vmem:[#allocation7 + $0x100] sm:$0xff]  ;;  %v2201_v15 = vsel %vm383_vm3, 1.0, %v4352_v5  ;;  %v670_v17 = vmul.f32 1.1111112, %v2200_v6  ;;  %v292_v19 = vld [vmem:[#allocation2 + $0x130] sm:$0xff] }
  0x6c   :  { %4602 = vst [vmem:[#allocation34_spill] sm:$0xff] %v2676_v0  ;;  %v293_v20 = vld [vmem:[#allocation2 + $0x138] sm:$0xff]  ;;  %v968_v22 = vadd.f32 %v2676_v0, %v2674_v63  ;;  %v671_v23 = vmul.f32 1.1111112, %v2201_v15  ;;  %vm388_vm4 = vcmp.ge.u32.totalorder %v292_v19, 429496730 }
  0x6d   :  { %vm389_vm5 = vcmp.ge.u32.totalorder %v293_v20, 429496730  ;;  %v2682_v27 = vadd.f32 %v768_v10, %v192_v47  ;;  %v2684_v29 = vadd.f32 %v769_v13, %v193_v1  ;;  %v191_v32 = vld [vmem:[#allocation7 + $0x108] sm:$0xff]  ;;  %v766_v33 = vmul.f32 %v670_v17, %v94_v2  ;;  %v100_v35 = vld [vmem:[#allocation5 + $0x130] sm:$0xff]  ;;  %v101_v44 = vld [vmem:[#allocation5 + $0x138] sm:$0xff] }
  0x6e   :  { %v2206_v42 = vsel %vm388_vm4, 1.0, %v4352_v5  ;;  %969 = vadd.xlane.f32.xlu0 %v968_v22  ;;  %v767_v43 = vmul.f32 %v671_v23, %v95_v4  ;;  %v2207_v45 = vsel %vm389_vm5, 1.0, %v4352_v5  ;;  %v290_v48 = vld [vmem:[#allocation2 + $0x120] sm:$0xff]  ;;  %v291_v53 = vld [vmem:[#allocation2 + $0x128] sm:$0xff]  ;;  %v196_v55 = vld [vmem:[#allocation7 + $0x130] sm:$0xff] }
  0x6f   :  { %4603 = vst [vmem:[#allocation35_spill] sm:$0xff] %v2682_v27  ;;  %4604 = vst [vmem:[#allocation36_spill] sm:$0xff] %v2684_v29  ;;  %v676_v46 = vmul.f32 1.1111112, %v2206_v42  ;;  %v977_v54 = vadd.f32 %v2684_v29, %v2682_v27  ;;  %v2690_v47 = vadd.f32 %v766_v33, %v190_v14  ;;  %v197_v58 = vld [vmem:[#allocation7 + $0x138] sm:$0xff]  ;;  %v98_v2 = vld [vmem:[#allocation5 + $0x120] sm:$0xff] }
  0x70   :  { %v677_v60 = vmul.f32 1.1111112, %v2207_v45  ;;  %vm386_vm6 = vcmp.ge.u32.totalorder %v290_v48, 429496730  ;;  %v2692_v62 = vadd.f32 %v767_v43, %v191_v32  ;;  %v99_v4 = vld [vmem:[#allocation5 + $0x128] sm:$0xff]  ;;  %v296_v10 = vld [vmem:[#allocation2 + $0x150] sm:$0xff] }
  0x71   :  { %4605 = vst [vmem:[#allocation37_spill] sm:$0xff] %v2690_v47  ;;  %v772_v1 = vmul.f32 %v676_v46, %v100_v35  ;;  %vm387_vm7 = vcmp.ge.u32.totalorder %v291_v53, 429496730  ;;  %v2204_v6 = vsel %vm386_vm6, 1.0, %v4352_v5  ;;  %978 = vadd.xlane.f32.xlu1 %v977_v54  ;;  %v297_v14 = vld [vmem:[#allocation2 + $0x158] sm:$0xff]  ;;  %v194_v22 = vld [vmem:[#allocation7 + $0x120] sm:$0xff] }
  0x72   :  { %4606 = vst [vmem:[#allocation38_spill] sm:$0xff] %v2692_v62  ;;  %v773_v13 = vmul.f32 %v677_v60, %v101_v44  ;;  %v2205_v15 = vsel %vm387_vm7, 1.0, %v4352_v5  ;;  %v674_v17 = vmul.f32 1.1111112, %v2204_v6  ;;  %vm392_vm8 = vcmp.ge.u32.totalorder %v296_v10, 429496730 }
  0x73   :  { %v974_v19 = vadd.f32 %v2692_v62, %v2690_v47  ;;  %v2698_v20 = vadd.f32 %v772_v1, %v196_v55  ;;  %v195_v23 = vld [vmem:[#allocation7 + $0x128] sm:$0xff]  ;;  %v675_v32 = vmul.f32 1.1111112, %v2205_v15  ;;  %vm393_vm9 = vcmp.ge.u32.totalorder %v297_v14, 429496730  ;;  %v104_v42 = vld [vmem:[#allocation5 + $0x150] sm:$0xff] }
  0x74   :  { %v2700_v33 = vadd.f32 %v773_v13, %v197_v58  ;;  %v770_v35 = vmul.f32 %v674_v17, %v98_v2  ;;  %v105_v43 = vld [vmem:[#allocation5 + $0x158] sm:$0xff]  ;;  %v2210_v44 = vsel %vm392_vm8, 1.0, %v4352_v5  ;;  %v2211_v45 = vsel %vm393_vm9, 1.0, %v4352_v5  ;;  %v294_v46 = vld [vmem:[#allocation2 + $0x140] sm:$0xff]  ;;  %v200_v53 = vld [vmem:[#allocation7 + $0x150] sm:$0xff] }
  0x75   :  { %4607 = vst [vmem:[#allocation39_spill] sm:$0xff] %v2698_v20  ;;  %975 = vadd.xlane.f32.xlu0 %v974_v19  ;;  %v771_v48 = vmul.f32 %v675_v32, %v99_v4  ;;  %v680_v54 = vmul.f32 1.1111112, %v2210_v44  ;;  %v681_v55 = vmul.f32 1.1111112, %v2211_v45  ;;  %v295_v60 = vld [vmem:[#allocation2 + $0x148] sm:$0xff] }
  0x76   :  { %4608 = vst [vmem:[#allocation40_spill] sm:$0xff] %v2700_v33  ;;  %v983_v1 = vadd.f32 %v2700_v33, %v2698_v20  ;;  %v2706_v6 = vadd.f32 %v770_v35, %v194_v22  ;;  %v201_v58 = vld [vmem:[#allocation7 + $0x158] sm:$0xff]  ;;  %v102_v2 = vld [vmem:[#allocation5 + $0x140] sm:$0xff]  ;;  %vm390_vm10 = vcmp.ge.u32.totalorder %v294_v46, 429496730  ;;  %v103_v17 = vld [vmem:[#allocation5 + $0x148] sm:$0xff] }
  0x77   :  { %vm391_vm11 = vcmp.ge.u32.totalorder %v295_v60, 429496730  ;;  %v2708_v10 = vadd.f32 %v771_v48, %v195_v23  ;;  %v776_v13 = vmul.f32 %v680_v54, %v104_v42  ;;  %v777_v15 = vmul.f32 %v681_v55, %v105_v43  ;;  %v300_v14 = vld [vmem:[#allocation2 + $0x170] sm:$0xff]  ;;  %v301_v19 = vld [vmem:[#allocation2 + $0x178] sm:$0xff]  ;;  %v198_v32 = vld [vmem:[#allocation7 + $0x140] sm:$0xff] }
  0x78   :  { %4609 = vst [vmem:[#allocation41_spill] sm:$0xff] %v2706_v6  ;;  %v2208_v4 = vsel %vm390_vm10, 1.0, %v4352_v5  ;;  %984 = vadd.xlane.f32.xlu1 %v983_v1  ;;  %v2209_v44 = vsel %vm391_vm11, 1.0, %v4352_v5  ;;  %vm396_vm12 = vcmp.ge.u32.totalorder %v300_v14, 429496730  ;;  %v199_v42 = vld [vmem:[#allocation7 + $0x148] sm:$0xff] }
  0x79   :  { %4610 = vst [vmem:[#allocation42_spill] sm:$0xff] %v2708_v10  ;;  %v678_v45 = vmul.f32 1.1111112, %v2208_v4  ;;  %v980_v22 = vadd.f32 %v2708_v10, %v2706_v6  ;;  %v2714_v35 = vadd.f32 %v776_v13, %v200_v53  ;;  %v2716_v23 = vadd.f32 %v777_v15, %v201_v58  ;;  %v108_v46 = vld [vmem:[#allocation5 + $0x170] sm:$0xff]  ;;  %v109_v48 = vld [vmem:[#allocation5 + $0x178] sm:$0xff]  ;;  %v298_v1 = vld [vmem:[#allocation2 + $0x160] sm:$0xff] }
  0x7a   :  { %v679_v43 = vmul.f32 1.1111112, %v2209_v44  ;;  %v204_v55 = vld [vmem:[#allocation7 + $0x170] sm:$0xff]  ;;  %vm397_vm13 = vcmp.ge.u32.totalorder %v301_v19, 429496730  ;;  %v2214_v60 = vsel %vm396_vm12, 1.0, %v4352_v5 }
  0x7b   :  { %4611 = vst [vmem:[#allocation43_spill] sm:$0xff] %v2714_v35  ;;  %4612 = vst [vmem:[#allocation44_spill] sm:$0xff] %v2716_v23  ;;  %v774_v54 = vmul.f32 %v678_v45, %v102_v2  ;;  %v299_v33 = vld [vmem:[#allocation2 + $0x168] sm:$0xff]  ;;  %981 = vadd.xlane.f32.xlu0 %v980_v22  ;;  %v989_v4 = vadd.f32 %v2716_v23, %v2714_v35  ;;  %v205_v53 = vld [vmem:[#allocation7 + $0x178] sm:$0xff]  ;;  %v2215_v58 = vsel %vm397_vm13, 1.0, %v4352_v5 }
  0x7c   :  { %v775_v14 = vmul.f32 %v679_v43, %v103_v17  ;;  %v684_v13 = vmul.f32 1.1111112, %v2214_v60  ;;  %v106_v15 = vld [vmem:[#allocation5 + $0x160] sm:$0xff]  ;;  %v107_v44 = vld [vmem:[#allocation5 + $0x168] sm:$0xff]  ;;  %v685_v2 = vmul.f32 1.1111112, %v2215_v58 }
  0x7d   :  { %v2722_v10 = vadd.f32 %v774_v54, %v198_v32  ;;  %vm394_vm14 = vcmp.ge.u32.totalorder %v298_v1, 429496730  ;;  %vm395_vm15 = vcmp.ge.u32.totalorder %v299_v33, 429496730  ;;  %990 = vadd.xlane.f32.xlu1 %v989_v4  ;;  %v202_v22 = vld [vmem:[#allocation7 + $0x160] sm:$0xff]  ;;  %v304_v43 = vld [vmem:[#allocation2 + $0x190] sm:$0xff] }
  0x7e   :  { %v2724_v19 = vadd.f32 %v775_v14, %v199_v42  ;;  %v780_v45 = vmul.f32 %v684_v13, %v108_v46  ;;  %v2212_v6 = vsel %vm394_vm14, 1.0, %v4352_v5  ;;  %v2213_v17 = vsel %vm395_vm15, 1.0, %v4352_v5  ;;  %v305_v23 = vld [vmem:[#allocation2 + $0x198] sm:$0xff]  ;;  %v203_v33 = vld [vmem:[#allocation7 + $0x168] sm:$0xff]  ;;  %v112_v42 = vld [vmem:[#allocation5 + $0x190] sm:$0xff] }
  0x7f   :  { %4613 = vst [vmem:[#allocation45_spill] sm:$0xff] %v2722_v10  ;;  %v781_v35 = vmul.f32 %v685_v2, %v109_v48  ;;  %v682_v60 = vmul.f32 1.1111112, %v2212_v6  ;;  %v683_v20 = vmul.f32 1.1111112, %v2213_v17  ;;  %v113_v1 = vld [vmem:[#allocation5 + $0x198] sm:$0xff] }
  0x80   :  { %4614 = vst [vmem:[#allocation46_spill] sm:$0xff] %v2724_v19  ;;  %vm400_vm0 = vcmp.ge.u32.totalorder %v304_v43, 429496730  ;;  %v986_v32 = vadd.f32 %v2724_v19, %v2722_v10  ;;  %v2730_v54 = vadd.f32 %v780_v45, %v204_v55  ;;  %vm401_vm1 = vcmp.ge.u32.totalorder %v305_v23, 429496730  ;;  %v208_v13 = vld [vmem:[#allocation7 + $0x190] sm:$0xff] }
  0x81   :  { %v2218_v46 = vsel %vm400_vm0, 1.0, %v4352_v5  ;;  %v2733_v4 = vadd.f32 %v781_v35, %v205_v53  ;;  %v778_v14 = vmul.f32 %v682_v60, %v106_v15  ;;  %v779_v58 = vmul.f32 %v683_v20, %v107_v44  ;;  %v302_v48 = vld [vmem:[#allocation2 + $0x180] sm:$0xff]  ;;  %v303_v2 = vld [vmem:[#allocation2 + $0x188] sm:$0xff]  ;;  %v209_v35 = vld [vmem:[#allocation7 + $0x198] sm:$0xff] }
  0x82   :  { %4615 = vst [vmem:[#allocation47_spill] sm:$0xff] %v2730_v54  ;;  %v2219_v6 = vsel %vm401_vm1, 1.0, %v4352_v5  ;;  %987 = vadd.xlane.f32.xlu0 %v986_v32  ;;  %v688_v17 = vmul.f32 1.1111112, %v2218_v46  ;;  %vm398_vm2 = vcmp.ge.u32.totalorder %v302_v48, 429496730 }
  0x83   :  { %4616 = vst [vmem:[#allocation48_spill] sm:$0xff] %v2733_v4  ;;  %v689_v43 = vmul.f32 1.1111112, %v2219_v6  ;;  %v995_v55 = vadd.f32 %v2733_v4, %v2730_v54  ;;  %v2738_v45 = vadd.f32 %v778_v14, %v202_v22  ;;  %v2740_v23 = vadd.f32 %v779_v58, %v203_v33  ;;  %v110_v53 = vld [vmem:[#allocation5 + $0x180] sm:$0xff]  ;;  %v111_v15 = vld [vmem:[#allocation5 + $0x188] sm:$0xff]  ;;  %v308_v6 = vld [vmem:[#allocation2 + $0x1b0] sm:$0xff] }
  0x84   :  { %vm399_vm3 = vcmp.ge.u32.totalorder %v303_v2, 429496730  ;;  %v784_v20 = vmul.f32 %v688_v17, %v112_v42  ;;  %v206_v60 = vld [vmem:[#allocation7 + $0x180] sm:$0xff]  ;;  %v207_v5 = vld [vmem:[#allocation7 + $0x188] sm:$0xff]  ;;  %v4619_v19 = vmov 0.0   ;;  %v309_v48 = vld [vmem:[#allocation2 + $0x1b8] sm:$0xff] }
  0x85   :  { %4617 = vst [vmem:[#allocation49_spill] sm:$0xff] %v2738_v45  ;;  %4618 = vst [vmem:[#allocation50_spill] sm:$0xff] %v2740_v23  ;;  %v785_v44 = vmul.f32 %v689_v43, %v113_v1  ;;  %v2216_v32 = vsel %vm398_vm2, 1.0, %v4619_v19  ;;  %v2217_v46 = vsel %vm399_vm3, 1.0, %v4619_v19  ;;  %996 = vadd.xlane.f32.xlu1 %v995_v55  ;;  %v992_v22 = vadd.f32 %v2740_v23, %v2738_v45  ;;  %v116_v42 = vld [vmem:[#allocation5 + $0x1b0] sm:$0xff]  ;;  %v117_v1 = vld [vmem:[#allocation5 + $0x1b8] sm:$0xff] }
  0x86   :  { %v686_v33 = vmul.f32 1.1111112, %v2216_v32  ;;  %v687_v14 = vmul.f32 1.1111112, %v2217_v46  ;;  %vm404_vm4 = vcmp.ge.u32.totalorder %v308_v6, 429496730  ;;  %v2746_v58 = vadd.f32 %v784_v20, %v208_v13 }
  0x87   :  { %v2748_v2 = vadd.f32 %v785_v44, %v209_v35  ;;  %v212_v17 = vld [vmem:[#allocation7 + $0x1b0] sm:$0xff]  ;;  %vm405_vm5 = vcmp.ge.u32.totalorder %v309_v48, 429496730  ;;  %v2222_v43 = vsel %vm404_vm4, 1.0, %v4619_v19  ;;  %993 = vadd.xlane.f32.xlu0 %v992_v22  ;;  %v213_v55 = vld [vmem:[#allocation7 + $0x1b8] sm:$0xff]  ;;  %v306_v32 = vld [vmem:[#allocation2 + $0x1a0] sm:$0xff] }
  0x88   :  { %4620 = vst [vmem:[#allocation51_spill] sm:$0xff] %v2746_v58  ;;  %v782_v4 = vmul.f32 %v686_v33, %v110_v53  ;;  %v783_v54 = vmul.f32 %v687_v14, %v111_v15  ;;  %v2223_v10 = vsel %vm405_vm5, 1.0, %v4619_v19  ;;  %v692_v23 = vmul.f32 1.1111112, %v2222_v43  ;;  %v307_v46 = vld [vmem:[#allocation2 + $0x1a8] sm:$0xff]  ;;  %v114_v48 = vld [vmem:[#allocation5 + $0x1a0] sm:$0xff] }
  0x89   :  { %4621 = vst [vmem:[#allocation52_spill] sm:$0xff] %v2748_v2  ;;  %v1001_v13 = vadd.f32 %v2748_v2, %v2746_v58  ;;  %v693_v35 = vmul.f32 1.1111112, %v2223_v10  ;;  %vm402_vm6 = vcmp.ge.u32.totalorder %v306_v32, 429496730  ;;  %v115_v53 = vld [vmem:[#allocation5 + $0x1a8] sm:$0xff] }
  0x8a   :  { %vm403_vm7 = vcmp.ge.u32.totalorder %v307_v46, 429496730  ;;  %v2754_v20 = vadd.f32 %v782_v4, %v206_v60  ;;  %v2756_v44 = vadd.f32 %v783_v54, %v207_v5  ;;  %v788_v6 = vmul.f32 %v692_v23, %v116_v42  ;;  %v210_v15 = vld [vmem:[#allocation7 + $0x1a0] sm:$0xff]  ;;  %v211_v14 = vld [vmem:[#allocation7 + $0x1a8] sm:$0xff]  ;;  %v312_v2 = vld [vmem:[#allocation2 + $0x1d0] sm:$0xff] }
  0x8b   :  { %v2220_v22 = vsel %vm402_vm6, 1.0, %v4619_v19  ;;  %1002 = vadd.xlane.f32.xlu1 %v1001_v13  ;;  %v789_v33 = vmul.f32 %v693_v35, %v117_v1  ;;  %v2221_v43 = vsel %vm403_vm7, 1.0, %v4619_v19  ;;  %v313_v10 = vld [vmem:[#allocation2 + $0x1d8] sm:$0xff]  ;;  %v120_v54 = vld [vmem:[#allocation5 + $0x1d0] sm:$0xff]  ;;  %vm408_vm8 = vcmp.ge.u32.totalorder %v312_v2, 429496730 }
  0x8c   :  { %4622 = vst [vmem:[#allocation53_spill] sm:$0xff] %v2754_v20  ;;  %4623 = vst [vmem:[#allocation54_spill] sm:$0xff] %v2756_v44  ;;  %v690_v45 = vmul.f32 1.1111112, %v2220_v22  ;;  %v998_v4 = vadd.f32 %v2756_v44, %v2754_v20  ;;  %v2762_v60 = vadd.f32 %v788_v6, %v212_v17  ;;  %v691_v5 = vmul.f32 1.1111112, %v2221_v43 }
  0x8d   :  { %v121_v23 = vld [vmem:[#allocation5 + $0x1d8] sm:$0xff]  ;;  %v2764_v42 = vadd.f32 %v789_v33, %v213_v55  ;;  %v216_v46 = vld [vmem:[#allocation7 + $0x1d0] sm:$0xff]  ;;  %vm409_vm9 = vcmp.ge.u32.totalorder %v313_v10, 429496730  ;;  %v2226_v1 = vsel %vm408_vm8, 1.0, %v4619_v19  ;;  %v310_v13 = vld [vmem:[#allocation2 + $0x1c0] sm:$0xff] }
  0x8e   :  { %4624 = vst [vmem:[#allocation55_spill] sm:$0xff] %v2762_v60  ;;  %v786_v32 = vmul.f32 %v690_v45, %v114_v48  ;;  %v311_v35 = vld [vmem:[#allocation2 + $0x1c8] sm:$0xff]  ;;  %999 = vadd.xlane.f32.xlu0 %v998_v4  ;;  %v787_v22 = vmul.f32 %v691_v5, %v115_v53  ;;  %v217_v58 = vld [vmem:[#allocation7 + $0x1d8] sm:$0xff]  ;;  %v2227_v44 = vsel %vm409_vm9, 1.0, %v4619_v19  ;;  %v696_v17 = vmul.f32 1.1111112, %v2226_v1 }
  0x8f   :  { %4625 = vst [vmem:[#allocation56_spill] sm:$0xff] %v2764_v42  ;;  %vm406_vm10 = vcmp.ge.u32.totalorder %v310_v13, 429496730  ;;  %v1007_v6 = vadd.f32 %v2764_v42, %v2762_v60  ;;  %v697_v55 = vmul.f32 1.1111112, %v2227_v44  ;;  %v118_v45 = vld [vmem:[#allocation5 + $0x1c0] sm:$0xff] }
  0x90   :  { %v2770_v2 = vadd.f32 %v786_v32, %v210_v15  ;;  %v119_v48 = vld [vmem:[#allocation5 + $0x1c8] sm:$0xff]  ;;  %vm407_vm11 = vcmp.ge.u32.totalorder %v311_v35, 429496730  ;;  %v2772_v33 = vadd.f32 %v787_v22, %v211_v14  ;;  %v792_v43 = vmul.f32 %v696_v17, %v120_v54  ;;  %v214_v10 = vld [vmem:[#allocation7 + $0x1c0] sm:$0xff]  ;;  %v316_v5 = vld [vmem:[#allocation2 + $0x1f0] sm:$0xff] }
  0x91   :  { %v2224_v53 = vsel %vm406_vm10, 1.0, %v4619_v19  ;;  %v2225_v4 = vsel %vm407_vm11, 1.0, %v4619_v19  ;;  %v317_v1 = vld [vmem:[#allocation2 + $0x1f8] sm:$0xff]  ;;  %1008 = vadd.xlane.f32.xlu1 %v1007_v6  ;;  %v793_v13 = vmul.f32 %v697_v55, %v121_v23  ;;  %vm412_vm12 = vcmp.ge.u32.totalorder %v316_v5, 429496730  ;;  %v215_v14 = vld [vmem:[#allocation7 + $0x1c8] sm:$0xff] }
  0x92   :  { %4626 = vst [vmem:[#allocation57_spill] sm:$0xff] %v2770_v2  ;;  %4627 = vst [vmem:[#allocation58_spill] sm:$0xff] %v2772_v33  ;;  %v694_v20 = vmul.f32 1.1111112, %v2224_v53  ;;  %v695_v42 = vmul.f32 1.1111112, %v2225_v4  ;;  %v1004_v44 = vadd.f32 %v2772_v33, %v2770_v2  ;;  %v2778_v15 = vadd.f32 %v792_v43, %v216_v46 }
  0x93   :  { %v124_v32 = vld [vmem:[#allocation5 + $0x1f0] sm:$0xff]  ;;  %v125_v54 = vld [vmem:[#allocation5 + $0x1f8] sm:$0xff]  ;;  %vm413_vm13 = vcmp.ge.u32.totalorder %v317_v1, 429496730  ;;  %v2230_v35 = vsel %vm412_vm12, 1.0, %v4619_v19  ;;  %v2781_v22 = vadd.f32 %v793_v13, %v217_v58  ;;  %v314_v55 = vld [vmem:[#allocation2 + $0x1e0] sm:$0xff] }
  0x94   :  { %4628 = vst [vmem:[#allocation59_spill] sm:$0xff] %v2778_v15  ;;  %v790_v17 = vmul.f32 %v694_v20, %v118_v45  ;;  %v791_v60 = vmul.f32 %v695_v42, %v119_v48  ;;  %v220_v6 = vld [vmem:[#allocation7 + $0x1f0] sm:$0xff]  ;;  %v2231_v23 = vsel %vm413_vm13, 1.0, %v4619_v19  ;;  %v315_v53 = vld [vmem:[#allocation2 + $0x1e8] sm:$0xff]  ;;  %1005 = vadd.xlane.f32.xlu0 %v1004_v44  ;;  %v700_v4 = vmul.f32 1.1111112, %v2230_v35 }
  0x95   :  { %4629 = vst [vmem:[#allocation60_spill] sm:$0xff] %v2781_v22  ;;  %v701_v5 = vmul.f32 1.1111112, %v2231_v23  ;;  %vm410_vm14 = vcmp.ge.u32.totalorder %v314_v55, 429496730  ;;  %v1013_v46 = vadd.f32 %v2781_v22, %v2778_v15  ;;  %v221_v58 = vld [vmem:[#allocation7 + $0x1f8] sm:$0xff] }
  0x96   :  { %v2786_v43 = vadd.f32 %v790_v17, %v214_v10  ;;  %v2788_v1 = vadd.f32 %v791_v60, %v215_v14  ;;  %v122_v13 = vld [vmem:[#allocation5 + $0x1e0] sm:$0xff]  ;;  %v123_v20 = vld [vmem:[#allocation5 + $0x1e8] sm:$0xff]  ;;  %vm411_vm15 = vcmp.ge.u32.totalorder %v315_v53, 429496730  ;;  %v796_v42 = vmul.f32 %v700_v4, %v124_v32  ;;  %v320_v35 = vld [vmem:[#allocation2 + $0x210] sm:$0xff] }
  0x97   :  { %v797_v45 = vmul.f32 %v701_v5, %v125_v54  ;;  %v218_v48 = vld [vmem:[#allocation7 + $0x1e0] sm:$0xff]  ;;  %v2228_v33 = vsel %vm410_vm14, 1.0, %v4619_v19  ;;  %v2229_v44 = vsel %vm411_vm15, 1.0, %v4619_v19  ;;  %v321_v23 = vld [vmem:[#allocation2 + $0x218] sm:$0xff]  ;;  %1014 = vadd.xlane.f32.xlu1 %v1013_v46  ;;  %vm416_vm0 = vcmp.ge.u32.totalorder %v320_v35, 429496730 }
  0x98   :  { %4630 = vst [vmem:[#allocation61_spill] sm:$0xff] %v2786_v43  ;;  %4631 = vst [vmem:[#allocation62_spill] sm:$0xff] %v2788_v1  ;;  %v1010_v10 = vadd.f32 %v2788_v1, %v2786_v43  ;;  %v698_v17 = vmul.f32 1.1111112, %v2228_v33  ;;  %v699_v60 = vmul.f32 1.1111112, %v2229_v44  ;;  %v2794_v14 = vadd.f32 %v796_v42, %v220_v6 }
  0x99   :  { %v2796_v55 = vadd.f32 %v797_v45, %v221_v58  ;;  %v219_v32 = vld [vmem:[#allocation7 + $0x1e8] sm:$0xff]  ;;  %v128_v54 = vld [vmem:[#allocation5 + $0x210] sm:$0xff]  ;;  %v129_v53 = vld [vmem:[#allocation5 + $0x218] sm:$0xff]  ;;  %vm417_vm1 = vcmp.ge.u32.totalorder %v321_v23, 429496730  ;;  %v2234_v4 = vsel %vm416_vm0, 1.0, %v4619_v19 }
  0x9a   :  { %4632 = vst [vmem:[#allocation63_spill] sm:$0xff] %v2794_v14  ;;  %1011 = vadd.xlane.f32.xlu0 %v1010_v10  ;;  %v794_v5 = vmul.f32 %v698_v17, %v122_v13  ;;  %v795_v22 = vmul.f32 %v699_v60, %v123_v20  ;;  %v224_v46 = vld [vmem:[#allocation7 + $0x210] sm:$0xff]  ;;  %v2235_v15 = vsel %vm417_vm1, 1.0, %v4619_v19  ;;  %v704_v1 = vmul.f32 1.1111112, %v2234_v4  ;;  %v318_v33 = vld [vmem:[#allocation2 + $0x200] sm:$0xff] }
  0x9b   :  { %4633 = vst [vmem:[#allocation64_spill] sm:$0xff] %v2796_v55  ;;  %v319_v44 = vld [vmem:[#allocation2 + $0x208] sm:$0xff]  ;;  %v1019_v6 = vadd.f32 %v2796_v55, %v2794_v14  ;;  %v705_v58 = vmul.f32 1.1111112, %v2235_v15  ;;  %vm414_vm2 = vcmp.ge.u32.totalorder %v318_v33, 429496730 }
  0x9c   :  { %vm415_vm3 = vcmp.ge.u32.totalorder %v319_v44, 429496730  ;;  %v2802_v42 = vadd.f32 %v794_v5, %v218_v48  ;;  %v2804_v45 = vadd.f32 %v795_v22, %v219_v32  ;;  %v225_v35 = vld [vmem:[#allocation7 + $0x218] sm:$0xff]  ;;  %v800_v23 = vmul.f32 %v704_v1, %v128_v54  ;;  %v126_v13 = vld [vmem:[#allocation5 + $0x200] sm:$0xff]  ;;  %v127_v17 = vld [vmem:[#allocation5 + $0x208] sm:$0xff] }
  0x9d   :  { %v2232_v20 = vsel %vm414_vm2, 1.0, %v4619_v19  ;;  %1020 = vadd.xlane.f32.xlu1 %v1019_v6  ;;  %v801_v10 = vmul.f32 %v705_v58, %v129_v53  ;;  %v2233_v60 = vsel %vm415_vm3, 1.0, %v4619_v19  ;;  %v324_v43 = vld [vmem:[#allocation2 + $0x230] sm:$0xff]  ;;  %v325_v55 = vld [vmem:[#allocation2 + $0x238] sm:$0xff]  ;;  %v222_v22 = vld [vmem:[#allocation7 + $0x200] sm:$0xff] }
  0x9e   :  { %4634 = vst [vmem:[#allocation65_spill] sm:$0xff] %v2802_v42  ;;  %4635 = vst [vmem:[#allocation66_spill] sm:$0xff] %v2804_v45  ;;  %v702_v4 = vmul.f32 1.1111112, %v2232_v20  ;;  %v1016_v15 = vadd.f32 %v2804_v45, %v2802_v42  ;;  %v2810_v48 = vadd.f32 %v800_v23, %v224_v46  ;;  %v223_v32 = vld [vmem:[#allocation7 + $0x208] sm:$0xff]  ;;  %v132_v33 = vld [vmem:[#allocation5 + $0x230] sm:$0xff] }
  0x9f   :  { %v703_v5 = vmul.f32 1.1111112, %v2233_v60  ;;  %vm420_vm4 = vcmp.ge.u32.totalorder %v324_v43, 429496730  ;;  %v2812_v1 = vadd.f32 %v801_v10, %v225_v35  ;;  %v133_v53 = vld [vmem:[#allocation5 + $0x238] sm:$0xff]  ;;  %v322_v6 = vld [vmem:[#allocation2 + $0x220] sm:$0xff] }
  0xa0   :  { %4636 = vst [vmem:[#allocation67_spill] sm:$0xff] %v2810_v48  ;;  %v798_v54 = vmul.f32 %v702_v4, %v126_v13  ;;  %vm421_vm5 = vcmp.ge.u32.totalorder %v325_v55, 429496730  ;;  %v2238_v44 = vsel %vm420_vm4, 1.0, %v4619_v19  ;;  %1017 = vadd.xlane.f32.xlu0 %v1016_v15  ;;  %v323_v46 = vld [vmem:[#allocation2 + $0x228] sm:$0xff]  ;;  %v228_v35 = vld [vmem:[#allocation7 + $0x230] sm:$0xff] }
  0xa1   :  { %4637 = vst [vmem:[#allocation68_spill] sm:$0xff] %v2812_v1  ;;  %v799_v58 = vmul.f32 %v703_v5, %v127_v17  ;;  %v2239_v20 = vsel %vm421_vm5, 1.0, %v4619_v19  ;;  %v708_v45 = vmul.f32 1.1111112, %v2238_v44  ;;  %vm418_vm6 = vcmp.ge.u32.totalorder %v322_v6, 429496730 }
  0xa2   :  { %v1025_v23 = vadd.f32 %v2812_v1, %v2810_v48  ;;  %v2818_v43 = vadd.f32 %v798_v54, %v222_v22  ;;  %v229_v13 = vld [vmem:[#allocation7 + $0x238] sm:$0xff]  ;;  %v709_v10 = vmul.f32 1.1111112, %v2239_v20  ;;  %vm419_vm7 = vcmp.ge.u32.totalorder %v323_v46, 429496730  ;;  %v130_v4 = vld [vmem:[#allocation5 + $0x220] sm:$0xff] }
  0xa3   :  { %v2820_v55 = vadd.f32 %v799_v58, %v223_v32  ;;  %v804_v60 = vmul.f32 %v708_v45, %v132_v33  ;;  %v131_v15 = vld [vmem:[#allocation5 + $0x228] sm:$0xff]  ;;  %v2236_v17 = vsel %vm418_vm6, 1.0, %v4619_v19  ;;  %v2237_v5 = vsel %vm419_vm7, 1.0, %v4619_v19  ;;  %v328_v44 = vld [vmem:[#allocation2 + $0x250] sm:$0xff]  ;;  %v226_v42 = vld [vmem:[#allocation7 + $0x220] sm:$0xff] }
  0xa4   :  { %4638 = vst [vmem:[#allocation69_spill] sm:$0xff] %v2818_v43  ;;  %1026 = vadd.xlane.f32.xlu1 %v1025_v23  ;;  %v805_v6 = vmul.f32 %v709_v10, %v133_v53  ;;  %v706_v1 = vmul.f32 1.1111112, %v2236_v17  ;;  %v707_v22 = vmul.f32 1.1111112, %v2237_v5  ;;  %v329_v54 = vld [vmem:[#allocation2 + $0x258] sm:$0xff] }
  0xa5   :  { %4639 = vst [vmem:[#allocation70_spill] sm:$0xff] %v2820_v55  ;;  %v1022_v20 = vadd.f32 %v2820_v55, %v2818_v43  ;;  %v2826_v46 = vadd.f32 %v804_v60, %v228_v35  ;;  %v227_v32 = vld [vmem:[#allocation7 + $0x228] sm:$0xff]  ;;  %v136_v45 = vld [vmem:[#allocation5 + $0x250] sm:$0xff]  ;;  %vm424_vm8 = vcmp.ge.u32.totalorder %v328_v44, 429496730  ;;  %v137_v14 = vld [vmem:[#allocation5 + $0x258] sm:$0xff] }
  0xa6   :  { %vm425_vm9 = vcmp.ge.u32.totalorder %v329_v54, 429496730  ;;  %v2828_v33 = vadd.f32 %v805_v6, %v229_v13  ;;  %v802_v58 = vmul.f32 %v706_v1, %v130_v4  ;;  %v803_v48 = vmul.f32 %v707_v22, %v131_v15  ;;  %v326_v23 = vld [vmem:[#allocation2 + $0x240] sm:$0xff]  ;;  %v327_v10 = vld [vmem:[#allocation2 + $0x248] sm:$0xff]  ;;  %v232_v17 = vld [vmem:[#allocation7 + $0x250] sm:$0xff] }
  0xa7   :  { %4640 = vst [vmem:[#allocation71_spill] sm:$0xff] %v2826_v46  ;;  %v2242_v53 = vsel %vm424_vm8, 1.0, %v4619_v19  ;;  %1023 = vadd.xlane.f32.xlu0 %v1022_v20  ;;  %v2243_v5 = vsel %vm425_vm9, 1.0, %v4619_v19  ;;  %vm422_vm10 = vcmp.ge.u32.totalorder %v326_v23, 429496730  ;;  %v233_v1 = vld [vmem:[#allocation7 + $0x258] sm:$0xff] }
  0xa8   :  { %4641 = vst [vmem:[#allocation72_spill] sm:$0xff] %v2828_v33  ;;  %v712_v55 = vmul.f32 1.1111112, %v2242_v53  ;;  %v1031_v35 = vadd.f32 %v2828_v33, %v2826_v46  ;;  %v2834_v60 = vadd.f32 %v802_v58, %v226_v42  ;;  %v2836_v13 = vadd.f32 %v803_v48, %v227_v32  ;;  %v134_v15 = vld [vmem:[#allocation5 + $0x240] sm:$0xff]  ;;  %v135_v44 = vld [vmem:[#allocation5 + $0x248] sm:$0xff]  ;;  %v332_v20 = vld [vmem:[#allocation2 + $0x270] sm:$0xff] }
  0xa9   :  { %v713_v4 = vmul.f32 1.1111112, %v2243_v5  ;;  %v230_v22 = vld [vmem:[#allocation7 + $0x240] sm:$0xff]  ;;  %vm423_vm11 = vcmp.ge.u32.totalorder %v327_v10, 429496730  ;;  %v2240_v54 = vsel %vm422_vm10, 1.0, %v4619_v19 }
  0xaa   :  { %4642 = vst [vmem:[#allocation73_spill] sm:$0xff] %v2834_v60  ;;  %4643 = vst [vmem:[#allocation74_spill] sm:$0xff] %v2836_v13  ;;  %v808_v6 = vmul.f32 %v712_v55, %v136_v45  ;;  %v333_v43 = vld [vmem:[#allocation2 + $0x278] sm:$0xff]  ;;  %1032 = vadd.xlane.f32.xlu1 %v1031_v35  ;;  %v1028_v53 = vadd.f32 %v2836_v13, %v2834_v60  ;;  %v231_v42 = vld [vmem:[#allocation7 + $0x248] sm:$0xff]  ;;  %v2241_v48 = vsel %vm423_vm11, 1.0, %v4619_v19 }
  0xab   :  { %v809_v23 = vmul.f32 %v713_v4, %v137_v14  ;;  %v710_v32 = vmul.f32 1.1111112, %v2240_v54  ;;  %v140_v58 = vld [vmem:[#allocation5 + $0x270] sm:$0xff]  ;;  %v141_v5 = vld [vmem:[#allocation5 + $0x278] sm:$0xff]  ;;  %v711_v55 = vmul.f32 1.1111112, %v2241_v48 }
  0xac   :  { %v2842_v33 = vadd.f32 %v808_v6, %v232_v17  ;;  %vm428_vm12 = vcmp.ge.u32.totalorder %v332_v20, 429496730  ;;  %vm429_vm13 = vcmp.ge.u32.totalorder %v333_v43, 429496730  ;;  %1029 = vadd.xlane.f32.xlu0 %v1028_v53  ;;  %v236_v35 = vld [vmem:[#allocation7 + $0x270] sm:$0xff]  ;;  %v330_v4 = vld [vmem:[#allocation2 + $0x260] sm:$0xff] }
  0xad   :  { %v2844_v45 = vadd.f32 %v809_v23, %v233_v1  ;;  %v806_v10 = vmul.f32 %v710_v32, %v134_v15  ;;  %v2246_v46 = vsel %vm428_vm12, 1.0, %v4619_v19  ;;  %v2247_v14 = vsel %vm429_vm13, 1.0, %v4619_v19  ;;  %v331_v13 = vld [vmem:[#allocation2 + $0x268] sm:$0xff]  ;;  %v237_v43 = vld [vmem:[#allocation7 + $0x278] sm:$0xff]  ;;  %v138_v1 = vld [vmem:[#allocation5 + $0x260] sm:$0xff] }
  0xae   :  { %4644 = vst [vmem:[#allocation75_spill] sm:$0xff] %v2842_v33  ;;  %v807_v60 = vmul.f32 %v711_v55, %v135_v44  ;;  %v716_v54 = vmul.f32 1.1111112, %v2246_v46  ;;  %v717_v2 = vmul.f32 1.1111112, %v2247_v14  ;;  %v139_v20 = vld [vmem:[#allocation5 + $0x268] sm:$0xff] }
  0xaf   :  { %4645 = vst [vmem:[#allocation76_spill] sm:$0xff] %v2844_v45  ;;  %vm426_vm14 = vcmp.ge.u32.totalorder %v330_v4, 429496730  ;;  %v1037_v17 = vadd.f32 %v2844_v45, %v2842_v33  ;;  %v2850_v6 = vadd.f32 %v806_v10, %v230_v22  ;;  %vm427_vm15 = vcmp.ge.u32.totalorder %v331_v13, 429496730  ;;  %v234_v32 = vld [vmem:[#allocation7 + $0x260] sm:$0xff] }
  0xb0   :  { %v2244_v15 = vsel %vm426_vm14, 1.0, %v4619_v19  ;;  %v2853_v53 = vadd.f32 %v807_v60, %v231_v42  ;;  %v812_v23 = vmul.f32 %v716_v54, %v140_v58  ;;  %v813_v48 = vmul.f32 %v717_v2, %v141_v5  ;;  %v336_v44 = vld [vmem:[#allocation2 + $0x290] sm:$0xff]  ;;  %v337_v55 = vld [vmem:[#allocation2 + $0x298] sm:$0xff]  ;;  %v235_v60 = vld [vmem:[#allocation7 + $0x268] sm:$0xff] }
  0xb1   :  { %4646 = vst [vmem:[#allocation77_spill] sm:$0xff] %v2850_v6  ;;  %v2245_v46 = vsel %vm427_vm15, 1.0, %v4619_v19  ;;  %1038 = vadd.xlane.f32.xlu1 %v1037_v17  ;;  %v714_v14 = vmul.f32 1.1111112, %v2244_v15  ;;  %vm432_vm0 = vcmp.ge.u32.totalorder %v336_v44, 429496730 }
  0xb2   :  { %4647 = vst [vmem:[#allocation78_spill] sm:$0xff] %v2853_v53  ;;  %v715_v4 = vmul.f32 1.1111112, %v2245_v46  ;;  %v1034_v22 = vadd.f32 %v2853_v53, %v2850_v6  ;;  %v2858_v10 = vadd.f32 %v812_v23, %v236_v35  ;;  %v2860_v13 = vadd.f32 %v813_v48, %v237_v43  ;;  %v144_v42 = vld [vmem:[#allocation5 + $0x290] sm:$0xff]  ;;  %v145_v58 = vld [vmem:[#allocation5 + $0x298] sm:$0xff]  ;;  %v334_v15 = vld [vmem:[#allocation2 + $0x280] sm:$0xff] }
  0xb3   :  { %vm433_vm1 = vcmp.ge.u32.totalorder %v337_v55, 429496730  ;;  %v810_v2 = vmul.f32 %v714_v14, %v138_v1  ;;  %v240_v54 = vld [vmem:[#allocation7 + $0x290] sm:$0xff]  ;;  %v2250_v45 = vsel %vm432_vm0, 1.0, %v4619_v19  ;;  %v335_v46 = vld [vmem:[#allocation2 + $0x288] sm:$0xff]  ;;  %v241_v1 = vld [vmem:[#allocation7 + $0x298] sm:$0xff] }
  0xb4   :  { %4648 = vst [vmem:[#allocation79_spill] sm:$0xff] %v2858_v10  ;;  %4649 = vst [vmem:[#allocation80_spill] sm:$0xff] %v2860_v13  ;;  %v811_v5 = vmul.f32 %v715_v4, %v139_v20  ;;  %v2251_v17 = vsel %vm433_vm1, 1.0, %v4619_v19  ;;  %1035 = vadd.xlane.f32.xlu0 %v1034_v22  ;;  %v1043_v35 = vadd.f32 %v2860_v13, %v2858_v10  ;;  %v720_v23 = vmul.f32 1.1111112, %v2250_v45  ;;  %v142_v20 = vld [vmem:[#allocation5 + $0x280] sm:$0xff] }
  0xb5   :  { %v721_v43 = vmul.f32 1.1111112, %v2251_v17  ;;  %vm430_vm2 = vcmp.ge.u32.totalorder %v334_v15, 429496730  ;;  %v2866_v48 = vadd.f32 %v810_v2, %v234_v32  ;;  %v143_v55 = vld [vmem:[#allocation5 + $0x288] sm:$0xff]  ;;  %v238_v22 = vld [vmem:[#allocation7 + $0x280] sm:$0xff] }
  0xb6   :  { %v2868_v44 = vadd.f32 %v811_v5, %v235_v60  ;;  %vm431_vm3 = vcmp.ge.u32.totalorder %v335_v46, 429496730  ;;  %v2248_v14 = vsel %vm430_vm2, 1.0, %v4619_v19  ;;  %1044 = vadd.xlane.f32.xlu1 %v1043_v35  ;;  %v816_v4 = vmul.f32 %v720_v23, %v144_v42  ;;  %v340_v45 = vld [vmem:[#allocation2 + $0x2b0] sm:$0xff]  ;;  %v341_v17 = vld [vmem:[#allocation2 + $0x2b8] sm:$0xff]  ;;  %v239_v15 = vld [vmem:[#allocation7 + $0x288] sm:$0xff] }
  0xb7   :  { %4650 = vst [vmem:[#allocation81_spill] sm:$0xff] %v2866_v48  ;;  %v817_v53 = vmul.f32 %v721_v43, %v145_v58  ;;  %v2249_v6 = vsel %vm431_vm3, 1.0, %v4619_v19  ;;  %v718_v13 = vmul.f32 1.1111112, %v2248_v14  ;;  %vm436_vm4 = vcmp.ge.u32.totalorder %v340_v45, 429496730 }
  0xb8   :  { %4651 = vst [vmem:[#allocation82_spill] sm:$0xff] %v2868_v44  ;;  %v1040_v32 = vadd.f32 %v2868_v44, %v2866_v48  ;;  %v719_v60 = vmul.f32 1.1111112, %v2249_v6  ;;  %vm437_vm5 = vcmp.ge.u32.totalorder %v341_v17, 429496730  ;;  %v2874_v2 = vadd.f32 %v816_v4, %v240_v54  ;;  %v148_v42 = vld [vmem:[#allocation5 + $0x2b0] sm:$0xff] }
  0xb9   :  { %v2876_v5 = vadd.f32 %v817_v53, %v241_v1  ;;  %v814_v46 = vmul.f32 %v718_v13, %v142_v20  ;;  %v149_v58 = vld [vmem:[#allocation5 + $0x2b8] sm:$0xff]  ;;  %v2254_v35 = vsel %vm436_vm4, 1.0, %v4619_v19  ;;  %v244_v43 = vld [vmem:[#allocation7 + $0x2b0] sm:$0xff]  ;;  %v2255_v14 = vsel %vm437_vm5, 1.0, %v4619_v19  ;;  %v338_v44 = vld [vmem:[#allocation2 + $0x2a0] sm:$0xff] }
  0xba   :  { %4652 = vst [vmem:[#allocation83_spill] sm:$0xff] %v2874_v2  ;;  %1041 = vadd.xlane.f32.xlu0 %v1040_v32  ;;  %v815_v23 = vmul.f32 %v719_v60, %v143_v55  ;;  %v724_v10 = vmul.f32 1.1111112, %v2254_v35  ;;  %v339_v6 = vld [vmem:[#allocation2 + $0x2a8] sm:$0xff]  ;;  %v245_v53 = vld [vmem:[#allocation7 + $0x2b8] sm:$0xff]  ;;  %v146_v13 = vld [vmem:[#allocation5 + $0x2a0] sm:$0xff] }
  0xbb   :  { %4653 = vst [vmem:[#allocation84_spill] sm:$0xff] %v2876_v5  ;;  %v1049_v54 = vadd.f32 %v2876_v5, %v2874_v2  ;;  %v2882_v4 = vadd.f32 %v814_v46, %v238_v22  ;;  %v725_v1 = vmul.f32 1.1111112, %v2255_v14  ;;  %vm434_vm6 = vcmp.ge.u32.totalorder %v338_v44, 429496730  ;;  %v147_v17 = vld [vmem:[#allocation5 + $0x2a8] sm:$0xff] }
  0xbc   :  { %v2884_v20 = vadd.f32 %v815_v23, %v239_v15  ;;  %v820_v45 = vmul.f32 %v724_v10, %v148_v42  ;;  %vm435_vm7 = vcmp.ge.u32.totalorder %v339_v6, 429496730  ;;  %v2252_v55 = vsel %vm434_vm6, 1.0, %v4619_v19  ;;  %v344_v32 = vld [vmem:[#allocation2 + $0x2d0] sm:$0xff]  ;;  %v345_v60 = vld [vmem:[#allocation2 + $0x2d8] sm:$0xff]  ;;  %v242_v48 = vld [vmem:[#allocation7 + $0x2a0] sm:$0xff] }
  0xbd   :  { %4654 = vst [vmem:[#allocation85_spill] sm:$0xff] %v2882_v4  ;;  %1050 = vadd.xlane.f32.xlu1 %v1049_v54  ;;  %v821_v35 = vmul.f32 %v725_v1, %v149_v58  ;;  %v2253_v5 = vsel %vm435_vm7, 1.0, %v4619_v19  ;;  %v722_v22 = vmul.f32 1.1111112, %v2252_v55  ;;  %vm440_vm8 = vcmp.ge.u32.totalorder %v344_v32, 429496730 }
  0xbe   :  { %4655 = vst [vmem:[#allocation86_spill] sm:$0xff] %v2884_v20  ;;  %v1046_v46 = vadd.f32 %v2884_v20, %v2882_v4  ;;  %v2890_v44 = vadd.f32 %v820_v45, %v244_v43  ;;  %v243_v15 = vld [vmem:[#allocation7 + $0x2a8] sm:$0xff]  ;;  %v723_v10 = vmul.f32 1.1111112, %v2253_v5  ;;  %v152_v42 = vld [vmem:[#allocation5 + $0x2d0] sm:$0xff]  ;;  %v153_v6 = vld [vmem:[#allocation5 + $0x2d8] sm:$0xff] }
  0xbf   :  { %vm441_vm9 = vcmp.ge.u32.totalorder %v345_v60, 429496730  ;;  %v2892_v23 = vadd.f32 %v821_v35, %v245_v53  ;;  %v818_v14 = vmul.f32 %v722_v22, %v146_v13  ;;  %v2258_v58 = vsel %vm440_vm8, 1.0, %v4619_v19  ;;  %v342_v1 = vld [vmem:[#allocation2 + $0x2c0] sm:$0xff]  ;;  %v343_v55 = vld [vmem:[#allocation2 + $0x2c8] sm:$0xff]  ;;  %v248_v53 = vld [vmem:[#allocation7 + $0x2d0] sm:$0xff] }
  0xc0   :  { %4656 = vst [vmem:[#allocation87_spill] sm:$0xff] %v2890_v44  ;;  %v2259_v54 = vsel %vm441_vm9, 1.0, %v4619_v19  ;;  %1047 = vadd.xlane.f32.xlu0 %v1046_v46  ;;  %v819_v32 = vmul.f32 %v723_v10, %v147_v17  ;;  %v728_v2 = vmul.f32 1.1111112, %v2258_v58  ;;  %vm438_vm10 = vcmp.ge.u32.totalorder %v342_v1, 429496730 }
  0xc1   :  { %4657 = vst [vmem:[#allocation88_spill] sm:$0xff] %v2892_v23  ;;  %v729_v20 = vmul.f32 1.1111112, %v2259_v54  ;;  %v1055_v5 = vadd.f32 %v2892_v23, %v2890_v44  ;;  %v2898_v43 = vadd.f32 %v818_v14, %v242_v48  ;;  %v249_v45 = vld [vmem:[#allocation7 + $0x2d8] sm:$0xff]  ;;  %v150_v13 = vld [vmem:[#allocation5 + $0x2c0] sm:$0xff]  ;;  %v2256_v60 = vsel %vm438_vm10, 1.0, %v4619_v19 }
  0xc2   :  { %vm439_vm11 = vcmp.ge.u32.totalorder %v343_v55, 429496730  ;;  %v2901_v35 = vadd.f32 %v819_v32, %v243_v15  ;;  %v824_v22 = vmul.f32 %v728_v2, %v152_v42  ;;  %v151_v46 = vld [vmem:[#allocation5 + $0x2c8] sm:$0xff]  ;;  %v348_v10 = vld [vmem:[#allocation2 + $0x2f0] sm:$0xff]  ;;  %v349_v58 = vld [vmem:[#allocation2 + $0x2f8] sm:$0xff] }
  0xc3   :  { %4658 = vst [vmem:[#allocation89_spill] sm:$0xff] %v2898_v43  ;;  %v825_v4 = vmul.f32 %v729_v20, %v153_v6  ;;  %v2257_v17 = vsel %vm439_vm11, 1.0, %v4619_v19  ;;  %1056 = vadd.xlane.f32.xlu1 %v1055_v5  ;;  %v726_v54 = vmul.f32 1.1111112, %v2256_v60  ;;  %vm444_vm12 = vcmp.ge.u32.totalorder %v348_v10, 429496730 }
  0xc4   :  { %4659 = vst [vmem:[#allocation90_spill] sm:$0xff] %v2901_v35  ;;  %v727_v1 = vmul.f32 1.1111112, %v2257_v17  ;;  %v1052_v48 = vadd.f32 %v2901_v35, %v2898_v43  ;;  %v2906_v14 = vadd.f32 %v824_v22, %v248_v53  ;;  %v246_v15 = vld [vmem:[#allocation7 + $0x2c0] sm:$0xff]  ;;  %v247_v32 = vld [vmem:[#allocation7 + $0x2c8] sm:$0xff]  ;;  %v156_v2 = vld [vmem:[#allocation5 + $0x2f0] sm:$0xff] }
  0xc5   :  { %v2908_v55 = vadd.f32 %v825_v4, %v249_v45  ;;  %vm445_vm13 = vcmp.ge.u32.totalorder %v349_v58, 429496730  ;;  %v822_v20 = vmul.f32 %v726_v54, %v150_v13  ;;  %v157_v6 = vld [vmem:[#allocation5 + $0x2f8] sm:$0xff]  ;;  %v2262_v23 = vsel %vm444_vm12, 1.0, %v4619_v19  ;;  %v346_v60 = vld [vmem:[#allocation2 + $0x2e0] sm:$0xff]  ;;  %v347_v17 = vld [vmem:[#allocation2 + $0x2e8] sm:$0xff] }
  0xc6   :  { %4660 = vst [vmem:[#allocation91_spill] sm:$0xff] %v2906_v14  ;;  %v823_v42 = vmul.f32 %v727_v1, %v151_v46  ;;  %v2263_v5 = vsel %vm445_vm13, 1.0, %v4619_v19  ;;  %1053 = vadd.xlane.f32.xlu0 %v1052_v48  ;;  %v732_v22 = vmul.f32 1.1111112, %v2262_v23  ;;  %vm442_vm14 = vcmp.ge.u32.totalorder %v346_v60, 429496730 }
  0xc7   :  { %4661 = vst [vmem:[#allocation92_spill] sm:$0xff] %v2908_v55  ;;  %v1061_v53 = vadd.f32 %v2908_v55, %v2906_v14  ;;  %v733_v4 = vmul.f32 1.1111112, %v2263_v5  ;;  %v2914_v45 = vadd.f32 %v822_v20, %v246_v15  ;;  %v252_v13 = vld [vmem:[#allocation7 + $0x2f0] sm:$0xff]  ;;  %v253_v46 = vld [vmem:[#allocation7 + $0x2f8] sm:$0xff]  ;;  %v154_v58 = vld [vmem:[#allocation5 + $0x2e0] sm:$0xff] }
  0xc8   :  { %v2916_v10 = vadd.f32 %v823_v42, %v247_v32  ;;  %vm443_vm15 = vcmp.ge.u32.totalorder %v347_v17, 429496730  ;;  %v2260_v54 = vsel %vm442_vm14, 1.0, %v4619_v19  ;;  %v828_v1 = vmul.f32 %v732_v22, %v156_v2  ;;  %v155_v48 = vld [vmem:[#allocation5 + $0x2e8] sm:$0xff]  ;;  %v250_v15 = vld [vmem:[#allocation7 + $0x2e0] sm:$0xff] }
  0xc9   :  { %4662 = vst [vmem:[#allocation93_spill] sm:$0xff] %v2914_v45  ;;  %1062 = vadd.xlane.f32.xlu1 %v1061_v53  ;;  %v829_v35 = vmul.f32 %v733_v4, %v157_v6  ;;  %v2261_v43 = vsel %vm443_vm15, 1.0, %v4619_v19  ;;  %v730_v55 = vmul.f32 1.1111112, %v2260_v54  ;;  %v1072_v32 = vmul.f32 %v2578_v3, %v2578_v3  ;;  %v251_v60 = vld [vmem:[#allocation7 + $0x2e8] sm:$0xff] }
  0xca   :  { %4663 = vst [vmem:[#allocation94_spill] sm:$0xff] %v2916_v10  ;;  %v1058_v23 = vadd.f32 %v2916_v10, %v2914_v45  ;;  %v731_v20 = vmul.f32 1.1111112, %v2261_v43  ;;  %v2924_v42 = vadd.f32 %v828_v1, %v252_v13  ;;  %v1073_v2 = vmul.f32 %v2580_v8, %v2580_v8 }
  0xcb   :  { %v2926_v5 = vadd.f32 %v829_v35, %v253_v46  ;;  %v826_v17 = vmul.f32 %v730_v55, %v154_v58  ;;  %v1070_v22 = vmul.f32 %v2562_v39, %v2562_v39  ;;  %v1071_v35 = vmul.f32 %v2564_v40, %v2564_v40 }
  0xcc   :  { %4664 = vst [vmem:[#allocation95_spill] sm:$0xff] %v2924_v42  ;;  %1059 = vadd.xlane.f32.xlu0 %v1058_v23  ;;  %v827_v19 = vmul.f32 %v731_v20, %v155_v48  ;;  %v1169_v55 = vadd.f32 %v1073_v2, %v1072_v32  ;;  %v1076_v4 = vmul.f32 %v2570_v52, %v2570_v52 }
  0xcd   :  { %4665 = vst [vmem:[#allocation96_spill] sm:$0xff] %v2926_v5  ;;  %v1067_v6 = vadd.f32 %v2926_v5, %v2924_v42  ;;  %v2932_v53 = vadd.f32 %v826_v17, %v250_v15  ;;  %v1077_v13 = vmul.f32 %v2572_v56, %v2572_v56  ;;  %v1166_v58 = vadd.f32 %v1071_v35, %v1070_v22 }
  0xce   :  { %v2934_v43 = vadd.f32 %v827_v19, %v251_v60  ;;  %v1074_v54 = vmul.f32 %v2554_v24, %v2554_v24  ;;  %v1075_v1 = vmul.f32 %v2556_v25, %v2556_v25  ;;  %v1080_v23 = vmul.f32 %v2586_v21, %v2586_v21 }
  0xcf   :  { %4666 = vst [vmem:[#allocation97_spill] sm:$0xff] %v2932_v53  ;;  %1068 = vadd.xlane.f32.xlu1 %v1067_v6  ;;  %v1175_v48 = vadd.f32 %v1077_v13, %v1076_v4  ;;  %v1081_v15 = vmul.f32 %v2588_v26, %v2588_v26  ;;  %v1078_v32 = vmul.f32 %v2594_v37, %v2594_v37  ;;  %v2962_v6 = vpop.xlane.xlu1 %933 }
  0xd0   :  { %4667 = vst [vmem:[#allocation98_spill] sm:$0xff] %v2934_v43  ;;  %v1064_v46 = vadd.f32 %v2934_v43, %v2932_v53  ;;  %v1172_v20 = vadd.f32 %v1075_v1, %v1074_v54  ;;  %v1079_v60 = vmul.f32 %v2596_v38, %v2596_v38  ;;  %v1084_v2 = vmul.f32 %v2602_v59, %v2602_v59 }
  0xd1   :  { %v1181_v17 = vadd.f32 %v1081_v15, %v1080_v23  ;;  %v1085_v19 = vmul.f32 %v2604_v61, %v2604_v61  ;;  %v1082_v35 = vmul.f32 %v2610_v11, %v2610_v11  ;;  %v1088_v13 = vmul.f32 %v2618_v30, %v2618_v30 }
  0xd2   :  { %1065 = vadd.xlane.f32.xlu0 %v1064_v46  ;;  %v1178_v22 = vadd.f32 %v1079_v60, %v1078_v32  ;;  %v1089_v46 = vmul.f32 %v2620_v31, %v2620_v31  ;;  %v1086_v1 = vmul.f32 %v2626_v50, %v2626_v50  ;;  %v1093_v32 = vmul.f32 %v2636_v9, %v2636_v9 }
  0xd3   :  { %1170 = vadd.xlane.f32.xlu1 %v1169_v55  ;;  %v1083_v55 = vmul.f32 %v2613_v16, %v2613_v16  ;;  %v1187_v4 = vadd.f32 %v1085_v19, %v1084_v2  ;;  %v1090_v2 = vmul.f32 %v2642_v28, %v2642_v28  ;;  %v1091_v19 = vmul.f32 %v2644_v34, %v2644_v34 }
  0xd4   :  { %v2978_v23 = vpop.xlane.xlu1 %936  ;;  %v1193_v15 = vadd.f32 %v1089_v46, %v1088_v13  ;;  %v1094_v46 = vmul.f32 %v2658_v12, %v2658_v12 }
  0xd5   :  { %v1184_v54 = vadd.f32 %v1083_v55, %v1082_v35  ;;  %v1096_v35 = vmul.f32 %v2650_v49, %v2650_v49  ;;  %v1097_v55 = vmul.f32 %v2652_v57, %v2652_v57  ;;  %v1196_v13 = vadd.f32 %v1091_v19, %v1090_v2 }
  0xd6   :  { %1167 = vadd.xlane.f32.xlu0 %v1166_v58  ;;  %v2972_v58 = vpop.xlane.xlu0 %927  ;;  %v1099_v2 = vmul.f32 %v2676_v0, %v2676_v0 }
  0xd7   :  { %1176 = vadd.xlane.f32.xlu1 %v1175_v48  ;;  %v1087_v48 = vmul.f32 %v2628_v51, %v2628_v51 }
  0xda   :  { %1173 = vadd.xlane.f32.xlu0 %v1172_v20  ;;  %v1092_v20 = vmul.f32 %v2634_v7, %v2634_v7  ;;  %v2984_v60 = vpop.xlane.xlu0 %930 }
  0xdb   :  { %1182 = vadd.xlane.f32.xlu1 %v1181_v17  ;;  %v1190_v17 = vadd.f32 %v1087_v48, %v1086_v1  ;;  %v1205_v1 = vadd.f32 %v1097_v55, %v1096_v35  ;;  %v1100_v48 = vmul.f32 %v2666_v36, %v2666_v36  ;;  %v1104_v35 = vmul.f32 %v2682_v27, %v2682_v27 }
  0xdc   :  { %v1105_v55 = vmul.f32 %v2684_v29, %v2684_v29 }
  0xde   :  { %1179 = vadd.xlane.f32.xlu0 %v1178_v22  ;;  %v1199_v22 = vadd.f32 %v1093_v32, %v1092_v20  ;;  %v3004_v20 = vpop.xlane.xlu0 %939  ;;  %v1217_v0 = vadd.f32 %v1105_v55, %v1104_v35  ;;  %v4672_v35 = vld [vmem:[#allocation43_spill] sm:$0xff] }
  0xdf   :  { %1188 = vadd.xlane.f32.xlu1 %v1187_v4  ;;  %v2994_v4 = vpop.xlane.xlu1 %942  ;;  %v1112_v55 = vmul.f32 %v4672_v35, %v4672_v35 }
  0xe2   :  { %1185 = vadd.xlane.f32.xlu0 %v1184_v54  ;;  %v1095_v54 = vmul.f32 %v2661_v18, %v2661_v18 }
  0xe3   :  { %1194 = vadd.xlane.f32.xlu1 %v1193_v15  ;;  %v1101_v15 = vmul.f32 %v2668_v41, %v2668_v41  ;;  %v3010_v19 = vpop.xlane.xlu1 %948  ;;  %v3016_v41 = vpop.xlane.xlu0 %945 }
  0xe4   :  { %v1202_v32 = vadd.f32 %v1095_v54, %v1094_v46  ;;  %v1102_v46 = vmul.f32 %v2690_v47, %v2690_v47  ;;  %v1103_v54 = vmul.f32 %v2692_v62, %v2692_v62 }
  0xe6   :  { %1191 = vadd.xlane.f32.xlu0 %v1190_v17  ;;  %v1098_v17 = vmul.f32 %v2674_v63, %v2674_v63  ;;  %v1214_v29 = vadd.f32 %v1103_v54, %v1102_v46  ;;  %v4674_v46 = vld [vmem:[#allocation45_spill] sm:$0xff] }
  0xe7   :  { %1200 = vadd.xlane.f32.xlu1 %v1199_v22  ;;  %v1211_v22 = vadd.f32 %v1101_v15, %v1100_v48  ;;  %v4669_v15 = vld [vmem:[#allocation40_spill] sm:$0xff]  ;;  %v3026_v63 = vpop.xlane.xlu1 %954  ;;  %v1110_v54 = vmul.f32 %v4674_v46, %v4674_v46 }
  0xe8   :  { %v1109_v27 = vmul.f32 %v4669_v15, %v4669_v15 }
  0xe9   :  { %v3032_v36 = vpop.xlane.xlu0 %951 }
  0xea   :  { %1197 = vadd.xlane.f32.xlu0 %v1196_v13  ;;  %v1208_v13 = vadd.f32 %v1099_v2, %v1098_v17  ;;  %v4671_v2 = vld [vmem:[#allocation42_spill] sm:$0xff] }
  0xeb   :  { %1206 = vadd.xlane.f32.xlu1 %v1205_v1  ;;  %v4668_v1 = vld [vmem:[#allocation39_spill] sm:$0xff]  ;;  %v1107_v47 = vmul.f32 %v4671_v2, %v4671_v2 }
  0xec   :  { %v1108_v48 = vmul.f32 %v4668_v1, %v4668_v1  ;;  %v4673_v1 = vld [vmem:[#allocation44_spill] sm:$0xff]  ;;  %v3038_v62 = vpop.xlane.xlu1 %960 }
  0xed   :  { %v1113_v15 = vmul.f32 %v4673_v1, %v4673_v1 }
  0xee   :  { %1203 = vadd.xlane.f32.xlu0 %v1202_v32  ;;  %v4670_v32 = vld [vmem:[#allocation41_spill] sm:$0xff] }
  0xef   :  { %1212 = vadd.xlane.f32.xlu1 %v1211_v22  ;;  %v1106_v17 = vmul.f32 %v4670_v32, %v4670_v32  ;;  %v1223_v22 = vadd.f32 %v1109_v27, %v1108_v48  ;;  %v4675_v32 = vld [vmem:[#allocation46_spill] sm:$0xff]  ;;  %v1229_v18 = vadd.f32 %v1113_v15, %v1112_v55  ;;  %v4677_v48 = vld [vmem:[#allocation48_spill] sm:$0xff]  ;;  %v3048_v12 = vpop.xlane.xlu0 %957 }
  0xf0   :  { %v1111_v2 = vmul.f32 %v4675_v32, %v4675_v32  ;;  %v1117_v35 = vmul.f32 %v4677_v48, %v4677_v48  ;;  %v4681_v55 = vld [vmem:[#allocation52_spill] sm:$0xff] }
  0xf2   :  { %1209 = vadd.xlane.f32.xlu0 %v1208_v13  ;;  %v1220_v13 = vadd.f32 %v1107_v47, %v1106_v17  ;;  %v1226_v1 = vadd.f32 %v1111_v2, %v1110_v54  ;;  %v4679_v17 = vld [vmem:[#allocation50_spill] sm:$0xff]  ;;  %v3058_v57 = vpop.xlane.xlu1 %966 }
  0xf3   :  { %1218 = vadd.xlane.f32.xlu1 %v1217_v0  ;;  %v4676_v0 = vld [vmem:[#allocation47_spill] sm:$0xff]  ;;  %v1115_v46 = vmul.f32 %v4679_v17, %v4679_v17  ;;  %v4683_v54 = vld [vmem:[#allocation54_spill] sm:$0xff] }
  0xf4   :  { %v1116_v27 = vmul.f32 %v4676_v0, %v4676_v0  ;;  %v1121_v0 = vmul.f32 %v4681_v55, %v4681_v55 }
  0xf5   :  { %v3064_v49 = vpop.xlane.xlu0 %963 }
  0xf6   :  { %1215 = vadd.xlane.f32.xlu0 %v1214_v29  ;;  %v4678_v29 = vld [vmem:[#allocation49_spill] sm:$0xff]  ;;  %v1235_v32 = vadd.f32 %v1117_v35, %v1116_v27  ;;  %v4684_v35 = vld [vmem:[#allocation55_spill] sm:$0xff]  ;;  %v3326_v11 = vmul.f32 0.00390625, %v3064_v49 }
  0xf7   :  { %1224 = vadd.xlane.f32.xlu1 %v1223_v22  ;;  %v1114_v47 = vmul.f32 %v4678_v29, %v4678_v29  ;;  %v4680_v22 = vld [vmem:[#allocation51_spill] sm:$0xff]  ;;  %v1119_v29 = vmul.f32 %v4683_v54, %v4683_v54  ;;  %v1124_v27 = vmul.f32 %v4684_v35, %v4684_v35 }
  0xf8   :  { %v1120_v15 = vmul.f32 %v4680_v22, %v4680_v22  ;;  %v4685_v22 = vld [vmem:[#allocation56_spill] sm:$0xff]  ;;  %v3070_v17 = vpop.xlane.xlu1 %972  ;;  %4735 = vst [vmem:[#allocation115_spill] sm:$0xff] %v3326_v11  ;;  %v3391_v59 = vmul.f32 %v3326_v11, %v3326_v11 }
  0xf9   :  { %v1232_v48 = vadd.f32 %v1115_v46, %v1114_v47  ;;  %v1125_v55 = vmul.f32 %v4685_v22, %v4685_v22  ;;  %v4686_v46 = vld [vmem:[#allocation57_spill] sm:$0xff]  ;;  %v3339_v51 = vmul.f32 0.00390625, %v3070_v17 }
  0xfa   :  { %1221 = vadd.xlane.f32.xlu0 %v1220_v13  ;;  %v4682_v13 = vld [vmem:[#allocation53_spill] sm:$0xff]  ;;  %v1122_v47 = vmul.f32 %v4686_v46, %v4686_v46  ;;  %4755 = vst [vmem:[#allocation119_spill] sm:$0xff] %v3391_v59 }
  0xfb   :  { %1230 = vadd.xlane.f32.xlu1 %v1229_v18  ;;  %v1118_v2 = vmul.f32 %v4682_v13, %v4682_v13  ;;  %v1241_v18 = vadd.f32 %v1121_v0, %v1120_v15  ;;  %v4687_v13 = vld [vmem:[#allocation58_spill] sm:$0xff]  ;;  %v1247_v34 = vadd.f32 %v1125_v55, %v1124_v27  ;;  %v4689_v15 = vld [vmem:[#allocation60_spill] sm:$0xff]  ;;  %v3080_v28 = vpop.xlane.xlu0 %969  ;;  %4736 = vst [vmem:[#allocation116_spill] sm:$0xff] %v3339_v51 }
  0xfc   :  { %v1123_v54 = vmul.f32 %v4687_v13, %v4687_v13  ;;  %v1129_v35 = vmul.f32 %v4689_v15, %v4689_v15  ;;  %4690 = vst [vmem:[#allocation99_spill] sm:$0xff] %v3080_v28 }
  0xfe   :  { %1227 = vadd.xlane.f32.xlu0 %v1226_v1  ;;  %v1238_v1 = vadd.f32 %v1119_v29, %v1118_v2  ;;  %v1244_v22 = vadd.f32 %v1123_v54, %v1122_v47  ;;  %v4692_v2 = vld [vmem:[#allocation62_spill] sm:$0xff]  ;;  %v3086_v9 = vpop.xlane.xlu1 %978 }
  0xff   :  { %1236 = vadd.xlane.f32.xlu1 %v1235_v32  ;;  %v4688_v32 = vld [vmem:[#allocation59_spill] sm:$0xff]  ;;  %v1127_v46 = vmul.f32 %v4692_v2, %v4692_v2  ;;  %4693 = vst [vmem:[#allocation100_spill] sm:$0xff] %v3086_v9 }
 0x100   :  { %v1128_v0 = vmul.f32 %v4688_v32, %v4688_v32  ;;  %v4695_v32 = vld [vmem:[#allocation64_spill] sm:$0xff] }
 0x101   :  { %v1133_v15 = vmul.f32 %v4695_v32, %v4695_v32 }
 0x102   :  { %1233 = vadd.xlane.f32.xlu0 %v1232_v48  ;;  %v4691_v48 = vld [vmem:[#allocation61_spill] sm:$0xff]  ;;  %v1253_v55 = vadd.f32 %v1129_v35, %v1128_v0  ;;  %v3092_v13 = vpop.xlane.xlu0 %975  ;;  %v4700_v0 = vld [vmem:[#allocation68_spill] sm:$0xff] }
 0x103   :  { %1242 = vadd.xlane.f32.xlu1 %v1241_v18  ;;  %v1126_v29 = vmul.f32 %v4691_v48, %v4691_v48  ;;  %v4694_v18 = vld [vmem:[#allocation63_spill] sm:$0xff]  ;;  %4696 = vst [vmem:[#allocation101_spill] sm:$0xff] %v3092_v13  ;;  %v4698_v48 = vld [vmem:[#allocation66_spill] sm:$0xff] }
 0x104   :  { %v1132_v27 = vmul.f32 %v4694_v18, %v4694_v18  ;;  %v1131_v2 = vmul.f32 %v4698_v48, %v4698_v48  ;;  %v1137_v18 = vmul.f32 %v4700_v0, %v4700_v0 }
 0x105   :  { %v1250_v54 = vadd.f32 %v1127_v46, %v1126_v29  ;;  %v3102_v28 = vpop.xlane.xlu1 %984  ;;  %v4703_v29 = vld [vmem:[#allocation70_spill] sm:$0xff] }
 0x106   :  { %1239 = vadd.xlane.f32.xlu0 %v1238_v1  ;;  %v4697_v1 = vld [vmem:[#allocation65_spill] sm:$0xff]  ;;  %v1259_v9 = vadd.f32 %v1133_v15, %v1132_v27  ;;  %4701 = vst [vmem:[#allocation102_spill] sm:$0xff] %v3102_v28  ;;  %v4705_v27 = vld [vmem:[#allocation72_spill] sm:$0xff] }
 0x107   :  { %1248 = vadd.xlane.f32.xlu1 %v1247_v34  ;;  %v1130_v47 = vmul.f32 %v4697_v1, %v4697_v1  ;;  %v4699_v34 = vld [vmem:[#allocation67_spill] sm:$0xff]  ;;  %v1135_v1 = vmul.f32 %v4703_v29, %v4703_v29 }
 0x108   :  { %v1136_v35 = vmul.f32 %v4699_v34, %v4699_v34  ;;  %v1141_v34 = vmul.f32 %v4705_v27, %v4705_v27  ;;  %v3112_v13 = vpop.xlane.xlu0 %981 }
 0x109   :  { %v1256_v32 = vadd.f32 %v1131_v2, %v1130_v47  ;;  %v4707_v47 = vld [vmem:[#allocation74_spill] sm:$0xff] }
 0x10a   :  { %1245 = vadd.xlane.f32.xlu0 %v1244_v22  ;;  %v4702_v22 = vld [vmem:[#allocation69_spill] sm:$0xff]  ;;  %v1265_v48 = vadd.f32 %v1137_v18, %v1136_v35  ;;  %v3118_v28 = vpop.xlane.xlu1 %990  ;;  %v1144_v18 = vmul.f32 %v2842_v33, %v2842_v33  ;;  %v4709_v35 = vld [vmem:[#allocation76_spill] sm:$0xff] }
 0x10b   :  { %1254 = vadd.xlane.f32.xlu1 %v1253_v55  ;;  %v1134_v46 = vmul.f32 %v4702_v22, %v4702_v22  ;;  %v4704_v55 = vld [vmem:[#allocation71_spill] sm:$0xff]  ;;  %v1139_v22 = vmul.f32 %v4707_v47, %v4707_v47  ;;  %4708 = vst [vmem:[#allocation103_spill] sm:$0xff] %v3118_v28  ;;  %v1145_v27 = vmul.f32 %v4709_v35, %v4709_v35 }
 0x10c   :  { %v1140_v15 = vmul.f32 %v4704_v55, %v4704_v55 }
 0x10d   :  { %v1262_v0 = vadd.f32 %v1135_v1, %v1134_v46  ;;  %v4711_v1 = vld [vmem:[#allocation77_spill] sm:$0xff]  ;;  %v1277_v29 = vadd.f32 %v1145_v27, %v1144_v18 }
 0x10e   :  { %1251 = vadd.xlane.f32.xlu0 %v1250_v54  ;;  %v4706_v54 = vld [vmem:[#allocation73_spill] sm:$0xff]  ;;  %v1142_v46 = vmul.f32 %v4711_v1, %v4711_v1 }
 0x10f   :  { %1260 = vadd.xlane.f32.xlu1 %v1259_v9  ;;  %v1138_v2 = vmul.f32 %v4706_v54, %v4706_v54  ;;  %v1271_v9 = vadd.f32 %v1141_v34, %v1140_v15  ;;  %v3124_v55 = vpop.xlane.xlu0 %987  ;;  %v4712_v54 = vld [vmem:[#allocation78_spill] sm:$0xff]  ;;  %v4714_v15 = vld [vmem:[#allocation80_spill] sm:$0xff] }
 0x110   :  { %4710 = vst [vmem:[#allocation104_spill] sm:$0xff] %v3124_v55  ;;  %v1143_v47 = vmul.f32 %v4712_v54, %v4712_v54  ;;  %v1149_v33 = vmul.f32 %v4714_v15, %v4714_v15 }
 0x112   :  { %1257 = vadd.xlane.f32.xlu0 %v1256_v32  ;;  %v1268_v32 = vadd.f32 %v1139_v22, %v1138_v2  ;;  %v3134_v28 = vpop.xlane.xlu1 %996  ;;  %v1274_v35 = vadd.f32 %v1143_v47, %v1142_v46  ;;  %v4716_v2 = vld [vmem:[#allocation82_spill] sm:$0xff]  ;;  %v4762_v11 = vld [vmem:[#allocation103_spill] sm:$0xff] }
 0x113   :  { %1266 = vadd.xlane.f32.xlu1 %v1265_v48  ;;  %v4713_v48 = vld [vmem:[#allocation79_spill] sm:$0xff]  ;;  %v1147_v1 = vmul.f32 %v4716_v2, %v4716_v2  ;;  %v3409_v59 = vmul.f32 0.00390625, %v4762_v11 }
 0x114   :  { %v1148_v34 = vmul.f32 %v4713_v48, %v4713_v48  ;;  %v3140_v55 = vpop.xlane.xlu0 %993  ;;  %v4719_v48 = vld [vmem:[#allocation84_spill] sm:$0xff] }
 0x115   :  { %4717 = vst [vmem:[#allocation105_spill] sm:$0xff] %v3140_v55  ;;  %v1153_v15 = vmul.f32 %v4719_v48, %v4719_v48  ;;  %4763 = vst [vmem:[#allocation103_spill] sm:$0xff] %v3409_v59 }
 0x116   :  { %1263 = vadd.xlane.f32.xlu0 %v1262_v0  ;;  %v4715_v0 = vld [vmem:[#allocation81_spill] sm:$0xff]  ;;  %v1283_v27 = vadd.f32 %v1149_v33, %v1148_v34  ;;  %v1156_v33 = vmul.f32 %v2890_v44, %v2890_v44 }
 0x117   :  { %1272 = vadd.xlane.f32.xlu1 %v1271_v9  ;;  %v1146_v22 = vmul.f32 %v4715_v0, %v4715_v0  ;;  %v4718_v9 = vld [vmem:[#allocation83_spill] sm:$0xff]  ;;  %v4721_v0 = vld [vmem:[#allocation86_spill] sm:$0xff] }
 0x118   :  { %v1152_v18 = vmul.f32 %v4718_v9, %v4718_v9  ;;  %v3146_v54 = vpop.xlane.xlu1 %1002  ;;  %v1151_v2 = vmul.f32 %v4721_v0, %v4721_v0 }
 0x119   :  { %v1280_v47 = vadd.f32 %v1147_v1, %v1146_v22  ;;  %v4724_v22 = vld [vmem:[#allocation90_spill] sm:$0xff] }
 0x11a   :  { %1269 = vadd.xlane.f32.xlu0 %v1268_v32  ;;  %v4720_v32 = vld [vmem:[#allocation85_spill] sm:$0xff]  ;;  %v1289_v55 = vadd.f32 %v1153_v15, %v1152_v18  ;;  %v1160_v15 = vmul.f32 %v2906_v14, %v2906_v14  ;;  %v3297_v14 = vmul.f32 0.00390625, %v3048_v12  ;;  %v3315_v12 = vmul.f32 0.00390625, %v3058_v57 }
 0x11b   :  { %1278 = vadd.xlane.f32.xlu1 %v1277_v29  ;;  %v1150_v46 = vmul.f32 %v4720_v32, %v4720_v32  ;;  %v4722_v29 = vld [vmem:[#allocation88_spill] sm:$0xff]  ;;  %v3156_v9 = vpop.xlane.xlu0 %999  ;;  %v1155_v32 = vmul.f32 %v4724_v22, %v4724_v22 }
 0x11c   :  { %v1157_v34 = vmul.f32 %v4722_v29, %v4722_v29  ;;  %4733 = vst [vmem:[#allocation113_spill] sm:$0xff] %v3297_v14  ;;  %4734 = vst [vmem:[#allocation114_spill] sm:$0xff] %v3315_v12 }
 0x11d   :  { %v1286_v48 = vadd.f32 %v1151_v2, %v1150_v46  ;;  %v1158_v2 = vmul.f32 %v2914_v45, %v2914_v45 }
 0x11e   :  { %1275 = vadd.xlane.f32.xlu0 %v1274_v35  ;;  %v4723_v35 = vld [vmem:[#allocation89_spill] sm:$0xff]  ;;  %v1295_v0 = vadd.f32 %v1157_v34, %v1156_v33  ;;  %v3166_v44 = vpop.xlane.xlu1 %1008  ;;  %v1164_v33 = vmul.f32 %v2924_v42, %v2924_v42  ;;  %v1165_v34 = vmul.f32 %v2926_v5, %v2926_v5 }
 0x11f   :  { %1284 = vadd.xlane.f32.xlu1 %v1283_v27  ;;  %v1154_v1 = vmul.f32 %v4723_v35, %v4723_v35  ;;  %v4725_v27 = vld [vmem:[#allocation92_spill] sm:$0xff] }
 0x120   :  { %v1161_v18 = vmul.f32 %v4725_v27, %v4725_v27  ;;  %v1946_v35 = vld [vmem:[%s4338_s4] sm:$0x3]  ;;  %s2467_s4 = smov [#allocation8]  }
 0x121   :  { %v1292_v29 = vadd.f32 %v1155_v32, %v1154_v1  ;;  %v3172_v46 = vpop.xlane.xlu0 %1005  ;;  %v1162_v32 = vmul.f32 %v2932_v53, %v2932_v53  ;;  %v1163_v1 = vmul.f32 %v2934_v43, %v2934_v43  ;;  %v3231_v43 = vmul.f32 0.00390625, %v3026_v63  ;;  %s2155_s8 = sshll.u32 %s2467_s4, 4  ;;  %s2156_s8 = int_to_ptr.vmem [resolvable:$true] %s2155_s8 }
 0x122   :  { %1281 = vadd.xlane.f32.xlu0 %v1280_v47  ;;  %v1159_v47 = vmul.f32 %v2916_v10, %v2916_v10  ;;  %v1307_v10 = vadd.f32 %v1165_v34, %v1164_v33  ;;  %v3203_v34 = vmul.f32 0.00390625, %v2978_v23  ;;  %s2433_s9 = scalar_lea.vmem %s2156_s8, 12288  ;;  %p2438_p11 = scmp.lt.s32.totalorder %s2156_s8, %s2156_s8 }
 0x123   :  { %1290 = vadd.xlane.f32.xlu1 %v1289_v55  ;;  %v1301_v55 = vadd.f32 %v1161_v18, %v1160_v15  ;;  %v1304_v15 = vadd.f32 %v1163_v1, %v1162_v32  ;;  %v3209_v32 = vmul.f32 0.00390625, %v2994_v4  ;;  %v3212_v1 = vmul.f32 0.00390625, %v3004_v20  ;;  %4730 = vst [vmem:[#allocation110_spill] sm:$0xff] %v3231_v43  ;;  %p2434_p10 = scmp.ne.s32.totalorder %s2156_s8, %s2433_s9  ;;  %p2439_p12 = scmp.lt.s32.totalorder %s2433_s9, %s2433_s9 }
 0x124   :  { %v3178_v27 = vpop.xlane.xlu1 %1014  ;;  %v3228_v20 = vmul.f32 0.00390625, %v3016_v41  ;;  %v3277_v4 = vmul.f32 0.00390625, %v3038_v62  ;;  %v1838_v41 = vld [vmem:[%s4337_s3] sm:$0x3]  ;;  %v3323_v16 = vmul.f32 %v3231_v43, %v3231_v43 }
 0x125   :  { %4726 = vst [vmem:[#allocation106_spill] sm:$0xff] %v3209_v32  ;;  %4727 = vst [vmem:[#allocation107_spill] sm:$0xff] %v3212_v1  ;;  %v3306_v31 = vmul.f32 %v3212_v1, %v3212_v1  ;;  %p2440_p13 = por %p2439_p12, %p2438_p11 }
 0x126   :  { %1287 = vadd.xlane.f32.xlu0 %v1286_v48  ;;  %v1298_v48 = vadd.f32 %v1159_v47, %v1158_v2  ;;  %v3195_v47 = vmul.f32 0.00390625, %v2962_v6  ;;  %4729 = vst [vmem:[#allocation109_spill] sm:$0xff] %v3228_v20  ;;  %v3256_v6 = vmul.f32 0.00390625, %v3032_v36  ;;  %4732 = vst [vmem:[#allocation112_spill] sm:$0xff] %v3277_v4  ;;  %v3319_v50 = vmul.f32 %v3228_v20, %v3228_v20 }
 0x127   :  { %1296 = vadd.xlane.f32.xlu1 %v1295_v0  ;;  %v3184_v0 = vpop.xlane.xlu0 %1011  ;;  %v3356_v57 = vmul.f32 %v3277_v4, %v3277_v4  ;;  %v4748_v4 = vld [vmem:[#allocation101_spill] sm:$0xff]  ;;  %p2441_p0 = pnand %p2440_p13, %p2434_p10 }
 0x128   :  { %4731 = vst [vmem:[#allocation111_spill] sm:$0xff] %v3256_v6  ;;  %v3334_v62 = vmul.f32 %v3256_v6, %v3256_v6  ;;  %v4739_v6 = vld [vmem:[#allocation99_spill] sm:$0xff]  ;;  %v3516_v11 = vmul.f32 0.00390625, %v3184_v0 }
 0x129   :  { %v3352_v37 = vmul.f32 0.00390625, %v4739_v6 }
 0x12a   :  { %1293 = vadd.xlane.f32.xlu0 %v1292_v29  ;;  %v3186_v18 = vpop.xlane.xlu1 %1020  ;;  %4797 = vst [vmem:[#allocation133_spill] sm:$0xff] %v3516_v11 }
 0x12b   :  { %1302 = vadd.xlane.f32.xlu1 %v1301_v55  ;;  %v3198_v55 = vmul.f32 0.00390625, %v2972_v58  ;;  %4740 = vst [vmem:[#allocation99_spill] sm:$0xff] %v3352_v37 }
 0x12d   :  { %v3188_v5 = vpop.xlane.xlu0 %1017  ;;  %v3274_v63 = vmul.f32 %v3198_v55, %v3198_v55 }
 0x12e   :  { %1299 = vadd.xlane.f32.xlu0 %v1298_v48  ;;  %v1840_v48 = vlaneseq }
 0x12f   :  { %1308 = vadd.xlane.f32.xlu1 %v1307_v10  ;;  %v3206_v10 = vmul.f32 0.00390625, %v2984_v60  ;;  %v3292_v60 = vmul.f32 %v3209_v32, %v3209_v32  ;;  %v3374_v32 = vmul.f32 0.00390625, %v4748_v4 }
 0x130   :  { %v1841_v53 = vshrl.u32 %v1840_v48, 7 }
 0x131   :  { %v3190_v29 = vpop.xlane.xlu1 %1026  ;;  %v3270_v36 = vmul.f32 %v3206_v10, %v3206_v10  ;;  %4749 = vst [vmem:[#allocation101_spill] sm:$0xff] %v3374_v32  ;;  %v3437_v6 = vmul.f32 %v3374_v32, %v3374_v32  ;;  %v3492_v32 = vmul.f32 0.00390625, %v3172_v46 }
 0x132   :  { %1305 = vadd.xlane.f32.xlu0 %v1304_v15  ;;  %v3219_v15 = vmul.f32 0.00390625, %v3010_v19  ;;  %v1842_v48 = vsub.s32 0, %v1841_v53  ;;  %v1846_v45 = vsub.s32 1, %v1841_v53  ;;  %v3284_v19 = vmul.f32 %v3203_v34, %v3203_v34 }
 0x133   :  { %v3288_v53 = vmul.f32 %v3195_v47, %v3195_v47  ;;  %4790 = vst [vmem:[#allocation130_spill] sm:$0xff] %v3492_v32  ;;  %v3555_v46 = vmul.f32 %v3492_v32, %v3492_v32 }
 0x134   :  { %v3192_v2 = vpop.xlane.xlu0 %1023  ;;  %4728 = vst [vmem:[#allocation108_spill] sm:$0xff] %v3219_v15  ;;  %v3310_v30 = vmul.f32 %v3219_v15, %v3219_v15  ;;  %v3328_v61 = vrot.slane %v1838_v41, %v1842_v48  ;;  %v3330_v15 = vrot.slane %v1838_v41, %v1846_v45  ;;  %v3343_v43 = vrot.slane %v1946_v35, %v1842_v48 }
 0x135   :  { %v3345_v49 = vrot.slane %v1946_v35, %v1846_v45  ;;  %v4743_v35 = vld [vmem:[#allocation100_spill] sm:$0xff]  ;;  %v3367_v41 = vmul.f32 %v3297_v14, %v3297_v14  ;;  %v3380_v45 = vmul.f32 %v3315_v12, %v3315_v12  ;;  %v3402_v48 = vmul.f32 %v3339_v51, %v3339_v51 }
 0x136   :  { %v3363_v26 = vmul.f32 0.00390625, %v4743_v35  ;;  %v3415_v12 = vmul.f32 %v3352_v37, %v3352_v37  ;;  %v3457_v51 = vmul.f32 0.00390625, %v3146_v54 }
 0x137   :  { %v3200_v33 = vpop.xlane.xlu1 %1032  ;;  %4745 = vst [vmem:[#allocation117_spill] sm:$0xff] %v3367_v41  ;;  %4750 = vst [vmem:[#allocation118_spill] sm:$0xff] %v3380_v45  ;;  %v4753_v41 = vld [vmem:[#allocation102_spill] sm:$0xff]  ;;  %v3398_v45 = vmul.f32 0.00390625, %v3112_v13 }
 0x138   :  { %4744 = vst [vmem:[#allocation100_spill] sm:$0xff] %v3363_v26  ;;  %v3387_v1 = vmul.f32 0.00390625, %v4753_v41  ;;  %4759 = vst [vmem:[#allocation121_spill] sm:$0xff] %v3402_v48  ;;  %v4767_v48 = vld [vmem:[#allocation104_spill] sm:$0xff]  ;;  %v3426_v35 = vmul.f32 %v3363_v26, %v3363_v26  ;;  %v4775_v26 = vld [vmem:[#allocation105_spill] sm:$0xff]  ;;  %v3472_v41 = vmul.f32 %v3409_v59, %v3409_v59  ;;  %v3573_v32 = vmul.f32 0.00390625, %v3200_v33 }
 0x139   :  { %v3221_v23 = vpop.xlane.xlu0 %1029  ;;  %4758 = vst [vmem:[#allocation120_spill] sm:$0xff] %v3398_v45  ;;  %4764 = vst [vmem:[#allocation122_spill] sm:$0xff] %v3415_v12  ;;  %v3422_v14 = vmul.f32 0.00390625, %v4767_v48  ;;  %v3433_v12 = vmul.f32 0.00390625, %v3134_v28  ;;  %v3461_v13 = vmul.f32 %v3398_v45, %v3398_v45  ;;  %v3479_v45 = vmul.f32 0.00390625, %v3166_v44 }
 0x13a   :  { %4754 = vst [vmem:[#allocation102_spill] sm:$0xff] %v3387_v1  ;;  %4769 = vst [vmem:[#allocation123_spill] sm:$0xff] %v3426_v35  ;;  %v3444_v35 = vmul.f32 0.00390625, %v4775_v26  ;;  %v3450_v37 = vmul.f32 %v3387_v1, %v3387_v1 }
 0x13b   :  { %4768 = vst [vmem:[#allocation104_spill] sm:$0xff] %v3422_v14  ;;  %4772 = vst [vmem:[#allocation124_spill] sm:$0xff] %v3433_v12  ;;  %v3485_v1 = vmul.f32 %v3422_v14, %v3422_v14  ;;  %v3496_v28 = vmul.f32 %v3433_v12, %v3433_v12  ;;  %v3520_v14 = vmul.f32 %v3457_v51, %v3457_v51  ;;  %v3551_v12 = vmul.f32 0.00390625, %v3190_v29 }
 0x13c   :  { %4776 = vst [vmem:[#allocation105_spill] sm:$0xff] %v3444_v35  ;;  %4777 = vst [vmem:[#allocation125_spill] sm:$0xff] %v3450_v37  ;;  %v3468_v37 = vmul.f32 0.00390625, %v3156_v9  ;;  %v3509_v59 = vmul.f32 %v3444_v35, %v3444_v35  ;;  %v3544_v35 = vmul.f32 %v3479_v45, %v3479_v45  ;;  %v3633_v29 = vmul.f32 %v3573_v32, %v3573_v32 }
 0x13d   :  { %4780 = vst [vmem:[#allocation126_spill] sm:$0xff] %v3457_v51  ;;  %4786 = vst [vmem:[#allocation128_spill] sm:$0xff] %v3479_v45  ;;  %v3538_v51 = vmul.f32 0.00390625, %v3188_v5  ;;  %v3579_v45 = vmul.f32 %v3516_v11, %v3516_v11  ;;  %v3614_v11 = vmul.f32 %v3551_v12, %v3551_v12 }
 0x13e   :  { %v3247_v58 = vpop.xlane.xlu1 %1038  ;;  %4783 = vst [vmem:[#allocation127_spill] sm:$0xff] %v3468_v37  ;;  %4787 = vst [vmem:[#allocation129_spill] sm:$0xff] %v3485_v1  ;;  %v3503_v1 = vmul.f32 0.00390625, %v3178_v27  ;;  %v3531_v26 = vmul.f32 %v3468_v37, %v3468_v37  ;;  %v3586_v37 = vmul.f32 0.00390625, %v3221_v23 }
 0x13f   :  { %4794 = vst [vmem:[#allocation132_spill] sm:$0xff] %v3509_v59  ;;  %v3527_v59 = vmul.f32 0.00390625, %v3186_v18  ;;  %4803 = vst [vmem:[#allocation135_spill] sm:$0xff] %v3538_v51  ;;  %v3601_v0 = vmul.f32 %v3538_v51, %v3538_v51 }
 0x140   :  { %4793 = vst [vmem:[#allocation131_spill] sm:$0xff] %v3503_v1  ;;  %4804 = vst [vmem:[#allocation136_spill] sm:$0xff] %v3544_v35  ;;  %v3562_v35 = vmul.f32 0.00390625, %v3192_v2  ;;  %v3566_v44 = vmul.f32 %v3503_v1, %v3503_v1  ;;  %v3644_v5 = vmul.f32 %v3586_v37, %v3586_v37 }
 0x141   :  { %v3266_v42 = vpop.xlane.xlu0 %1035  ;;  %4800 = vst [vmem:[#allocation134_spill] sm:$0xff] %v3527_v59  ;;  %4807 = vst [vmem:[#allocation137_spill] sm:$0xff] %v3551_v12  ;;  %v3590_v18 = vmul.f32 %v3527_v59, %v3527_v59 }
 0x142   :  { %4810 = vst [vmem:[#allocation138_spill] sm:$0xff] %v3562_v35  ;;  %4813 = vst [vmem:[#allocation139_spill] sm:$0xff] %v3573_v32  ;;  %v3608_v59 = vmul.f32 0.00390625, %v3266_v42  ;;  %v3624_v42 = vmul.f32 %v3562_v35, %v3562_v35 }
 0x143   :  { %v3299_v22 = vpop.xlane.xlu1 %1044  ;;  %4814 = vst [vmem:[#allocation140_spill] sm:$0xff] %v3579_v45  ;;  %4817 = vst [vmem:[#allocation141_spill] sm:$0xff] %v3586_v37  ;;  %v3597_v45 = vmul.f32 0.00390625, %v3247_v58 }
 0x144   :  { %4821 = vst [vmem:[#allocation143_spill] sm:$0xff] %v3601_v0  ;;  %4824 = vst [vmem:[#allocation144_spill] sm:$0xff] %v3608_v59  ;;  %v3629_v12 = vmul.f32 0.00390625, %v3299_v22 }
 0x145   :  { %4820 = vst [vmem:[#allocation142_spill] sm:$0xff] %v3597_v45  ;;  %4825 = vst [vmem:[#allocation145_spill] sm:$0xff] %v3614_v11  ;;  %v3653_v33 = vmul.f32 %v3597_v45, %v3597_v45 }
 0x146   :  { %4830 = vst [vmem:[#allocation146_spill] sm:$0xff] %v3629_v12  ;;  %4831 = vst [vmem:[#allocation147_spill] sm:$0xff] %v3633_v29 }
 0x147   :  { %v3341_v20 = vpop.xlane.xlu0 %1041  ;;  %4837 = vst [vmem:[#allocation149_spill] sm:$0xff] %v3653_v33 }
 0x148   :  { %v3640_v58 = vmul.f32 0.00390625, %v3341_v20  ;;  %v3676_v20 = vmul.f32 %v3629_v12, %v3629_v12  ;;  %v4846_v12 = vld [vmem:[#allocation84_spill] sm:$0xff] }
 0x14a   :  { %v3376_v7 = vpop.xlane.xlu1 %1050  ;;  %4834 = vst [vmem:[#allocation148_spill] sm:$0xff] %v3640_v58 }
 0x14b   :  { %v3658_v23 = vmul.f32 0.00390625, %v3376_v7 }
 0x14d   :  { %v3411_v38 = vpop.xlane.xlu0 %1047  ;;  %v3697_v1 = vmul.f32 %v3658_v23, %v3658_v23 }
 0x14e   :  { %v3671_v7 = vmul.f32 0.00390625, %v3411_v38 }
 0x150   :  { %v3446_v17 = vpop.xlane.xlu1 %1056  ;;  %4842 = vst [vmem:[#allocation150_spill] sm:$0xff] %v3671_v7 }
 0x153   :  { %v3481_v4 = vpop.xlane.xlu0 %1053 }
 0x156   :  { %v3505_v48 = vpop.xlane.xlu1 %1062 }
 0x159   :  { %v3540_v54 = vpop.xlane.xlu0 %1059 }
 0x15c   :  { %v3575_v9 = vpop.xlane.xlu1 %1068 }
 0x15f   :  { %v3610_v27 = vpop.xlane.xlu0 %1065 }
 0x160   :  { %v1171_v0 = vpop.xlane.xlu1 %1170 }
 0x161   :  { %v1359_v11 = vmul.f32 0.00390625, %v1171_v0  ;;  %v3662_v0 = vmul.f32 %v3608_v59, %v3608_v59  ;;  %v4850_v59 = vld [vmem:[#allocation88_spill] sm:$0xff] }
 0x163   :  { %v1455_v35 = vsub.f32 %v1359_v11, %v3270_v36  ;;  %v1168_v29 = vpop.xlane.xlu0 %1167 }
 0x164   :  { %v1358_v51 = vmul.f32 0.00390625, %v1168_v29  ;;  %v1177_v37 = vpop.xlane.xlu1 %1176 }
 0x165   :  { %v1503_v22 = vmax.f32 %v1455_v35, 0.0  ;;  %v1361_v45 = vmul.f32 0.00390625, %v1177_v37  ;;  %v3683_v37 = vmul.f32 %v3640_v58, %v3640_v58 }
 0x166   :  { %v1454_v29 = vsub.f32 %v1358_v51, %v3274_v63  ;;  %v3688_v51 = vmul.f32 0.00390625, %v3446_v17 }
 0x167   :  { %v1551_v32 = vadd.f32 1e-12, %v1503_v22  ;;  %v1457_v2 = vsub.f32 %v1361_v45, %v3284_v19  ;;  %v1174_v35 = vpop.xlane.xlu0 %1173  ;;  %4844 = vst [vmem:[#allocation151_spill] sm:$0xff] %v3683_v37 }
 0x168   :  { %v1502_v63 = vmax.f32 %v1454_v29, 0.0  ;;  %v1360_v33 = vmul.f32 0.00390625, %v1174_v35  ;;  %v1183_v11 = vpop.xlane.xlu1 %1182 }
 0x169   :  { %2271 = vrsqrt.f32 %v1551_v32  ;;  %v1505_v22 = vmax.f32 %v1457_v2, 0.0  ;;  %v1363_v19 = vmul.f32 0.00390625, %v1183_v11  ;;  %v3704_v32 = vmul.f32 %v3671_v7, %v3671_v7  ;;  %v4849_v2 = vld [vmem:[#allocation87_spill] sm:$0xff] }
 0x16a   :  { %v1550_v58 = vadd.f32 1e-12, %v1502_v63  ;;  %v1456_v37 = vsub.f32 %v1360_v33, %v3288_v53 }
 0x16b   :  { %v1553_v35 = vadd.f32 1e-12, %v1505_v22  ;;  %v1459_v38 = vsub.f32 %v1363_v19, %v3292_v60  ;;  %v1180_v36 = vpop.xlane.xlu0 %1179  ;;  %v3711_v60 = vmul.f32 0.00390625, %v3481_v4  ;;  %v3714_v19 = vmul.f32 0.00390625, %v3505_v48 }
 0x16c   :  { %2273 = vrsqrt.f32 %v1550_v58  ;;  %v1504_v53 = vmax.f32 %v1456_v37, 0.0  ;;  %v1362_v33 = vmul.f32 0.00390625, %v1180_v36  ;;  %v1189_v63 = vpop.xlane.xlu1 %1188  ;;  %v3718_v58 = vmul.f32 0.00390625, %v3540_v54 }
 0x16d   :  { %2275 = vrsqrt.f32 %v1553_v35  ;;  %v1507_v29 = vmax.f32 %v1459_v38, 0.0  ;;  %v1365_v22 = vmul.f32 0.00390625, %v1189_v63  ;;  %4851 = vst [vmem:[#allocation84_spill] sm:$0xff] %v3711_v60  ;;  %4852 = vst [vmem:[#allocation87_spill] sm:$0xff] %v3714_v19  ;;  %v3721_v36 = vmul.f32 0.00390625, %v3575_v9 }
 0x16e   :  { %v1552_v17 = vadd.f32 1e-12, %v1504_v53  ;;  %v1458_v7 = vsub.f32 %v1362_v33, %v3306_v31  ;;  %4853 = vst [vmem:[#allocation88_spill] sm:$0xff] %v3718_v58  ;;  %v3726_v48 = vmul.f32 %v3688_v51, %v3688_v51  ;;  %v3729_v31 = vmul.f32 0.00390625, %v3610_v27 }
 0x16f   :  { %4854 = vst [vmem:[#allocation152_spill] sm:$0xff] %v3721_v36  ;;  %v1555_v37 = vadd.f32 1e-12, %v1507_v29  ;;  %v1461_v35 = vsub.f32 %v1365_v22, %v3310_v30  ;;  %v1186_v38 = vpop.xlane.xlu0 %1185  ;;  %v3734_v30 = vmul.f32 %v3711_v60, %v3711_v60 }
 0x170   :  { %2277 = vrsqrt.f32 %v1552_v17  ;;  %v1506_v63 = vmax.f32 %v1458_v7, 0.0  ;;  %v1364_v4 = vmul.f32 0.00390625, %v1186_v38  ;;  %v1195_v45 = vpop.xlane.xlu1 %1194  ;;  %v3738_v7 = vmul.f32 %v3714_v19, %v3714_v19 }
 0x171   :  { %2279 = vrsqrt.f32 %v1555_v37  ;;  %v1509_v54 = vmax.f32 %v1461_v35, 0.0  ;;  %v1367_v53 = vmul.f32 0.00390625, %v1195_v45  ;;  %v3743_v37 = vmul.f32 %v3718_v58, %v3718_v58 }
 0x172   :  { %v1554_v9 = vadd.f32 1e-12, %v1506_v63  ;;  %v1460_v29 = vsub.f32 %v1364_v4, %v3319_v50  ;;  %v3747_v50 = vmul.f32 %v3721_v36, %v3721_v36  ;;  %v4855_v45 = vsub.f32 %v2578_v3, %v3206_v10 }
 0x173   :  { %v2272_v17 = vpop.eup %2271  ;;  %v1557_v33 = vadd.f32 1e-12, %v1509_v54  ;;  %v1463_v22 = vsub.f32 %v1367_v53, %v3323_v16  ;;  %v1192_v27 = vpop.xlane.xlu0 %1191  ;;  %v4856_v38 = vsub.f32 %v2580_v8, %v3206_v10  ;;  %v3757_v11 = vmul.f32 %v3729_v31, %v3729_v31 }
 0x174   :  { %v1744_v35 = vmul.f32 %v2272_v17, %v4855_v45  ;;  %2281 = vrsqrt.f32 %v1554_v9  ;;  %v1508_v4 = vmax.f32 %v1460_v29, 0.0  ;;  %v1201_v16 = vpop.xlane.xlu1 %1200  ;;  %v1366_v53 = vmul.f32 0.00390625, %v1192_v27 }
 0x175   :  { %v1745_v63 = vmul.f32 %v2272_v17, %v4856_v38  ;;  %2283 = vrsqrt.f32 %v1557_v33  ;;  %v1511_v54 = vmax.f32 %v1463_v22, 0.0  ;;  %v1369_v19 = vmul.f32 0.00390625, %v1201_v16 }
 0x176   :  { %v2274_v36 = vpop.eup %2273  ;;  %v1852_v58 = vmul.f32 %v3328_v61, %v1744_v35  ;;  %v1556_v45 = vadd.f32 1e-12, %v1508_v4  ;;  %v4857_v8 = vsub.f32 %v2562_v39, %v3198_v55  ;;  %v4858_v9 = vsub.f32 %v2564_v40, %v3198_v55 }
 0x177   :  { %v1853_v3 = vmul.f32 %v3330_v15, %v1745_v63  ;;  %v2276_v60 = vpop.eup %2275  ;;  %v1559_v17 = vadd.f32 1e-12, %v1511_v54  ;;  %v1462_v33 = vsub.f32 %v1366_v53, %v3334_v62  ;;  %v1198_v22 = vpop.xlane.xlu0 %1197  ;;  %v4859_v38 = vsub.f32 %v2570_v52, %v3203_v34 }
 0x178   :  { %v1742_v10 = vmul.f32 %v2274_v36, %v4857_v8  ;;  %v1743_v29 = vmul.f32 %v2274_v36, %v4858_v9  ;;  %v1960_v27 = vadd.f32 %v3343_v43, %v1852_v58  ;;  %v4860_v39 = vsub.f32 %v2572_v56, %v3203_v34  ;;  %v1207_v16 = vpop.xlane.xlu1 %1206 }
 0x179   :  { %v1961_v35 = vadd.f32 %v3345_v49, %v1853_v3  ;;  %v1748_v63 = vmul.f32 %v2276_v60, %v4859_v38  ;;  %2285 = vrsqrt.f32 %v1556_v45  ;;  %v1510_v62 = vmax.f32 %v1462_v33, 0.0  ;;  %v4865_v33 = vld [vmem:[#allocation12_spill] sm:$0xff] }
 0x17a   :  { %v1749_v4 = vmul.f32 %v2276_v60, %v4860_v39  ;;  %v1850_v40 = vmul.f32 %v3328_v61, %v1742_v10  ;;  %v1851_v55 = vmul.f32 %v3330_v15, %v1743_v29  ;;  %v2278_v36 = vpop.eup %2277  ;;  %2056 = vst [vmem:[#allocation8 + $0x10] sm:$0xff] %v1960_v27  ;;  %2287 = vrsqrt.f32 %v1559_v17 }
 0x17b   :  { %2057 = vst [vmem:[#allocation8 + $0x18] sm:$0xff] %v1961_v35  ;;  %v1856_v58 = vmul.f32 %v3328_v61, %v1748_v63  ;;  %v1465_v52 = vsub.f32 %v1369_v19, %v3356_v57  ;;  %v2280_v53 = vpop.eup %2279  ;;  %v4861_v60 = vsub.f32 %v2554_v24, %v3195_v47  ;;  %v4862_v45 = vsub.f32 %v2556_v25, %v3195_v47  ;;  %v1204_v10 = vpop.xlane.xlu0 %1203  ;;  %v4863_v57 = vld [vmem:[#allocation106_spill] sm:$0xff] }
 0x17c   :  { %v1857_v54 = vmul.f32 %v3330_v15, %v1749_v4  ;;  %v1958_v56 = vadd.f32 %v3343_v43, %v1850_v40  ;;  %v1959_v34 = vadd.f32 %v3345_v49, %v1851_v55  ;;  %v4864_v19 = vsub.f32 %v2586_v21, %v4863_v57  ;;  %v1213_v38 = vpop.xlane.xlu1 %1212 }
 0x17d   :  { %v1746_v3 = vmul.f32 %v2278_v36, %v4861_v60  ;;  %v1747_v8 = vmul.f32 %v2278_v36, %v4862_v45  ;;  %v1964_v9 = vadd.f32 %v3343_v43, %v1856_v58  ;;  %v4866_v27 = vsub.f32 %v4865_v33, %v4863_v57 }
 0x17e   :  { %v1965_v29 = vadd.f32 %v3345_v49, %v1857_v54  ;;  %v1752_v17 = vmul.f32 %v2280_v53, %v4864_v19  ;;  %2054 = vst [vmem:[#allocation8] sm:$0xff] %v1958_v56  ;;  %2055 = vst [vmem:[#allocation8 + $0x8] sm:$0xff] %v1959_v34  ;;  %v1558_v47 = vadd.f32 1e-12, %v1510_v62  ;;  %v1513_v63 = vmax.f32 %v1465_v52, 0.0  ;;  %v2282_v39 = vpop.eup %2281  ;;  %v4868_v56 = vld [vmem:[#allocation107_spill] sm:$0xff] }
 0x17f   :  { %v1753_v35 = vmul.f32 %v2280_v53, %v4866_v27  ;;  %v1854_v24 = vmul.f32 %v3328_v61, %v1746_v3  ;;  %v1855_v25 = vmul.f32 %v3330_v15, %v1747_v8  ;;  %2060 = vst [vmem:[#allocation8 + $0x30] sm:$0xff] %v1964_v9  ;;  %v1368_v40 = vmul.f32 0.00390625, %v1198_v22  ;;  %v2284_v36 = vpop.eup %2283  ;;  %v4867_v53 = vld [vmem:[#allocation13_spill] sm:$0xff]  ;;  %v4870_v62 = vld [vmem:[#allocation14_spill] sm:$0xff]  ;;  %v1210_v45 = vpop.xlane.xlu0 %1209  ;;  %v4872_v22 = vld [vmem:[#allocation15_spill] sm:$0xff] }
 0x180   :  { %2061 = vst [vmem:[#allocation8 + $0x38] sm:$0xff] %v1965_v29  ;;  %v1860_v4 = vmul.f32 %v3328_v61, %v1752_v17  ;;  %v1371_v55 = vmul.f32 0.00390625, %v1207_v16  ;;  %v4869_v34 = vsub.f32 %v4867_v53, %v4868_v56  ;;  %v4871_v52 = vsub.f32 %v4870_v62, %v4868_v56  ;;  %v4873_v16 = vld [vmem:[#allocation108_spill] sm:$0xff]  ;;  %v1219_v27 = vpop.xlane.xlu1 %1218  ;;  %v4878_v56 = vld [vmem:[#allocation118_spill] sm:$0xff] }
 0x181   :  { %v1861_v21 = vmul.f32 %v3330_v15, %v1753_v35  ;;  %v1962_v58 = vadd.f32 %v3343_v43, %v1854_v24  ;;  %v1963_v54 = vadd.f32 %v3345_v49, %v1855_v25  ;;  %v4874_v29 = vsub.f32 %v4872_v22, %v4873_v16  ;;  %v4875_v19 = vld [vmem:[#allocation16_spill] sm:$0xff] }
 0x182   :  { %v1750_v60 = vmul.f32 %v2282_v39, %v4869_v34  ;;  %v1751_v3 = vmul.f32 %v2282_v39, %v4871_v52  ;;  %v1968_v8 = vadd.f32 %v3343_v43, %v1860_v4  ;;  %v4876_v17 = vsub.f32 %v4875_v19, %v4873_v16  ;;  %v4885_v19 = vld [vmem:[#allocation110_spill] sm:$0xff] }
 0x183   :  { %v1969_v9 = vadd.f32 %v3345_v49, %v1861_v21  ;;  %v1756_v57 = vmul.f32 %v2284_v36, %v4874_v29  ;;  %2058 = vst [vmem:[#allocation8 + $0x20] sm:$0xff] %v1962_v58  ;;  %2059 = vst [vmem:[#allocation8 + $0x28] sm:$0xff] %v1963_v54  ;;  %2289 = vrsqrt.f32 %v1558_v47  ;;  %v1561_v25 = vadd.f32 1e-12, %v1513_v63  ;;  %v4877_v21 = vld [vmem:[#allocation117_spill] sm:$0xff]  ;;  %v1216_v62 = vpop.xlane.xlu0 %1215 }
 0x184   :  { %v1757_v33 = vmul.f32 %v2284_v36, %v4876_v17  ;;  %v1858_v35 = vmul.f32 %v3328_v61, %v1750_v60  ;;  %v1859_v24 = vmul.f32 %v3330_v15, %v1751_v3  ;;  %2064 = vst [vmem:[#allocation8 + $0x50] sm:$0xff] %v1968_v8  ;;  %v1464_v53 = vsub.f32 %v1368_v40, %v4877_v21  ;;  %v2286_v36 = vpop.eup %2285  ;;  %v4879_v3 = vld [vmem:[#allocation17_spill] sm:$0xff]  ;;  %v4882_v40 = vld [vmem:[#allocation18_spill] sm:$0xff]  ;;  %v1225_v29 = vpop.xlane.xlu1 %1224 }
 0x185   :  { %2065 = vst [vmem:[#allocation8 + $0x58] sm:$0xff] %v1969_v9  ;;  %v1864_v39 = vmul.f32 %v3328_v61, %v1756_v57  ;;  %v1467_v34 = vsub.f32 %v1371_v55, %v4878_v56  ;;  %2291 = vrsqrt.f32 %v1561_v25  ;;  %v1370_v60 = vmul.f32 0.00390625, %v1204_v10  ;;  %v2288_v47 = vpop.eup %2287  ;;  %v4880_v8 = vld [vmem:[#allocation109_spill] sm:$0xff]  ;;  %v4884_v57 = vld [vmem:[#allocation19_spill] sm:$0xff] }
 0x186   :  { %v1865_v4 = vmul.f32 %v3330_v15, %v1757_v33  ;;  %v1966_v58 = vadd.f32 %v3343_v43, %v1858_v35  ;;  %v1967_v54 = vadd.f32 %v3345_v49, %v1859_v24  ;;  %v4881_v9 = vsub.f32 %v4879_v3, %v4880_v8  ;;  %v4887_v33 = vld [vmem:[#allocation20_spill] sm:$0xff]  ;;  %v4889_v56 = vld [vmem:[#allocation119_spill] sm:$0xff] }
 0x187   :  { %v1972_v63 = vadd.f32 %v3343_v43, %v1864_v39  ;;  %v4883_v55 = vsub.f32 %v4882_v40, %v4880_v8  ;;  %v4886_v10 = vsub.f32 %v4884_v57, %v4885_v19  ;;  %v4888_v35 = vsub.f32 %v4887_v33, %v4885_v19  ;;  %v1222_v40 = vpop.xlane.xlu0 %1221 }
 0x188   :  { %v1973_v52 = vadd.f32 %v3345_v49, %v1865_v4  ;;  %v1754_v22 = vmul.f32 %v2286_v36, %v4881_v9  ;;  %2062 = vst [vmem:[#allocation8 + $0x40] sm:$0xff] %v1966_v58  ;;  %2063 = vst [vmem:[#allocation8 + $0x48] sm:$0xff] %v1967_v54  ;;  %v1512_v25 = vmax.f32 %v1464_v53, 0.0  ;;  %v1515_v39 = vmax.f32 %v1467_v34, 0.0 }
 0x189   :  { %v1755_v16 = vmul.f32 %v2286_v36, %v4883_v55  ;;  %v1760_v17 = vmul.f32 %v2288_v47, %v4886_v10  ;;  %v1761_v24 = vmul.f32 %v2288_v47, %v4888_v35  ;;  %2068 = vst [vmem:[#allocation8 + $0x70] sm:$0xff] %v1972_v63  ;;  %v1466_v36 = vsub.f32 %v1370_v60, %v4889_v56  ;;  %v4890_v63 = vld [vmem:[#allocation121_spill] sm:$0xff] }
 0x18a   :  { %2069 = vst [vmem:[#allocation8 + $0x78] sm:$0xff] %v1973_v52  ;;  %v1862_v4 = vmul.f32 %v3328_v61, %v1754_v22  ;;  %v1373_v58 = vmul.f32 0.00390625, %v1213_v38  ;;  %v1560_v8 = vadd.f32 1e-12, %v1512_v25  ;;  %v1563_v9 = vadd.f32 1e-12, %v1515_v39  ;;  %v1231_v22 = vpop.xlane.xlu1 %1230 }
 0x18b   :  { %v1863_v21 = vmul.f32 %v3330_v15, %v1755_v16  ;;  %v1868_v54 = vmul.f32 %v3328_v61, %v1760_v17  ;;  %v1869_v3 = vmul.f32 %v3330_v15, %v1761_v24  ;;  %v1514_v34 = vmax.f32 %v1466_v36, 0.0  ;;  %v4891_v17 = vld [vmem:[#allocation122_spill] sm:$0xff]  ;;  %v1228_v39 = vpop.xlane.xlu0 %1227 }
 0x18c   :  { %v1970_v47 = vadd.f32 %v3343_v43, %v1862_v4  ;;  %v1469_v52 = vsub.f32 %v1373_v58, %v4890_v63  ;;  %2293 = vrsqrt.f32 %v1560_v8  ;;  %v1372_v38 = vmul.f32 0.00390625, %v1210_v45  ;;  %v4892_v4 = vld [vmem:[#allocation21_spill] sm:$0xff]  ;;  %v4895_v45 = vld [vmem:[#allocation22_spill] sm:$0xff] }
 0x18d   :  { %v1971_v53 = vadd.f32 %v3345_v49, %v1863_v21  ;;  %v1976_v55 = vadd.f32 %v3343_v43, %v1868_v54  ;;  %v1977_v60 = vadd.f32 %v3345_v49, %v1869_v3  ;;  %2295 = vrsqrt.f32 %v1563_v9  ;;  %v2290_v10 = vpop.eup %2289  ;;  %v4893_v21 = vld [vmem:[#allocation111_spill] sm:$0xff] }
 0x18e   :  { %2066 = vst [vmem:[#allocation8 + $0x60] sm:$0xff] %v1970_v47  ;;  %v1562_v16 = vadd.f32 1e-12, %v1514_v34  ;;  %v1517_v57 = vmax.f32 %v1469_v52, 0.0  ;;  %v1375_v19 = vmul.f32 0.00390625, %v1219_v27  ;;  %v1468_v33 = vsub.f32 %v1372_v38, %v4891_v17  ;;  %v1237_v27 = vpop.xlane.xlu1 %1236  ;;  %v4897_v47 = vld [vmem:[#allocation123_spill] sm:$0xff] }
 0x18f   :  { %2067 = vst [vmem:[#allocation8 + $0x68] sm:$0xff] %v1971_v53  ;;  %2072 = vst [vmem:[#allocation8 + $0x90] sm:$0xff] %v1976_v55  ;;  %v1374_v35 = vmul.f32 0.00390625, %v1216_v62  ;;  %v1377_v24 = vmul.f32 0.00390625, %v1225_v29  ;;  %v1376_v25 = vmul.f32 0.00390625, %v1222_v40  ;;  %v4894_v56 = vsub.f32 %v4892_v4, %v4893_v21  ;;  %v2292_v8 = vpop.eup %2291  ;;  %v4898_v29 = vld [vmem:[#allocation125_spill] sm:$0xff]  ;;  %v3867_v4 = vpop.xlane.xlu0 %1233 }
 0x190   :  { %2073 = vst [vmem:[#allocation8 + $0x98] sm:$0xff] %v1977_v60  ;;  %v4896_v58 = vsub.f32 %v4895_v45, %v4893_v21  ;;  %2297 = vrsqrt.f32 %v1562_v16  ;;  %v1565_v3 = vadd.f32 1e-12, %v1517_v57  ;;  %v1516_v9 = vmax.f32 %v1468_v33, 0.0  ;;  %v4899_v52 = vld [vmem:[#allocation23_spill] sm:$0xff]  ;;  %v4900_v55 = vld [vmem:[#allocation112_spill] sm:$0xff] }
 0x191   :  { %v1758_v36 = vmul.f32 %v2290_v10, %v4894_v56  ;;  %v1471_v53 = vsub.f32 %v1375_v19, %v4897_v47  ;;  %v1470_v62 = vsub.f32 %v1374_v35, %v3437_v6  ;;  %v1473_v40 = vsub.f32 %v1377_v24, %v4898_v29 }
 0x192   :  { %v1759_v54 = vmul.f32 %v2290_v10, %v4896_v58  ;;  %v4901_v60 = vsub.f32 %v4899_v52, %v4900_v55  ;;  %v4902_v10 = vld [vmem:[#allocation24_spill] sm:$0xff]  ;;  %2299 = vrsqrt.f32 %v1565_v3  ;;  %v1564_v17 = vadd.f32 1e-12, %v1516_v9  ;;  %v3873_v56 = vpop.xlane.xlu1 %1242  ;;  %v4905_v52 = vld [vmem:[#allocation113_spill] sm:$0xff] }
 0x193   :  { %v1866_v34 = vmul.f32 %v3328_v61, %v1758_v36  ;;  %v4903_v16 = vsub.f32 %v4902_v10, %v4900_v55  ;;  %v1519_v33 = vmax.f32 %v1471_v53, 0.0  ;;  %v1518_v19 = vmax.f32 %v1470_v62, 0.0 }
 0x194   :  { %v1867_v63 = vmul.f32 %v3330_v15, %v1759_v54  ;;  %v1764_v38 = vmul.f32 %v2292_v8, %v4901_v60  ;;  %2301 = vrsqrt.f32 %v1564_v17  ;;  %v1521_v58 = vmax.f32 %v1473_v40, 0.0  ;;  %v4904_v40 = vld [vmem:[#allocation25_spill] sm:$0xff] }
 0x195   :  { %v1765_v57 = vmul.f32 %v2292_v8, %v4903_v16  ;;  %v1974_v6 = vadd.f32 %v3343_v43, %v1866_v34  ;;  %v1567_v36 = vadd.f32 1e-12, %v1519_v33  ;;  %v1566_v45 = vadd.f32 1e-12, %v1518_v19  ;;  %v3878_v34 = vpop.xlane.xlu0 %1239 }
 0x196   :  { %v1975_v35 = vadd.f32 %v3345_v49, %v1867_v63  ;;  %v1872_v24 = vmul.f32 %v3328_v61, %v1764_v38  ;;  %v1472_v8 = vsub.f32 %v1376_v25, %v3461_v13  ;;  %v1379_v9 = vmul.f32 0.00390625, %v1231_v22  ;;  %v2294_v47 = vpop.eup %2293  ;;  %v4907_v38 = vld [vmem:[#allocation26_spill] sm:$0xff]  ;;  %v4909_v22 = vld [vmem:[#allocation27_spill] sm:$0xff] }
 0x197   :  { %v1873_v21 = vmul.f32 %v3330_v15, %v1765_v57  ;;  %2070 = vst [vmem:[#allocation8 + $0x80] sm:$0xff] %v1974_v6  ;;  %2303 = vrsqrt.f32 %v1567_v36  ;;  %v1569_v53 = vadd.f32 1e-12, %v1521_v58  ;;  %v1378_v62 = vmul.f32 0.00390625, %v1228_v39  ;;  %v2296_v63 = vpop.eup %2295  ;;  %v4910_v25 = vld [vmem:[#allocation114_spill] sm:$0xff]  ;;  %v4914_v36 = vld [vmem:[#allocation129_spill] sm:$0xff]  ;;  %v3896_v58 = vpop.xlane.xlu1 %1248 }
 0x198   :  { %2071 = vst [vmem:[#allocation8 + $0x88] sm:$0xff] %v1975_v35  ;;  %v1980_v54 = vadd.f32 %v3343_v43, %v1872_v24  ;;  %v1381_v29 = vmul.f32 0.00390625, %v1237_v27  ;;  %v4906_v55 = vsub.f32 %v4904_v40, %v4905_v52  ;;  %v4908_v10 = vsub.f32 %v4907_v38, %v4905_v52  ;;  %v4912_v27 = vld [vmem:[#allocation28_spill] sm:$0xff]  ;;  %v4918_v40 = vld [vmem:[#allocation30_spill] sm:$0xff] }
 0x199   :  { %v1981_v3 = vadd.f32 %v3345_v49, %v1873_v21  ;;  %2305 = vrsqrt.f32 %v1566_v45  ;;  %v1520_v13 = vmax.f32 %v1472_v8, 0.0  ;;  %v4911_v57 = vsub.f32 %v4909_v22, %v4910_v25  ;;  %v4915_v8 = vld [vmem:[#allocation29_spill] sm:$0xff] }
 0x19a   :  { %2076 = vst [vmem:[#allocation8 + $0xb0] sm:$0xff] %v1980_v54  ;;  %v1762_v60 = vmul.f32 %v2294_v47, %v4906_v55  ;;  %v1763_v16 = vmul.f32 %v2294_v47, %v4908_v10  ;;  %v4913_v17 = vsub.f32 %v4912_v27, %v4910_v25  ;;  %2307 = vrsqrt.f32 %v1569_v53  ;;  %v2298_v6 = vpop.eup %2297  ;;  %v4916_v47 = vld [vmem:[#allocation115_spill] sm:$0xff] }
 0x19b   :  { %2077 = vst [vmem:[#allocation8 + $0xb8] sm:$0xff] %v1981_v3  ;;  %v1768_v39 = vmul.f32 %v2296_v63, %v4911_v57  ;;  %v1475_v19 = vsub.f32 %v1379_v9, %v3472_v41  ;;  %v1568_v21 = vadd.f32 1e-12, %v1520_v13  ;;  %v1474_v45 = vsub.f32 %v1378_v62, %v4914_v36  ;;  %v4920_v25 = vld [vmem:[#allocation31_spill] sm:$0xff]  ;;  %v4921_v57 = vld [vmem:[#allocation116_spill] sm:$0xff] }
 0x19c   :  { %v1769_v33 = vmul.f32 %v2296_v63, %v4913_v17  ;;  %v1870_v35 = vmul.f32 %v3328_v61, %v1762_v60  ;;  %v1871_v24 = vmul.f32 %v3330_v15, %v1763_v16  ;;  %v4917_v63 = vsub.f32 %v4915_v8, %v4916_v47  ;;  %v3908_v60 = vpop.xlane.xlu0 %1245  ;;  %v2300_v38 = vpop.eup %2299  ;;  %v4923_v17 = vld [vmem:[#allocation32_spill] sm:$0xff] }
 0x19d   :  { %v1876_v54 = vmul.f32 %v3328_v61, %v1768_v39  ;;  %v4919_v41 = vsub.f32 %v4918_v40, %v4916_v47  ;;  %2309 = vrsqrt.f32 %v1568_v21  ;;  %v1523_v62 = vmax.f32 %v1475_v19, 0.0 }
 0x19e   :  { %v1877_v3 = vmul.f32 %v3330_v15, %v1769_v33  ;;  %v1766_v53 = vmul.f32 %v2298_v6, %v4917_v63  ;;  %v1978_v52 = vadd.f32 %v3343_v43, %v1870_v35  ;;  %v1979_v55 = vadd.f32 %v3345_v49, %v1871_v24  ;;  %v2302_v24 = vpop.eup %2301  ;;  %v4925_v63 = vld [vmem:[#allocation33_spill] sm:$0xff] }
 0x19f   :  { %v1767_v9 = vmul.f32 %v2298_v6, %v4919_v41  ;;  %v1984_v10 = vadd.f32 %v3343_v43, %v1876_v54  ;;  %v4922_v39 = vsub.f32 %v4920_v25, %v4921_v57  ;;  %v4924_v33 = vsub.f32 %v4923_v17, %v4921_v57  ;;  %v4932_v17 = vld [vmem:[#allocation100_spill] sm:$0xff] }
 0x1a0   :  { %v1985_v16 = vadd.f32 %v3345_v49, %v1877_v3  ;;  %v1874_v13 = vmul.f32 %v3328_v61, %v1766_v53  ;;  %2074 = vst [vmem:[#allocation8 + $0xa0] sm:$0xff] %v1978_v52  ;;  %2075 = vst [vmem:[#allocation8 + $0xa8] sm:$0xff] %v1979_v55  ;;  %v1571_v6 = vadd.f32 1e-12, %v1523_v62  ;;  %v1522_v35 = vmax.f32 %v1474_v45, 0.0  ;;  %v4926_v53 = vld [vmem:[#allocation99_spill] sm:$0xff]  ;;  %v3932_v55 = vpop.xlane.xlu1 %1254  ;;  %v3939_v57 = vpop.xlane.xlu0 %1251 }
 0x1a1   :  { %v1875_v22 = vmul.f32 %v3330_v15, %v1767_v9  ;;  %v1772_v27 = vmul.f32 %v2300_v38, %v4922_v39  ;;  %v1773_v19 = vmul.f32 %v2300_v38, %v4924_v33  ;;  %2080 = vst [vmem:[#allocation8 + $0xd0] sm:$0xff] %v1984_v10  ;;  %v1477_v54 = vsub.f32 %v1381_v29, %v3496_v28  ;;  %v4928_v45 = vld [vmem:[#allocation34_spill] sm:$0xff]  ;;  %v2304_v62 = vpop.eup %2303  ;;  %v4930_v29 = vld [vmem:[#allocation132_spill] sm:$0xff] }
 0x1a2   :  { %2081 = vst [vmem:[#allocation8 + $0xd8] sm:$0xff] %v1985_v16  ;;  %v1982_v21 = vadd.f32 %v3343_v43, %v1874_v13  ;;  %v1380_v3 = vmul.f32 0.00390625, %v3867_v4  ;;  %v4927_v40 = vsub.f32 %v4925_v63, %v4926_v53  ;;  %v4929_v9 = vsub.f32 %v4928_v45, %v4926_v53  ;;  %v4942_v45 = vld [vmem:[#allocation102_spill] sm:$0xff] }
 0x1a3   :  { %v1983_v36 = vadd.f32 %v3345_v49, %v1875_v22  ;;  %v1880_v8 = vmul.f32 %v3328_v61, %v1772_v27  ;;  %v1881_v47 = vmul.f32 %v3330_v15, %v1773_v19  ;;  %2311 = vrsqrt.f32 %v1571_v6  ;;  %v2306_v10 = vpop.eup %2305  ;;  %v4931_v27 = vld [vmem:[#allocation35_spill] sm:$0xff]  ;;  %v4934_v6 = vld [vmem:[#allocation36_spill] sm:$0xff] }
 0x1a4   :  { %v1770_v41 = vmul.f32 %v2302_v24, %v4927_v40  ;;  %v1771_v52 = vmul.f32 %v2302_v24, %v4929_v9  ;;  %2078 = vst [vmem:[#allocation8 + $0xc0] sm:$0xff] %v1982_v21  ;;  %v1570_v28 = vadd.f32 1e-12, %v1522_v35  ;;  %v1525_v4 = vmax.f32 %v1477_v54, 0.0  ;;  %v2308_v39 = vpop.eup %2307  ;;  %v4936_v21 = vld [vmem:[#allocation37_spill] sm:$0xff] }
 0x1a5   :  { %2079 = vst [vmem:[#allocation8 + $0xc8] sm:$0xff] %v1983_v36  ;;  %v1476_v38 = vsub.f32 %v1380_v3, %v4930_v29  ;;  %v1988_v16 = vadd.f32 %v3343_v43, %v1880_v8  ;;  %v1989_v13 = vadd.f32 %v3345_v49, %v1881_v47  ;;  %v4933_v33 = vsub.f32 %v4931_v27, %v4932_v17  ;;  %v4937_v36 = vld [vmem:[#allocation101_spill] sm:$0xff]  ;;  %v4939_v8 = vld [vmem:[#allocation38_spill] sm:$0xff]  ;;  %v4944_v29 = vld [vmem:[#allocation40_spill] sm:$0xff] }
 0x1a6   :  { %v1878_v22 = vmul.f32 %v3328_v61, %v1770_v41  ;;  %v1879_v25 = vmul.f32 %v3330_v15, %v1771_v52  ;;  %v4935_v35 = vsub.f32 %v4934_v6, %v4932_v17  ;;  %v4938_v54 = vsub.f32 %v4936_v21, %v4937_v36  ;;  %v4941_v41 = vld [vmem:[#allocation39_spill] sm:$0xff] }
 0x1a7   :  { %v1776_v19 = vmul.f32 %v2304_v62, %v4933_v33  ;;  %v4940_v47 = vsub.f32 %v4939_v8, %v4937_v36  ;;  %2084 = vst [vmem:[#allocation8 + $0xf0] sm:$0xff] %v1988_v16  ;;  %2085 = vst [vmem:[#allocation8 + $0xf8] sm:$0xff] %v1989_v13  ;;  %v4943_v9 = vsub.f32 %v4941_v41, %v4942_v45  ;;  %v2310_v13 = vpop.eup %2309  ;;  %2313 = vrsqrt.f32 %v1570_v28  ;;  %v4947_v8 = vld [vmem:[#allocation120_spill] sm:$0xff]  ;;  %v4949_v28 = vld [vmem:[#allocation42_spill] sm:$0xff] }
 0x1a8   :  { %v1777_v24 = vmul.f32 %v2304_v62, %v4935_v35  ;;  %v1774_v3 = vmul.f32 %v2306_v10, %v4938_v54  ;;  %v1986_v53 = vadd.f32 %v3343_v43, %v1878_v22  ;;  %v1987_v40 = vadd.f32 %v3345_v49, %v1879_v25  ;;  %v3967_v35 = vpop.xlane.xlu1 %1260 }
 0x1a9   :  { %v1775_v63 = vmul.f32 %v2306_v10, %v4940_v47  ;;  %v1780_v52 = vmul.f32 %v2308_v39, %v4943_v9  ;;  %v4945_v62 = vsub.f32 %v4944_v29, %v4942_v45  ;;  %v1884_v17 = vmul.f32 %v3328_v61, %v1776_v19 }
 0x1aa   :  { %v1885_v33 = vmul.f32 %v3330_v15, %v1777_v24  ;;  %v1882_v10 = vmul.f32 %v3328_v61, %v1774_v3  ;;  %2082 = vst [vmem:[#allocation8 + $0xe0] sm:$0xff] %v1986_v53  ;;  %2083 = vst [vmem:[#allocation8 + $0xe8] sm:$0xff] %v1987_v40  ;;  %v1573_v6 = vadd.f32 1e-12, %v1525_v4  ;;  %v4946_v3 = vld [vmem:[#allocation41_spill] sm:$0xff]  ;;  %v4950_v4 = vsub.f32 %v4949_v28, %v4947_v8  ;;  %v3981_v40 = vpop.xlane.xlu0 %1257 }
 0x1ab   :  { %v1781_v27 = vmul.f32 %v2308_v39, %v4945_v62  ;;  %v1883_v16 = vmul.f32 %v3330_v15, %v1775_v63  ;;  %v1888_v22 = vmul.f32 %v3328_v61, %v1780_v52  ;;  %v1992_v39 = vadd.f32 %v3343_v43, %v1884_v17 }
 0x1ac   :  { %v1993_v19 = vadd.f32 %v3345_v49, %v1885_v33  ;;  %v1990_v24 = vadd.f32 %v3343_v43, %v1882_v10  ;;  %v4948_v47 = vsub.f32 %v4946_v3, %v4947_v8  ;;  %v1779_v53 = vmul.f32 %v2310_v13, %v4950_v4 }
 0x1ad   :  { %v1889_v25 = vmul.f32 %v3330_v15, %v1781_v27  ;;  %v1991_v21 = vadd.f32 %v3345_v49, %v1883_v16  ;;  %v1996_v36 = vadd.f32 %v3343_v43, %v1888_v22  ;;  %2088 = vst [vmem:[#allocation8 + $0x110] sm:$0xff] %v1992_v39  ;;  %2315 = vrsqrt.f32 %v1573_v6  ;;  %v2312_v17 = vpop.eup %2311  ;;  %v4952_v22 = vld [vmem:[#allocation103_spill] sm:$0xff]  ;;  %v4954_v39 = vld [vmem:[#allocation44_spill] sm:$0xff] }
 0x1ae   :  { %v1778_v63 = vmul.f32 %v2310_v13, %v4948_v47  ;;  %2089 = vst [vmem:[#allocation8 + $0x118] sm:$0xff] %v1993_v19  ;;  %2086 = vst [vmem:[#allocation8 + $0x100] sm:$0xff] %v1990_v24  ;;  %v1524_v41 = vmax.f32 %v1476_v38, 0.0  ;;  %v1383_v45 = vmul.f32 0.00390625, %v3873_v56  ;;  %v1382_v9 = vmul.f32 0.00390625, %v3878_v34  ;;  %v4951_v13 = vld [vmem:[#allocation43_spill] sm:$0xff]  ;;  %v1267_v19 = vpop.xlane.xlu1 %1266  ;;  %v1264_v8 = vpop.xlane.xlu0 %1263 }
 0x1af   :  { %v1997_v54 = vadd.f32 %v3345_v49, %v1889_v25  ;;  %2087 = vst [vmem:[#allocation8 + $0x108] sm:$0xff] %v1991_v21  ;;  %2092 = vst [vmem:[#allocation8 + $0x130] sm:$0xff] %v1996_v36  ;;  %v1887_v29 = vmul.f32 %v3330_v15, %v1779_v53  ;;  %v1385_v62 = vmul.f32 0.00390625, %v3896_v58  ;;  %v1384_v27 = vmul.f32 0.00390625, %v3908_v60  ;;  %v4956_v21 = vld [vmem:[#allocation136_spill] sm:$0xff] }
 0x1b0   :  { %v1886_v52 = vmul.f32 %v3328_v61, %v1778_v63  ;;  %v1572_v33 = vadd.f32 1e-12, %v1524_v41  ;;  %v1479_v10 = vsub.f32 %v1383_v45, %v3520_v14  ;;  %v1478_v38 = vsub.f32 %v1382_v9, %v3531_v26 }
 0x1b1   :  { %2093 = vst [vmem:[#allocation8 + $0x138] sm:$0xff] %v1997_v54  ;;  %v1387_v56 = vmul.f32 0.00390625, %v3932_v55  ;;  %v1995_v16 = vadd.f32 %v3345_v49, %v1887_v29  ;;  %v4953_v25 = vsub.f32 %v4951_v13, %v4952_v22  ;;  %v4955_v58 = vsub.f32 %v4954_v39, %v4952_v22  ;;  %v2314_v53 = vpop.eup %2313  ;;  %v4957_v29 = vld [vmem:[#allocation45_spill] sm:$0xff]  ;;  %v4963_v39 = vld [vmem:[#allocation47_spill] sm:$0xff] }
 0x1b2   :  { %v1994_v34 = vadd.f32 %v3343_v43, %v1886_v52  ;;  %2317 = vrsqrt.f32 %v1572_v33  ;;  %v1527_v24 = vmax.f32 %v1479_v10, 0.0  ;;  %v1526_v14 = vmax.f32 %v1478_v38, 0.0 }
 0x1b3   :  { %v1784_v6 = vmul.f32 %v2312_v17, %v4953_v25  ;;  %v1785_v60 = vmul.f32 %v2312_v17, %v4955_v58  ;;  %v1481_v26 = vsub.f32 %v1385_v62, %v4956_v21  ;;  %2091 = vst [vmem:[#allocation8 + $0x128] sm:$0xff] %v1995_v16  ;;  %v1480_v54 = vsub.f32 %v1384_v27, %v3555_v46  ;;  %v4958_v62 = vld [vmem:[#allocation104_spill] sm:$0xff]  ;;  %v4960_v46 = vld [vmem:[#allocation46_spill] sm:$0xff]  ;;  %v1273_v16 = vpop.xlane.xlu1 %1272 }
 0x1b4   :  { %2090 = vst [vmem:[#allocation8 + $0x120] sm:$0xff] %v1994_v34  ;;  %v1483_v3 = vsub.f32 %v1387_v56, %v3566_v44  ;;  %v1575_v47 = vadd.f32 1e-12, %v1527_v24  ;;  %v1574_v63 = vadd.f32 1e-12, %v1526_v14  ;;  %v1386_v4 = vmul.f32 0.00390625, %v3939_v57 }
 0x1b5   :  { %v1892_v55 = vmul.f32 %v3328_v61, %v1784_v6  ;;  %v1893_v36 = vmul.f32 %v3330_v15, %v1785_v60  ;;  %v1529_v28 = vmax.f32 %v1481_v26, 0.0  ;;  %v1528_v9 = vmax.f32 %v1480_v54, 0.0  ;;  %v4962_v56 = vld [vmem:[#allocation140_spill] sm:$0xff] }
 0x1b6   :  { %v1531_v52 = vmax.f32 %v1483_v3, 0.0  ;;  %v4959_v17 = vsub.f32 %v4957_v29, %v4958_v62  ;;  %v4961_v44 = vsub.f32 %v4960_v46, %v4958_v62  ;;  %2319 = vrsqrt.f32 %v1575_v47  ;;  %v4964_v58 = vld [vmem:[#allocation124_spill] sm:$0xff]  ;;  %v4968_v62 = vld [vmem:[#allocation49_spill] sm:$0xff] }
 0x1b7   :  { %v2000_v41 = vadd.f32 %v3343_v43, %v1892_v55  ;;  %v2001_v45 = vadd.f32 %v3345_v49, %v1893_v36  ;;  %v1577_v10 = vadd.f32 1e-12, %v1529_v28  ;;  %2321 = vrsqrt.f32 %v1574_v63  ;;  %v2316_v13 = vpop.eup %2315  ;;  %v4966_v14 = vld [vmem:[#allocation48_spill] sm:$0xff]  ;;  %v1270_v36 = vpop.xlane.xlu0 %1269 }
 0x1b8   :  { %v1782_v33 = vmul.f32 %v2314_v53, %v4959_v17  ;;  %v1783_v27 = vmul.f32 %v2314_v53, %v4961_v44  ;;  %v1576_v57 = vadd.f32 1e-12, %v1528_v9  ;;  %v1579_v38 = vadd.f32 1e-12, %v1531_v52  ;;  %v4969_v17 = vld [vmem:[#allocation105_spill] sm:$0xff]  ;;  %v4971_v44 = vld [vmem:[#allocation50_spill] sm:$0xff] }
 0x1b9   :  { %2096 = vst [vmem:[#allocation8 + $0x150] sm:$0xff] %v2000_v41  ;;  %2097 = vst [vmem:[#allocation8 + $0x158] sm:$0xff] %v2001_v45  ;;  %v1482_v34 = vsub.f32 %v1386_v4, %v4962_v56  ;;  %2323 = vrsqrt.f32 %v1577_v10  ;;  %v1389_v6 = vmul.f32 0.00390625, %v3967_v35  ;;  %v4965_v60 = vsub.f32 %v4963_v39, %v4964_v58  ;;  %v4042_v10 = vpop.xlane.xlu1 %1278 }
 0x1ba   :  { %v1890_v22 = vmul.f32 %v3328_v61, %v1782_v33  ;;  %v1891_v25 = vmul.f32 %v3330_v15, %v1783_v27  ;;  %v4967_v21 = vsub.f32 %v4966_v14, %v4964_v58  ;;  %2325 = vrsqrt.f32 %v1576_v57 }
 0x1bb   :  { %v1788_v24 = vmul.f32 %v2316_v13, %v4965_v60  ;;  %v1530_v55 = vmax.f32 %v1482_v34, 0.0  ;;  %2327 = vrsqrt.f32 %v1579_v38  ;;  %v1485_v47 = vsub.f32 %v1389_v6, %v3590_v18  ;;  %v4974_v38 = vld [vmem:[#allocation145_spill] sm:$0xff]  ;;  %v4052_v6 = vpop.xlane.xlu0 %1275 }
 0x1bc   :  { %v1789_v26 = vmul.f32 %v2316_v13, %v4967_v21  ;;  %v1998_v54 = vadd.f32 %v3343_v43, %v1890_v22  ;;  %v1999_v3 = vadd.f32 %v3345_v49, %v1891_v25  ;;  %v1388_v4 = vmul.f32 0.00390625, %v3981_v40  ;;  %v2318_v53 = vpop.eup %2317  ;;  %v4975_v22 = vld [vmem:[#allocation147_spill] sm:$0xff] }
 0x1bd   :  { %v1896_v35 = vmul.f32 %v3328_v61, %v1788_v24  ;;  %v1578_v28 = vadd.f32 1e-12, %v1530_v55  ;;  %v1533_v41 = vmax.f32 %v1485_v47, 0.0  ;;  %v1391_v45 = vmul.f32 0.00390625, %v1267_v19  ;;  %v4976_v55 = vld [vmem:[#allocation51_spill] sm:$0xff]  ;;  %v4979_v47 = vld [vmem:[#allocation52_spill] sm:$0xff] }
 0x1be   :  { %v1897_v63 = vmul.f32 %v3330_v15, %v1789_v26  ;;  %2094 = vst [vmem:[#allocation8 + $0x140] sm:$0xff] %v1998_v54  ;;  %2095 = vst [vmem:[#allocation8 + $0x148] sm:$0xff] %v1999_v3  ;;  %v4030_v9 = vmul.f32 0.00390625, %v1264_v8  ;;  %v4032_v52 = vmul.f32 0.00390625, %v1273_v16  ;;  %v4970_v33 = vsub.f32 %v4968_v62, %v4969_v17  ;;  %v4973_v8 = vld [vmem:[#allocation143_spill] sm:$0xff]  ;;  %v4977_v54 = vld [vmem:[#allocation126_spill] sm:$0xff] }
 0x1bf   :  { %v2004_v29 = vadd.f32 %v3343_v43, %v1896_v35  ;;  %v4972_v40 = vsub.f32 %v4971_v44, %v4969_v17  ;;  %2329 = vrsqrt.f32 %v1578_v28  ;;  %v1581_v19 = vadd.f32 1e-12, %v1533_v41  ;;  %v4986_v44 = vld [vmem:[#allocation55_spill] sm:$0xff] }
 0x1c0   :  { %v2005_v18 = vadd.f32 %v3345_v49, %v1897_v63  ;;  %v1786_v46 = vmul.f32 %v2318_v53, %v4970_v33  ;;  %v1484_v57 = vsub.f32 %v1388_v4, %v4973_v8  ;;  %v1487_v56 = vsub.f32 %v1391_v45, %v4974_v38  ;;  %v2320_v39 = vpop.eup %2319  ;;  %v4981_v4 = vld [vmem:[#allocation53_spill] sm:$0xff]  ;;  %v4989_v8 = vld [vmem:[#allocation56_spill] sm:$0xff] }
 0x1c1   :  { %v1787_v27 = vmul.f32 %v2318_v53, %v4972_v40  ;;  %2100 = vst [vmem:[#allocation8 + $0x170] sm:$0xff] %v2004_v29  ;;  %v1486_v13 = vsub.f32 %v4030_v9, %v3624_v42  ;;  %v1489_v25 = vsub.f32 %v4032_v52, %v4975_v22  ;;  %2331 = vrsqrt.f32 %v1581_v19  ;;  %v2322_v14 = vpop.eup %2321  ;;  %v4982_v53 = vld [vmem:[#allocation127_spill] sm:$0xff]  ;;  %v4987_v40 = vld [vmem:[#allocation128_spill] sm:$0xff] }
 0x1c2   :  { %2101 = vst [vmem:[#allocation8 + $0x178] sm:$0xff] %v2005_v18  ;;  %v1894_v34 = vmul.f32 %v3328_v61, %v1786_v46  ;;  %v1532_v58 = vmax.f32 %v1484_v57, 0.0  ;;  %v1535_v60 = vmax.f32 %v1487_v56, 0.0  ;;  %v4054_v24 = vmul.f32 0.00390625, %v1270_v36  ;;  %v4984_v36 = vld [vmem:[#allocation54_spill] sm:$0xff]  ;;  %v4078_v56 = vpop.xlane.xlu1 %1284 }
 0x1c3   :  { %v1895_v16 = vmul.f32 %v3330_v15, %v1787_v27  ;;  %v4978_v3 = vsub.f32 %v4976_v55, %v4977_v54  ;;  %v4980_v35 = vsub.f32 %v4979_v47, %v4977_v54  ;;  %v2324_v28 = vpop.eup %2323  ;;  %v4983_v41 = vsub.f32 %v4981_v4, %v4982_v53 }
 0x1c4   :  { %v2002_v21 = vadd.f32 %v3343_v43, %v1894_v34  ;;  %v4985_v9 = vsub.f32 %v4984_v36, %v4982_v53  ;;  %v1580_v18 = vadd.f32 1e-12, %v1532_v58  ;;  %v1583_v62 = vadd.f32 1e-12, %v1535_v60  ;;  %v2326_v17 = vpop.eup %2325  ;;  %v4991_v58 = vld [vmem:[#allocation57_spill] sm:$0xff]  ;;  %v4992_v60 = vld [vmem:[#allocation130_spill] sm:$0xff] }
 0x1c5   :  { %v2003_v26 = vadd.f32 %v3345_v49, %v1895_v16  ;;  %v1792_v42 = vmul.f32 %v2320_v39, %v4978_v3  ;;  %v1793_v63 = vmul.f32 %v2320_v39, %v4980_v35  ;;  %v1790_v45 = vmul.f32 %v2322_v14, %v4983_v41  ;;  %v2328_v34 = vpop.eup %2327 }
 0x1c6   :  { %v1791_v29 = vmul.f32 %v2322_v14, %v4985_v9  ;;  %2098 = vst [vmem:[#allocation8 + $0x160] sm:$0xff] %v2002_v21  ;;  %v4988_v27 = vsub.f32 %v4986_v44, %v4987_v40  ;;  %v4990_v57 = vsub.f32 %v4989_v8, %v4987_v40  ;;  %v4993_v14 = vsub.f32 %v4991_v58, %v4992_v60  ;;  %v4996_v9 = vld [vmem:[#allocation59_spill] sm:$0xff]  ;;  %v5002_v58 = vld [vmem:[#allocation133_spill] sm:$0xff] }
 0x1c7   :  { %2099 = vst [vmem:[#allocation8 + $0x168] sm:$0xff] %v2003_v26  ;;  %v1900_v33 = vmul.f32 %v3328_v61, %v1792_v42  ;;  %v1901_v46 = vmul.f32 %v3330_v15, %v1793_v63  ;;  %v1898_v16 = vmul.f32 %v3328_v61, %v1790_v45  ;;  %v4994_v26 = vld [vmem:[#allocation58_spill] sm:$0xff]  ;;  %v1282_v63 = vpop.xlane.xlu0 %1281  ;;  %2333 = vrsqrt.f32 %v1580_v18 }
 0x1c8   :  { %v1796_v19 = vmul.f32 %v2324_v28, %v4988_v27  ;;  %v1797_v38 = vmul.f32 %v2324_v28, %v4990_v57  ;;  %v1899_v39 = vmul.f32 %v3330_v15, %v1791_v29  ;;  %v1794_v21 = vmul.f32 %v2326_v17, %v4993_v14  ;;  %v4997_v29 = vld [vmem:[#allocation131_spill] sm:$0xff] }
 0x1c9   :  { %v4995_v55 = vsub.f32 %v4994_v26, %v4992_v60  ;;  %v2008_v3 = vadd.f32 %v3343_v43, %v1900_v33  ;;  %v2009_v42 = vadd.f32 %v3345_v49, %v1901_v46  ;;  %v2006_v28 = vadd.f32 %v3343_v43, %v1898_v16  ;;  %v4999_v46 = vld [vmem:[#allocation60_spill] sm:$0xff]  ;;  %v2330_v27 = vpop.eup %2329 }
 0x1ca   :  { %v1904_v47 = vmul.f32 %v3328_v61, %v1796_v19  ;;  %v1905_v35 = vmul.f32 %v3330_v15, %v1797_v38  ;;  %v2007_v4 = vadd.f32 %v3345_v49, %v1899_v39  ;;  %v1902_v53 = vmul.f32 %v3328_v61, %v1794_v21  ;;  %v5001_v39 = vld [vmem:[#allocation61_spill] sm:$0xff] }
 0x1cb   :  { %v1795_v54 = vmul.f32 %v2326_v17, %v4995_v55  ;;  %2104 = vst [vmem:[#allocation8 + $0x190] sm:$0xff] %v2008_v3  ;;  %2105 = vst [vmem:[#allocation8 + $0x198] sm:$0xff] %v2009_v42  ;;  %v4998_v17 = vsub.f32 %v4996_v9, %v4997_v29  ;;  %v5000_v44 = vsub.f32 %v4999_v46, %v4997_v29  ;;  %v1534_v57 = vmax.f32 %v1486_v13, 0.0  ;;  %v1291_v55 = vpop.xlane.xlu1 %1290 }
 0x1cc   :  { %v2012_v45 = vadd.f32 %v3343_v43, %v1904_v47  ;;  %v2013_v36 = vadd.f32 %v3345_v49, %v1905_v35  ;;  %2102 = vst [vmem:[#allocation8 + $0x180] sm:$0xff] %v2006_v28  ;;  %2103 = vst [vmem:[#allocation8 + $0x188] sm:$0xff] %v2007_v4  ;;  %v2010_v19 = vadd.f32 %v3343_v43, %v1902_v53  ;;  %2335 = vrsqrt.f32 %v1583_v62  ;;  %v1288_v4 = vpop.xlane.xlu0 %1287  ;;  %v5006_v53 = vld [vmem:[#allocation63_spill] sm:$0xff] }
 0x1cd   :  { %v1903_v41 = vmul.f32 %v3330_v15, %v1795_v54  ;;  %v1800_v33 = vmul.f32 %v2328_v34, %v4998_v17  ;;  %v1801_v40 = vmul.f32 %v2328_v34, %v5000_v44  ;;  %v5003_v60 = vsub.f32 %v5001_v39, %v5002_v58  ;;  %v5004_v34 = vld [vmem:[#allocation62_spill] sm:$0xff]  ;;  %v2332_v54 = vpop.eup %2331 }
 0x1ce   :  { %2108 = vst [vmem:[#allocation8 + $0x1b0] sm:$0xff] %v2012_v45  ;;  %2109 = vst [vmem:[#allocation8 + $0x1b8] sm:$0xff] %v2013_v36  ;;  %v5005_v21 = vsub.f32 %v5004_v34, %v5002_v58  ;;  %v1582_v13 = vadd.f32 1e-12, %v1534_v57  ;;  %v1537_v18 = vmax.f32 %v1489_v25, 0.0  ;;  %v1488_v3 = vsub.f32 %v4054_v24, %v3644_v5  ;;  %v5009_v36 = vld [vmem:[#allocation64_spill] sm:$0xff] }
 0x1cf   :  { %v2011_v8 = vadd.f32 %v3345_v49, %v1903_v41  ;;  %v1908_v38 = vmul.f32 %v3328_v61, %v1800_v33  ;;  %v1909_v16 = vmul.f32 %v3330_v15, %v1801_v40  ;;  %v1798_v14 = vmul.f32 %v2330_v27, %v5003_v60  ;;  %2106 = vst [vmem:[#allocation8 + $0x1a0] sm:$0xff] %v2010_v19  ;;  %v5007_v41 = vld [vmem:[#allocation134_spill] sm:$0xff]  ;;  %v5011_v40 = vld [vmem:[#allocation149_spill] sm:$0xff]  ;;  %v1297_v57 = vpop.xlane.xlu1 %1296  ;;  %v5012_v60 = vld [vmem:[#allocation151_spill] sm:$0xff] }
 0x1d0   :  { %v1799_v26 = vmul.f32 %v2330_v27, %v5005_v21  ;;  %v5008_v62 = vsub.f32 %v5006_v53, %v5007_v41  ;;  %v5010_v52 = vsub.f32 %v5009_v36, %v5007_v41  ;;  %2337 = vrsqrt.f32 %v1582_v13  ;;  %v4142_v34 = vpop.xlane.xlu0 %1293  ;;  %v5013_v13 = vld [vmem:[#allocation65_spill] sm:$0xff]  ;;  %v5018_v36 = vld [vmem:[#allocation67_spill] sm:$0xff] }
 0x1d1   :  { %2107 = vst [vmem:[#allocation8 + $0x1a8] sm:$0xff] %v2011_v8  ;;  %v2016_v42 = vadd.f32 %v3343_v43, %v1908_v38  ;;  %v2017_v47 = vadd.f32 %v3345_v49, %v1909_v16  ;;  %v1906_v35 = vmul.f32 %v3328_v61, %v1798_v14  ;;  %v1585_v25 = vadd.f32 1e-12, %v1537_v18  ;;  %v2334_v21 = vpop.eup %2333  ;;  %v5014_v18 = vld [vmem:[#allocation135_spill] sm:$0xff] }
 0x1d2   :  { %v1907_v28 = vmul.f32 %v3330_v15, %v1799_v26  ;;  %v1804_v45 = vmul.f32 %v2332_v54, %v5008_v62  ;;  %v1805_v22 = vmul.f32 %v2332_v54, %v5010_v52  ;;  %v1536_v9 = vmax.f32 %v1488_v3, 0.0  ;;  %v5016_v3 = vld [vmem:[#allocation66_spill] sm:$0xff]  ;;  %v5019_v52 = vld [vmem:[#allocation137_spill] sm:$0xff] }
 0x1d3   :  { %2112 = vst [vmem:[#allocation8 + $0x1d0] sm:$0xff] %v2016_v42  ;;  %2113 = vst [vmem:[#allocation8 + $0x1d8] sm:$0xff] %v2017_v47  ;;  %v2014_v5 = vadd.f32 %v3343_v43, %v1906_v35  ;;  %v1395_v29 = vmul.f32 0.00390625, %v4042_v10  ;;  %2339 = vrsqrt.f32 %v1585_v25  ;;  %v1394_v46 = vmul.f32 0.00390625, %v4052_v6 }
 0x1d4   :  { %v2015_v24 = vadd.f32 %v3345_v49, %v1907_v28  ;;  %v1912_v17 = vmul.f32 %v3328_v61, %v1804_v45  ;;  %v1913_v33 = vmul.f32 %v3330_v15, %v1805_v22  ;;  %v1584_v44 = vadd.f32 1e-12, %v1536_v9 }
 0x1d5   :  { %2110 = vst [vmem:[#allocation8 + $0x1c0] sm:$0xff] %v2014_v5  ;;  %v1491_v27 = vsub.f32 %v1395_v29, %v5011_v40  ;;  %v1397_v19 = vmul.f32 0.00390625, %v4078_v56  ;;  %v1396_v8 = vmul.f32 0.00390625, %v1282_v63  ;;  %v1490_v16 = vsub.f32 %v1394_v46, %v3662_v0  ;;  %v5021_v5 = vld [vmem:[#allocation68_spill] sm:$0xff] }
 0x1d6   :  { %2111 = vst [vmem:[#allocation8 + $0x1c8] sm:$0xff] %v2015_v24  ;;  %v2020_v38 = vadd.f32 %v3343_v43, %v1912_v17  ;;  %v2021_v10 = vadd.f32 %v3345_v49, %v1913_v33  ;;  %v1399_v39 = vmul.f32 0.00390625, %v1291_v55  ;;  %2341 = vrsqrt.f32 %v1584_v44  ;;  %v2336_v28 = vpop.eup %2335  ;;  %v1303_v44 = vpop.xlane.xlu1 %1302 }
 0x1d7   :  { %v1539_v58 = vmax.f32 %v1491_v27, 0.0  ;;  %v1493_v6 = vsub.f32 %v1397_v19, %v3676_v20  ;;  %v1492_v14 = vsub.f32 %v1396_v8, %v5012_v60  ;;  %v1538_v56 = vmax.f32 %v1490_v16, 0.0  ;;  %v1300_v8 = vpop.xlane.xlu0 %1299 }
 0x1d8   :  { %2116 = vst [vmem:[#allocation8 + $0x1f0] sm:$0xff] %v2020_v38  ;;  %2117 = vst [vmem:[#allocation8 + $0x1f8] sm:$0xff] %v2021_v10  ;;  %v1495_v63 = vsub.f32 %v1399_v39, %v3697_v1  ;;  %v1398_v26 = vmul.f32 0.00390625, %v1288_v4  ;;  %v1401_v54 = vmul.f32 0.00390625, %v1297_v57  ;;  %v5015_v0 = vsub.f32 %v5013_v13, %v5014_v18  ;;  %v5023_v38 = vld [vmem:[#allocation69_spill] sm:$0xff]  ;;  %v5024_v10 = vld [vmem:[#allocation138_spill] sm:$0xff] }
 0x1d9   :  { %v5017_v42 = vsub.f32 %v5016_v3, %v5014_v18  ;;  %v1587_v47 = vadd.f32 1e-12, %v1539_v58  ;;  %v1541_v35 = vmax.f32 %v1493_v6, 0.0  ;;  %v1586_v53 = vadd.f32 1e-12, %v1538_v56  ;;  %v5026_v58 = vld [vmem:[#allocation70_spill] sm:$0xff] }
 0x1da   :  { %v1802_v55 = vmul.f32 %v2334_v21, %v5015_v0  ;;  %v1540_v41 = vmax.f32 %v1492_v14, 0.0  ;;  %v1543_v62 = vmax.f32 %v1495_v63, 0.0  ;;  %v1494_v45 = vsub.f32 %v1398_v26, %v3704_v32  ;;  %v2338_v29 = vpop.eup %2337  ;;  %v5028_v63 = vld [vmem:[#allocation71_spill] sm:$0xff]  ;;  %v5031_v0 = vld [vmem:[#allocation72_spill] sm:$0xff] }
 0x1db   :  { %v1803_v20 = vmul.f32 %v2334_v21, %v5017_v42  ;;  %v5020_v22 = vsub.f32 %v5018_v36, %v5019_v52  ;;  %v5022_v24 = vsub.f32 %v5021_v5, %v5019_v52  ;;  %2343 = vrsqrt.f32 %v1587_v47  ;;  %v5029_v26 = vld [vmem:[#allocation139_spill] sm:$0xff] }
 0x1dc   :  { %v1910_v1 = vmul.f32 %v3328_v61, %v1802_v55  ;;  %v1589_v17 = vadd.f32 1e-12, %v1541_v35  ;;  %v1588_v33 = vadd.f32 1e-12, %v1540_v41  ;;  %v1591_v46 = vadd.f32 1e-12, %v1543_v62 }
 0x1dd   :  { %v1911_v4 = vmul.f32 %v3330_v15, %v1803_v20  ;;  %v1808_v25 = vmul.f32 %v2336_v28, %v5020_v22  ;;  %v1809_v9 = vmul.f32 %v2336_v28, %v5022_v24  ;;  %v2340_v57 = vpop.eup %2339  ;;  %v5025_v16 = vsub.f32 %v5023_v38, %v5024_v10  ;;  %v5036_v22 = vld [vmem:[#allocation74_spill] sm:$0xff]  ;;  %v1309_v24 = vpop.xlane.xlu1 %1308 }
 0x1de   :  { %v2018_v32 = vadd.f32 %v3343_v43, %v1910_v1  ;;  %v5027_v6 = vsub.f32 %v5026_v58, %v5024_v10  ;;  %2345 = vrsqrt.f32 %v1586_v53  ;;  %v1542_v14 = vmax.f32 %v1494_v45, 0.0  ;;  %v5033_v1 = vld [vmem:[#allocation73_spill] sm:$0xff]  ;;  %v5038_v58 = vld [vmem:[#allocation75_spill] sm:$0xff] }
 0x1df   :  { %v2019_v40 = vadd.f32 %v3345_v49, %v1911_v4  ;;  %v1916_v27 = vmul.f32 %v3328_v61, %v1808_v25  ;;  %v1917_v19 = vmul.f32 %v3330_v15, %v1809_v9  ;;  %v1806_v39 = vmul.f32 %v2338_v29, %v5025_v16  ;;  %v5034_v4 = vld [vmem:[#allocation141_spill] sm:$0xff] }
 0x1e0   :  { %v1807_v60 = vmul.f32 %v2338_v29, %v5027_v6  ;;  %2114 = vst [vmem:[#allocation8 + $0x1e0] sm:$0xff] %v2018_v32  ;;  %v5030_v13 = vsub.f32 %v5028_v63, %v5029_v26  ;;  %v5032_v55 = vsub.f32 %v5031_v0, %v5029_v26  ;;  %2347 = vrsqrt.f32 %v1589_v17  ;;  %v2342_v35 = vpop.eup %2341  ;;  %v5039_v6 = vld [vmem:[#allocation142_spill] sm:$0xff] }
 0x1e1   :  { %2115 = vst [vmem:[#allocation8 + $0x1e8] sm:$0xff] %v2019_v40  ;;  %v2024_v21 = vadd.f32 %v3343_v43, %v1916_v27  ;;  %v2025_v56 = vadd.f32 %v3345_v49, %v1917_v19  ;;  %v1914_v42 = vmul.f32 %v3328_v61, %v1806_v39  ;;  %v1590_v47 = vadd.f32 1e-12, %v1542_v14 }
 0x1e2   :  { %v1812_v18 = vmul.f32 %v2340_v57, %v5030_v13  ;;  %v1813_v3 = vmul.f32 %v2340_v57, %v5032_v55  ;;  %v1915_v20 = vmul.f32 %v3330_v15, %v1807_v60  ;;  %2349 = vrsqrt.f32 %v1588_v33  ;;  %v5043_v55 = vld [vmem:[#allocation77_spill] sm:$0xff] }
 0x1e3   :  { %2120 = vst [vmem:[#allocation8 + $0x210] sm:$0xff] %v2024_v21  ;;  %2121 = vst [vmem:[#allocation8 + $0x218] sm:$0xff] %v2025_v56  ;;  %v1497_v41 = vsub.f32 %v1401_v54, %v3726_v48  ;;  %v2022_v62 = vadd.f32 %v3343_v43, %v1914_v42  ;;  %v5035_v36 = vsub.f32 %v5033_v1, %v5034_v4  ;;  %2351 = vrsqrt.f32 %v1591_v46  ;;  %v1306_v48 = vpop.xlane.xlu0 %1305 }
 0x1e4   :  { %v1920_v28 = vmul.f32 %v3328_v61, %v1812_v18  ;;  %v1921_v53 = vmul.f32 %v3330_v15, %v1813_v3  ;;  %v2023_v45 = vadd.f32 %v3345_v49, %v1915_v20  ;;  %v5037_v25 = vsub.f32 %v5036_v22, %v5034_v4  ;;  %v5044_v3 = vld [vmem:[#allocation144_spill] sm:$0xff]  ;;  %v5049_v22 = vld [vmem:[#allocation146_spill] sm:$0xff] }
 0x1e5   :  { %v1810_v52 = vmul.f32 %v2342_v35, %v5035_v36  ;;  %v1545_v17 = vmax.f32 %v1497_v41, 0.0  ;;  %2118 = vst [vmem:[#allocation8 + $0x200] sm:$0xff] %v2022_v62  ;;  %2353 = vrsqrt.f32 %v1590_v47  ;;  %v1400_v32 = vmul.f32 0.00390625, %v4142_v34  ;;  %v2344_v38 = vpop.eup %2343  ;;  %v5041_v34 = vld [vmem:[#allocation76_spill] sm:$0xff] }
 0x1e6   :  { %v1811_v5 = vmul.f32 %v2342_v35, %v5037_v25  ;;  %v2028_v9 = vadd.f32 %v3343_v43, %v1920_v28  ;;  %v2029_v29 = vadd.f32 %v3345_v49, %v1921_v53  ;;  %2119 = vst [vmem:[#allocation8 + $0x208] sm:$0xff] %v2023_v45  ;;  %v1403_v27 = vmul.f32 0.00390625, %v1303_v44 }
 0x1e7   :  { %v1918_v54 = vmul.f32 %v3328_v61, %v1810_v52  ;;  %v1593_v40 = vadd.f32 1e-12, %v1545_v17  ;;  %v1402_v19 = vmul.f32 0.00390625, %v1300_v8  ;;  %v1405_v57 = vmul.f32 0.00390625, %v1309_v24  ;;  %v5048_v52 = vld [vmem:[#allocation79_spill] sm:$0xff]  ;;  %v5051_v24 = vld [vmem:[#allocation80_spill] sm:$0xff] }
 0x1e8   :  { %v1919_v33 = vmul.f32 %v3330_v15, %v1811_v5  ;;  %2124 = vst [vmem:[#allocation8 + $0x230] sm:$0xff] %v2028_v9  ;;  %2125 = vst [vmem:[#allocation8 + $0x238] sm:$0xff] %v2029_v29  ;;  %v1496_v16 = vsub.f32 %v1400_v32, %v3734_v30  ;;  %v4199_v39 = vmul.f32 0.00390625, %v1306_v48  ;;  %v5040_v60 = vsub.f32 %v5038_v58, %v5039_v6  ;;  %v2346_v8 = vpop.eup %2345  ;;  %v5053_v17 = vld [vmem:[#allocation81_spill] sm:$0xff]  ;;  %v5054_v48 = vld [vmem:[#allocation148_spill] sm:$0xff] }
 0x1e9   :  { %v2026_v46 = vadd.f32 %v3343_v43, %v1918_v54  ;;  %v5042_v21 = vsub.f32 %v5041_v34, %v5039_v6  ;;  %2355 = vrsqrt.f32 %v1593_v40  ;;  %v1499_v44 = vsub.f32 %v1403_v27, %v3738_v7  ;;  %v5046_v7 = vld [vmem:[#allocation78_spill] sm:$0xff] }
 0x1ea   :  { %v2027_v10 = vadd.f32 %v3345_v49, %v1919_v33  ;;  %v1816_v14 = vmul.f32 %v2344_v38, %v5040_v60  ;;  %v1544_v63 = vmax.f32 %v1496_v16, 0.0  ;;  %v1498_v26 = vsub.f32 %v1402_v19, %v3743_v37  ;;  %v2348_v28 = vpop.eup %2347  ;;  %v5056_v32 = vld [vmem:[#allocation82_spill] sm:$0xff] }
 0x1eb   :  { %v1817_v56 = vmul.f32 %v2344_v38, %v5042_v21  ;;  %2122 = vst [vmem:[#allocation8 + $0x220] sm:$0xff] %v2026_v46  ;;  %v1501_v30 = vsub.f32 %v1405_v57, %v3747_v50  ;;  %v1500_v13 = vsub.f32 %v4199_v39, %v3757_v11  ;;  %v5045_v42 = vsub.f32 %v5043_v55, %v5044_v3  ;;  %v5071_v39 = vld [vmem:[#allocation87_spill] sm:$0xff] }
 0x1ec   :  { %2123 = vst [vmem:[#allocation8 + $0x228] sm:$0xff] %v2027_v10  ;;  %v1924_v18 = vmul.f32 %v3328_v61, %v1816_v14  ;;  %v5047_v47 = vsub.f32 %v5046_v7, %v5044_v3  ;;  %v1592_v53 = vadd.f32 1e-12, %v1544_v63  ;;  %v1547_v37 = vmax.f32 %v1499_v44, 0.0  ;;  %v2350_v62 = vpop.eup %2349  ;;  %v5058_v14 = vld [vmem:[#allocation83_spill] sm:$0xff]  ;;  %v5062_v63 = vld [vmem:[#allocation150_spill] sm:$0xff] }
 0x1ed   :  { %v1925_v0 = vmul.f32 %v3330_v15, %v1817_v56  ;;  %v1814_v20 = vmul.f32 %v2346_v8, %v5045_v42  ;;  %v1546_v41 = vmax.f32 %v1498_v26, 0.0  ;;  %v1549_v50 = vmax.f32 %v1501_v30, 0.0  ;;  %v2352_v19 = vpop.eup %2351 }
 0x1ee   :  { %v1815_v35 = vmul.f32 %v2346_v8, %v5047_v47  ;;  %v2032_v45 = vadd.f32 %v3343_v43, %v1924_v18  ;;  %v5050_v25 = vsub.f32 %v5048_v52, %v5049_v22  ;;  %v5052_v9 = vsub.f32 %v5051_v24, %v5049_v22  ;;  %v5061_v8 = vld [vmem:[#allocation85_spill] sm:$0xff]  ;;  %v5064_v18 = vld [vmem:[#allocation86_spill] sm:$0xff]  ;;  %v5068_v24 = vld [vmem:[#allocation84_spill] sm:$0xff] }
 0x1ef   :  { %v2033_v1 = vadd.f32 %v3345_v49, %v1925_v0  ;;  %v1922_v4 = vmul.f32 %v3328_v61, %v1814_v20  ;;  %v5055_v54 = vsub.f32 %v5053_v17, %v5054_v48  ;;  %v5057_v40 = vsub.f32 %v5056_v32, %v5054_v48  ;;  %v2354_v10 = vpop.eup %2353 }
 0x1f0   :  { %v1923_v36 = vmul.f32 %v3330_v15, %v1815_v35  ;;  %v1820_v5 = vmul.f32 %v2348_v28, %v5050_v25  ;;  %v1821_v29 = vmul.f32 %v2348_v28, %v5052_v9  ;;  %2128 = vst [vmem:[#allocation8 + $0x250] sm:$0xff] %v2032_v45  ;;  %2357 = vrsqrt.f32 %v1592_v53  ;;  %v5069_v9 = vld [vmem:[#allocation89_spill] sm:$0xff] }
 0x1f1   :  { %v1818_v33 = vmul.f32 %v2350_v62, %v5055_v54  ;;  %v1819_v27 = vmul.f32 %v2350_v62, %v5057_v40  ;;  %2129 = vst [vmem:[#allocation8 + $0x258] sm:$0xff] %v2033_v1  ;;  %v2030_v57 = vadd.f32 %v3343_v43, %v1922_v4  ;;  %v1595_v46 = vadd.f32 1e-12, %v1547_v37 }
 0x1f2   :  { %v2031_v38 = vadd.f32 %v3345_v49, %v1923_v36  ;;  %v1928_v16 = vmul.f32 %v3328_v61, %v1820_v5  ;;  %v1929_v58 = vmul.f32 %v3330_v15, %v1821_v29  ;;  %v5059_v34 = vsub.f32 %v5058_v14, %v3658_v23 }
 0x1f3   :  { %v1926_v6 = vmul.f32 %v3328_v61, %v1818_v33  ;;  %v1927_v60 = vmul.f32 %v3330_v15, %v1819_v27  ;;  %2126 = vst [vmem:[#allocation8 + $0x240] sm:$0xff] %v2030_v57  ;;  %v5060_v56 = vsub.f32 %v4846_v12, %v3658_v23  ;;  %v5063_v26 = vsub.f32 %v5061_v8, %v5062_v63  ;;  %v2356_v47 = vpop.eup %2355 }
 0x1f4   :  { %2127 = vst [vmem:[#allocation8 + $0x248] sm:$0xff] %v2031_v38  ;;  %v1824_v21 = vmul.f32 %v2352_v19, %v5059_v34  ;;  %v5065_v0 = vsub.f32 %v5064_v18, %v5062_v63  ;;  %v2036_v3 = vadd.f32 %v3343_v43, %v1928_v16  ;;  %v2037_v42 = vadd.f32 %v3345_v49, %v1929_v58  ;;  %v5074_v16 = vld [vmem:[#allocation88_spill] sm:$0xff]  ;;  %v5075_v58 = vld [vmem:[#allocation93_spill] sm:$0xff] }
 0x1f5   :  { %v1825_v44 = vmul.f32 %v2352_v19, %v5060_v56  ;;  %v1822_v30 = vmul.f32 %v2354_v10, %v5063_v26  ;;  %v2034_v20 = vadd.f32 %v3343_v43, %v1926_v6  ;;  %v2035_v7 = vadd.f32 %v3345_v49, %v1927_v60  ;;  %v5073_v19 = vld [vmem:[#allocation92_spill] sm:$0xff]  ;;  %v5076_v60 = vld [vmem:[#allocation94_spill] sm:$0xff] }
 0x1f6   :  { %v1823_v55 = vmul.f32 %v2354_v10, %v5065_v0  ;;  %v1932_v12 = vmul.f32 %v3328_v61, %v1824_v21  ;;  %2132 = vst [vmem:[#allocation8 + $0x270] sm:$0xff] %v2036_v3  ;;  %2133 = vst [vmem:[#allocation8 + $0x278] sm:$0xff] %v2037_v42  ;;  %v5066_v53 = vsub.f32 %v4849_v2, %v3688_v51  ;;  %2359 = vrsqrt.f32 %v1595_v46  ;;  %v5077_v18 = vld [vmem:[#allocation152_spill] sm:$0xff]  ;;  %v5078_v0 = vld [vmem:[#allocation95_spill] sm:$0xff] }
 0x1f7   :  { %v1933_v23 = vmul.f32 %v3330_v15, %v1825_v44  ;;  %v1930_v35 = vmul.f32 %v3328_v61, %v1822_v30  ;;  %2130 = vst [vmem:[#allocation8 + $0x260] sm:$0xff] %v2034_v20  ;;  %2131 = vst [vmem:[#allocation8 + $0x268] sm:$0xff] %v2035_v7  ;;  %v5067_v62 = vsub.f32 %v4850_v59, %v3688_v51  ;;  %v1594_v1 = vadd.f32 1e-12, %v1546_v41  ;;  %v5070_v41 = vld [vmem:[#allocation90_spill] sm:$0xff]  ;;  %v5079_v3 = vld [vmem:[#allocation96_spill] sm:$0xff] }
 0x1f8   :  { %v1931_v28 = vmul.f32 %v3330_v15, %v1823_v55  ;;  %v1828_v37 = vmul.f32 %v2356_v47, %v5066_v53  ;;  %v2040_v4 = vadd.f32 %v3343_v43, %v1932_v12  ;;  %v1597_v2 = vadd.f32 1e-12, %v1549_v50 }
 0x1f9   :  { %v1829_v45 = vmul.f32 %v2356_v47, %v5067_v62  ;;  %v2041_v36 = vadd.f32 %v3345_v49, %v1933_v23  ;;  %v2038_v52 = vadd.f32 %v3343_v43, %v1930_v35  ;;  %2361 = vrsqrt.f32 %v1594_v1  ;;  %v5080_v23 = vld [vmem:[#allocation97_spill] sm:$0xff] }
 0x1fa   :  { %v2039_v22 = vadd.f32 %v3345_v49, %v1931_v28  ;;  %v1936_v25 = vmul.f32 %v3328_v61, %v1828_v37  ;;  %v1730_v59 = vsub.f32 %v5069_v9, %v5068_v24  ;;  %2136 = vst [vmem:[#allocation8 + $0x290] sm:$0xff] %v2040_v4  ;;  %v1548_v51 = vmax.f32 %v1500_v13, 0.0  ;;  %v2358_v50 = vpop.eup %2357  ;;  %v5072_v13 = vld [vmem:[#allocation91_spill] sm:$0xff]  ;;  %v5081_v28 = vld [vmem:[#allocation98_spill] sm:$0xff] }
 0x1fb   :  { %v1937_v5 = vmul.f32 %v3330_v15, %v1829_v45  ;;  %2137 = vst [vmem:[#allocation8 + $0x298] sm:$0xff] %v2041_v36  ;;  %2134 = vst [vmem:[#allocation8 + $0x280] sm:$0xff] %v2038_v52  ;;  %v1731_v29 = vsub.f32 %v5070_v41, %v5068_v24  ;;  %2363 = vrsqrt.f32 %v1597_v2  ;;  %v1736_v27 = vsub.f32 %v5072_v13, %v5071_v39 }
 0x1fc   :  { %2135 = vst [vmem:[#allocation8 + $0x288] sm:$0xff] %v2039_v22  ;;  %v2044_v17 = vadd.f32 %v3343_v43, %v1936_v25  ;;  %v1596_v54 = vadd.f32 1e-12, %v1548_v51  ;;  %v1826_v33 = vmul.f32 %v2358_v50, %v1730_v59  ;;  %v1737_v57 = vsub.f32 %v5073_v19, %v5071_v39 }
 0x1fd   :  { %v2045_v48 = vadd.f32 %v3345_v49, %v1937_v5  ;;  %v1827_v32 = vmul.f32 %v2358_v50, %v1731_v29  ;;  %v1734_v6 = vsub.f32 %v5075_v58, %v5074_v16  ;;  %v1735_v14 = vsub.f32 %v5076_v60, %v5074_v16 }
 0x1fe   :  { %2140 = vst [vmem:[#allocation8 + $0x2b0] sm:$0xff] %v2044_v17  ;;  %2365 = vrsqrt.f32 %v1596_v54  ;;  %v1934_v40 = vmul.f32 %v3328_v61, %v1826_v33  ;;  %v1740_v55 = vsub.f32 %v5078_v0, %v5077_v18  ;;  %v1741_v42 = vsub.f32 %v5079_v3, %v5077_v18 }
 0x1ff   :  { %2141 = vst [vmem:[#allocation8 + $0x2b8] sm:$0xff] %v2045_v48  ;;  %v1935_v11 = vmul.f32 %v3330_v15, %v1827_v32  ;;  %v1738_v35 = vsub.f32 %v5080_v23, %v3729_v31  ;;  %v1739_v53 = vsub.f32 %v5081_v28, %v3729_v31 }
 0x200   :  { %v2360_v38 = vpop.eup %2359  ;;  %v2042_v46 = vadd.f32 %v3343_v43, %v1934_v40 }
 0x201   :  { %v2043_v10 = vadd.f32 %v3345_v49, %v1935_v11  ;;  %v1832_v34 = vmul.f32 %v2360_v38, %v1736_v27  ;;  %v1833_v21 = vmul.f32 %v2360_v38, %v1737_v57 }
 0x202   :  { %2138 = vst [vmem:[#allocation8 + $0x2a0] sm:$0xff] %v2042_v46 }
 0x203   :  { %v2362_v56 = vpop.eup %2361  ;;  %2139 = vst [vmem:[#allocation8 + $0x2a8] sm:$0xff] %v2043_v10  ;;  %v1940_v44 = vmul.f32 %v3328_v61, %v1832_v34  ;;  %v1941_v8 = vmul.f32 %v3330_v15, %v1833_v21 }
 0x204   :  { %v1830_v63 = vmul.f32 %v2362_v56, %v1734_v6  ;;  %v1831_v26 = vmul.f32 %v2362_v56, %v1735_v14 }
 0x205   :  { %v2364_v30 = vpop.eup %2363  ;;  %v2048_v20 = vadd.f32 %v3343_v43, %v1940_v44  ;;  %v2049_v7 = vadd.f32 %v3345_v49, %v1941_v8 }
 0x206   :  { %v1938_v47 = vmul.f32 %v3328_v61, %v1830_v63  ;;  %v1939_v12 = vmul.f32 %v3330_v15, %v1831_v26  ;;  %v1836_v37 = vmul.f32 %v2364_v30, %v1740_v55  ;;  %v1837_v62 = vmul.f32 %v2364_v30, %v1741_v42 }
 0x207   :  { %2144 = vst [vmem:[#allocation8 + $0x2d0] sm:$0xff] %v2048_v20  ;;  %2145 = vst [vmem:[#allocation8 + $0x2d8] sm:$0xff] %v2049_v7 }
 0x208   :  { %v2366_v45 = vpop.eup %2365  ;;  %v2046_v1 = vadd.f32 %v3343_v43, %v1938_v47  ;;  %v2047_v4 = vadd.f32 %v3345_v49, %v1939_v12  ;;  %v1944_v36 = vmul.f32 %v3328_v61, %v1836_v37  ;;  %v1945_v52 = vmul.f32 %v3330_v15, %v1837_v62 }
 0x209   :  { %v1834_v22 = vmul.f32 %v2366_v45, %v1738_v35  ;;  %v1835_v25 = vmul.f32 %v2366_v45, %v1739_v53 }
 0x20a   :  { %2142 = vst [vmem:[#allocation8 + $0x2c0] sm:$0xff] %v2046_v1  ;;  %2143 = vst [vmem:[#allocation8 + $0x2c8] sm:$0xff] %v2047_v4  ;;  %v2052_v31 = vadd.f32 %v3343_v43, %v1944_v36  ;;  %v2053_v5 = vadd.f32 %v3345_v49, %v1945_v52 }
 0x20b   :  { %v1942_v2 = vmul.f32 %v3328_v61, %v1834_v22  ;;  %v1943_v24 = vmul.f32 %v3330_v15, %v1835_v25 }
 0x20c   :  { %2148 = vst [vmem:[#allocation8 + $0x2f0] sm:$0xff] %v2052_v31  ;;  %2149 = vst [vmem:[#allocation8 + $0x2f8] sm:$0xff] %v2053_v5 }
 0x20d   :  { %v2050_v9 = vadd.f32 %v3343_v43, %v1942_v2  ;;  %v2051_v59 = vadd.f32 %v3345_v49, %v1943_v24 }
 0x20f   :  { %2146 = vst [vmem:[#allocation8 + $0x2e0] sm:$0xff] %v2050_v9  ;;  %2147 = vst [vmem:[#allocation8 + $0x2e8] sm:$0xff] %v2051_v59 }
 0x210   :  { %2444 = shalt.err (!%p2441_p0)
}
 0x211   :  { %s2445_s12 = scalar_lea.hbm %s4339_s5, 12288 }
 0x212   :  { %p2446_p1 = scmp.ne.s32.totalorder %s4339_s5, %s2445_s12  ;;  %p2449_p2 = scmp.lt.u32.totalorder %s2445_s12, %s4339_s5 }
 0x214   :  { %p2451_p3 = pnand %p2449_p2, %p2446_p1 }
 0x216   :  { %2454 = shalt.err (!%p2451_p3)
}
 0x217   :  { %2161 = dma.vmem_to_hbm [thread:$0]  %s2156_s8, 12288, %s4339_s5, [#allocation4], %s2463_s30, %s2463_s30, %s2464_s6  }
 0x218   :  { %2459 = dma.done.wait [#allocation4], 12288  }
 0x219   :  { %2460 = vsyncadd [#allocation4], 4294955008 }
 0x21a   :  { %2165 = vsyncpa [#allocation3], 1 }
 0x21b   :  { %2166 = vsyncpa [#allocation6], 1 }
 0x21c   :  { %2167 = vsyncpa [#allocation4], 1 }

</bundles_post_ra>
